<compile_context>
chip_gen: v5e
topology: v5e:2x2
jax: 0.10.0
libtpu: 0.0.40
codegen_flags: <defaults>
</compile_context>

<pallas_src>
import jax
import jax.numpy as jnp
import numpy as np
from jax.experimental import pallas as pl
from jax.experimental.pallas import tpu as pltpu

NEG_SLOPE = 0.01   # nn.LeakyReLU default negative_slope
BN_EPS = 1e-5      # nn.BatchNorm2d default eps


def _round_up(x, m):
    return (x + m - 1) // m * m


def _leaky_relu(x):
    return jnp.where(x > 0, x, NEG_SLOPE * x)


# ----------------------------------------------------------------------------
# Fused kernel: one grid step == one image (full H x W x C_pad tile in VMEM).
# ----------------------------------------------------------------------------
def _ff_kernel(x_ref, w1_ref, b1_ref, dw_ref, b2_ref, w3_ref, b3_ref,
               out_ref, pad_ref):
    H = out_ref.shape[1]
    W = out_ref.shape[2]
    Cmid = pad_ref.shape[2]

    x = x_ref[0].astype(jnp.float32)                       # (H, W, Cin_p)
    cin = x.shape[-1]

    # ---- stage 1: 1x1 conv (MXU matmul) + folded BN + LeakyReLU --------------
    h1 = jnp.dot(x.reshape(H * W, cin), w1_ref[...],
                 preferred_element_type=jnp.float32,
                 precision=jax.lax.Precision.HIGHEST)      # (H*W, Cmid) f32
    h1 = _leaky_relu(h1 + b1_ref[...])

    # ---- stage 2: depthwise 3x3, padding=1, as 9 shifted VPU FMAs ------------
    # Halo-padded VMEM tile: zero border == the conv's zero padding.
    pad_ref[...] = jnp.zeros_like(pad_ref)
    pad_ref[1:H + 1, 1:W + 1, :] = h1.reshape(H, W, Cmid)

    acc = jnp.zeros((H, W, Cmid), jnp.float32)
    for dy in range(3):
        for dx in range(3):
            idx = dy * 3 + dx
            tap = dw_ref[idx:idx + 1, :].reshape(1, 1, Cmid)   # per-channel tap
            acc = acc + pad_ref[dy:dy + H, dx:dx + W, :] * tap
    h2 = _leaky_relu(acc + b2_ref[...].reshape(1, 1, Cmid))   # (H, W, Cmid) f32

    # ---- stage 3: 1x1 conv (MXU matmul) + folded BN + residual + LeakyReLU ---
    y = jnp.dot(h2.reshape(H * W, Cmid), w3_ref[...],
                preferred_element_type=jnp.float32,
                precision=jax.lax.Precision.HIGHEST)       # (H*W, Cout_p)
    y = (y + b3_ref[...]).reshape(H, W, -1) + x            # residual in f32
    out_ref[0] = _leaky_relu(y).astype(out_ref.dtype)


# ----------------------------------------------------------------------------
# Host wrapper: folds BN, pads channels to 128, launches the fused kernel.
# ----------------------------------------------------------------------------
def _fold_bn(w, b, gamma, beta, mean, var, eps=BN_EPS):
    """Fold inference-mode BatchNorm into the preceding conv.
    `w` has the conv's OUTPUT channels as its LAST axis; `b` is (C_out,)."""
    scale = gamma / jnp.sqrt(var + eps)
    return w * scale, (b - mean) * scale + beta


def feed_forward_pallas(x_nchw, params):
    """Pallas implementation of feed_forward.forward (NCHW in / NCHW out)."""
    N, Cin, H, W = x_nchw.shape
    Cmid = params["conv1_w"].shape[0]
    Cin_p = _round_up(Cin, 128)
    Cmid_p = _round_up(Cmid, 128)

    # NCHW -> NHWC once at the boundary (channels land on TPU lanes).
    x = jnp.transpose(x_nchw, (0, 2, 3, 1)).astype(jnp.float32)
    x = jnp.pad(x, ((0, 0), (0, 0), (0, 0), (0, Cin_p - Cin)))

    # Fold BN (running stats) into the convs, reshape for matmul / stencil use.
    w1 = params["conv1_w"][:, :, 0, 0].T                         # (Cin, Cmid)
    w1, b1 = _fold_bn(w1, params["conv1_b"],
                      params["bn1_gamma"], params["bn1_beta"],
                      params["bn1_mean"], params["bn1_var"])
    wd = params["dw_w"][:, 0, :, :].reshape(Cmid, 9).T           # (9, Cmid)
    wd, b2 = _fold_bn(wd, params["dw_b"],
                      params["bn2_gamma"], params["bn2_beta"],
                      params["bn2_mean"], params["bn2_var"])
    w3 = params["conv3_w"][:, :, 0, 0].T                         # (Cmid, Cin)
    w3, b3 = _fold_bn(w3, params["conv3_b"],
                      params["bn3_gamma"], params["bn3_beta"],
                      params["bn3_mean"], params["bn3_var"])

    # Zero-pad channel dims to lane multiples (padded lanes stay exactly 0
    # through every stage, so they never contaminate real channels).
    w1p = jnp.zeros((Cin_p, Cmid_p), jnp.float32).at[:Cin, :Cmid].set(w1)
    wdp = jnp.zeros((9, Cmid_p), jnp.float32).at[:, :Cmid].set(wd)
    w3p = jnp.zeros((Cmid_p, Cin_p), jnp.float32).at[:Cmid, :Cin].set(w3)
    b1p = jnp.zeros((1, Cmid_p), jnp.float32).at[0, :Cmid].set(b1)
    b2p = jnp.zeros((1, Cmid_p), jnp.float32).at[0, :Cmid].set(b2)
    b3p = jnp.zeros((1, Cin_p), jnp.float32).at[0, :Cin].set(b3)

    out = pl.pallas_call(
        _ff_kernel,
        out_shape=jax.ShapeDtypeStruct((N, H, W, Cin_p), jnp.float32),
        grid_spec=pltpu.PrefetchScalarGridSpec(
            num_scalar_prefetch=0,
            grid=(N,),
            in_specs=[
                pl.BlockSpec((1, H, W, Cin_p), lambda n: (n, 0, 0, 0)),   # x / residual
                pl.BlockSpec((Cin_p, Cmid_p), lambda n: (0, 0)),          # w1 (resident)
                pl.BlockSpec((1, Cmid_p), lambda n: (0, 0)),              # b1
                pl.BlockSpec((9, Cmid_p), lambda n: (0, 0)),              # depthwise taps
                pl.BlockSpec((1, Cmid_p), lambda n: (0, 0)),              # b2
                pl.BlockSpec((Cmid_p, Cin_p), lambda n: (0, 0)),          # w3 (resident)
                pl.BlockSpec((1, Cin_p), lambda n: (0, 0)),               # b3
            ],
            out_specs=pl.BlockSpec((1, H, W, Cin_p), lambda n: (n, 0, 0, 0)),
            scratch_shapes=[pltpu.VMEM((H + 2, W + 2, Cmid_p), jnp.float32)],
        ),
        compiler_params=pltpu.CompilerParams(
            dimension_semantics=("parallel",),
        ),
    )(x, w1p, b1p, wdp, b2p, w3p, b3p)

    # Drop channel padding, return NCHW to match the PyTorch module.
    return jnp.transpose(out[..., :Cin], (0, 3, 1, 2))


# ----------------------------------------------------------------------------
# Pure-JAX reference (mirrors the PyTorch module, inference-mode BN).
# ----------------------------------------------------------------------------
def feed_forward_reference(x_nchw, params):
    x = jnp.transpose(x_nchw, (0, 2, 3, 1)).astype(jnp.float32)   # NHWC
    N, H, W, Cin = x.shape

    def bn(h, g, b, m, v):
        return (h - m) / jnp.sqrt(v + BN_EPS) * g + b

    h = jnp.einsum("nhwc,oc->nhwo", x, params["conv1_w"][:, :, 0, 0],
                   precision=jax.lax.Precision.HIGHEST) + params["conv1_b"]
    h = _leaky_relu(bn(h, params["bn1_gamma"], params["bn1_beta"],
                       params["bn1_mean"], params["bn1_var"]))

    hp = jnp.pad(h, ((0, 0), (1, 1), (1, 1), (0, 0)))
    acc = jnp.zeros_like(h)
    wdw = params["dw_w"][:, 0, :, :]                               # (Cmid, 3, 3)
    for dy in range(3):
        for dx in range(3):
            acc = acc + hp[:, dy:dy + H, dx:dx + W, :] * wdw[:, dy, dx]
    h = acc + params["dw_b"]
    h = _leaky_relu(bn(h, params["bn2_gamma"], params["bn2_beta"],
                       params["bn2_mean"], params["bn2_var"]))

    y = jnp.einsum("nhwc,oc->nhwo", h, params["conv3_w"][:, :, 0, 0],
                   precision=jax.lax.Precision.HIGHEST) + params["conv3_b"]
    y = bn(y, params["bn3_gamma"], params["bn3_beta"],
           params["bn3_mean"], params["bn3_var"])
    y = _leaky_relu(y + x)
    return jnp.transpose(y, (0, 3, 1, 2))


if __name__ == "__main__":
    key = jax.random.PRNGKey(0)
    N, Cin, H, W = 2, 4, 16, 16
    expand = 4
    Cmid = Cin * expand

    ks = jax.random.split(key, 4)
    # kaiming_normal_(a=1): std = sqrt(2 / (1 + a^2) / fan_in) = 1/sqrt(fan_in)
    conv1_w = jax.random.normal(ks[0], (Cmid, Cin, 1, 1), jnp.float32) / np.sqrt(Cin)
    dw_w = jax.random.normal(ks[1], (Cmid, 1, 3, 3), jnp.float32) / np.sqrt(9.0)
    conv3_w = jax.random.normal(ks[2], (Cin, Cmid, 1, 1), jnp.float32) / np.sqrt(Cmid)
    x = jax.random.normal(ks[3], (N, Cin, H, W), jnp.float32)

    params = dict(
        conv1_w=conv1_w, conv1_b=jnp.zeros((Cmid,), jnp.float32),
        bn1_gamma=jnp.ones((Cmid,), jnp.float32), bn1_beta=jnp.zeros((Cmid,), jnp.float32),
        bn1_mean=jnp.zeros((Cmid,), jnp.float32), bn1_var=jnp.ones((Cmid,), jnp.float32),
        dw_w=dw_w, dw_b=jnp.zeros((Cmid,), jnp.float32),
        bn2_gamma=jnp.ones((Cmid,), jnp.float32), bn2_beta=jnp.zeros((Cmid,), jnp.float32),
        bn2_mean=jnp.zeros((Cmid,), jnp.float32), bn2_var=jnp.ones((Cmid,), jnp.float32),
        conv3_w=conv3_w, conv3_b=jnp.zeros((Cin,), jnp.float32),
        bn3_gamma=jnp.ones((Cin,), jnp.float32), bn3_beta=jnp.zeros((Cin,), jnp.float32),
        bn3_mean=jnp.zeros((Cin,), jnp.float32), bn3_var=jnp.ones((Cin,), jnp.float32),
    )

    out = jax.jit(feed_forward_pallas)(x, params)
    out = jax.block_until_ready(out)

    ref = feed_forward_reference(x, params)
    np.testing.assert_allclose(np.asarray(out), np.asarray(ref), rtol=5e-3, atol=5e-3)

    print("KERNEL_OK")
</pallas_src>

<mosaic_0001>
module attributes {stable_mosaic.version = 11 : i64} {
  func.func @_ff_kernel(%arg0: i32, %arg1: memref<1x16x16x128xf32, #tpu.memory_space<vmem>>, %arg2: memref<128x128xf32, #tpu.memory_space<vmem>>, %arg3: memref<1x128xf32, #tpu.memory_space<vmem>>, %arg4: memref<9x128xf32, #tpu.memory_space<vmem>>, %arg5: memref<1x128xf32, #tpu.memory_space<vmem>>, %arg6: memref<128x128xf32, #tpu.memory_space<vmem>>, %arg7: memref<1x128xf32, #tpu.memory_space<vmem>>, %arg8: memref<1x16x16x128xf32, #tpu.memory_space<vmem>>, %arg9: memref<18x18x128xf32, #tpu.memory_space<vmem>>) attributes {dimension_semantics = [#tpu.dimension_semantics<parallel>], iteration_bounds = array<i64: 2>, scalar_prefetch = 0 : i64, scratch_operands = 1 : i64, tpu.core_type = #tpu.core_type<tc>, window_params = [{transform_indices = @transform_0, window_bounds = array<i64: 1, 16, 16, 128>}, {pipeline_mode = #tpu.pipeline_mode<synchronous>, transform_indices = @transform_1, window_bounds = array<i64: 128, 128>}, {pipeline_mode = #tpu.pipeline_mode<synchronous>, transform_indices = @transform_2, window_bounds = array<i64: 1, 128>}, {pipeline_mode = #tpu.pipeline_mode<synchronous>, transform_indices = @transform_3, window_bounds = array<i64: 9, 128>}, {pipeline_mode = #tpu.pipeline_mode<synchronous>, transform_indices = @transform_4, window_bounds = array<i64: 1, 128>}, {pipeline_mode = #tpu.pipeline_mode<synchronous>, transform_indices = @transform_5, window_bounds = array<i64: 128, 128>}, {pipeline_mode = #tpu.pipeline_mode<synchronous>, transform_indices = @transform_6, window_bounds = array<i64: 1, 128>}, {transform_indices = @transform_7, window_bounds = array<i64: 1, 16, 16, 128>}]} {
    %c0 = arith.constant 0 : index
    %c0_0 = arith.constant 0 : index
    %c0_1 = arith.constant 0 : index
    %c0_2 = arith.constant 0 : index
    %0 = vector.load %arg1[%c0, %c0_0, %c0_1, %c0_2] : memref<1x16x16x128xf32, #tpu.memory_space<vmem>>, vector<1x16x16x128xf32>
    %1 = vector.shape_cast %0 : vector<1x16x16x128xf32> to vector<16x16x128xf32>
    %2 = vector.shape_cast %1 : vector<16x16x128xf32> to vector<256x128xf32>
    %c0_3 = arith.constant 0 : index
    %c0_4 = arith.constant 0 : index
    %3 = vector.load %arg2[%c0_3, %c0_4] : memref<128x128xf32, #tpu.memory_space<vmem>>, vector<128x128xf32>
    %cst = arith.constant dense<0.000000e+00> : vector<256x128xf32>
    %4 = tpu.matmul %2, %3, %cst {dimension_numbers = #tpu.dot_dimension_numbers<[1], [0], [0], [1], [0, 0, 1, 1], [], []>, precision = #tpu.contract_precision<fp32>} : vector<256x128xf32>, vector<128x128xf32>, vector<256x128xf32> -> vector<256x128xf32>
    %c0_5 = arith.constant 0 : index
    %c0_6 = arith.constant 0 : index
    %5 = vector.load %arg3[%c0_5, %c0_6] : memref<1x128xf32, #tpu.memory_space<vmem>>, vector<1x128xf32>
    %6 = vector.broadcast %5 : vector<1x128xf32> to vector<256x128xf32>
    %7 = arith.addf %4, %6 : vector<256x128xf32>
    %cst_7 = arith.constant 0.000000e+00 : f32
    %8 = vector.broadcast %cst_7 : f32 to vector<256x128xf32>
    %9 = arith.cmpf ogt, %7, %8 : vector<256x128xf32>
    %cst_8 = arith.constant 0.00999999977 : f32
    %10 = vector.broadcast %cst_8 : f32 to vector<256x128xf32>
    %11 = arith.mulf %10, %7 : vector<256x128xf32>
    %12 = arith.select %9, %7, %11 : vector<256x128xi1>, vector<256x128xf32>
    %cst_9 = arith.constant 0.000000e+00 : f32
    %13 = vector.broadcast %cst_9 : f32 to vector<18x18x128xf32>
    %c0_10 = arith.constant 0 : index
    %c0_11 = arith.constant 0 : index
    %c0_12 = arith.constant 0 : index
    %14 = vector.load %arg9[%c0_10, %c0_11, %c0_12] : memref<18x18x128xf32, #tpu.memory_space<vmem>>, vector<18x18x128xf32>
    tpu.vector_store %arg9[%c0_10, %c0_11, %c0_12], %13 {strides = array<i32>} : memref<18x18x128xf32, #tpu.memory_space<vmem>>, vector<18x18x128xf32>,
    %15 = vector.shape_cast %12 : vector<256x128xf32> to vector<16x16x128xf32>
    %c1 = arith.constant 1 : index
    %c1_13 = arith.constant 1 : index
    %c0_14 = arith.constant 0 : index
    %16 = vector.load %arg9[%c1, %c1_13, %c0_14] : memref<18x18x128xf32, #tpu.memory_space<vmem>>, vector<16x16x128xf32>
    tpu.vector_store %arg9[%c1, %c1_13, %c0_14], %15 {strides = array<i32>} : memref<18x18x128xf32, #tpu.memory_space<vmem>>, vector<16x16x128xf32>,
    %cst_15 = arith.constant 0.000000e+00 : f32
    %17 = vector.broadcast %cst_15 : f32 to vector<16x16x128xf32>
    %c0_16 = arith.constant 0 : index
    %c0_17 = arith.constant 0 : index
    %18 = vector.load %arg4[%c0_16, %c0_17] : memref<9x128xf32, #tpu.memory_space<vmem>>, vector<1x128xf32>
    %19 = vector.shape_cast %18 : vector<1x128xf32> to vector<1x1x128xf32>
    %c0_18 = arith.constant 0 : index
    %c0_19 = arith.constant 0 : index
    %c0_20 = arith.constant 0 : index
    %20 = vector.load %arg9[%c0_18, %c0_19, %c0_20] : memref<18x18x128xf32, #tpu.memory_space<vmem>>, vector<16x16x128xf32>
    %21 = vector.broadcast %19 : vector<1x1x128xf32> to vector<16x16x128xf32>
    %22 = arith.mulf %20, %21 : vector<16x16x128xf32>
    %23 = arith.addf %17, %22 : vector<16x16x128xf32>
    %c1_21 = arith.constant 1 : index
    %c0_22 = arith.constant 0 : index
    %24 = vector.load %arg4[%c1_21, %c0_22] : memref<9x128xf32, #tpu.memory_space<vmem>>, vector<1x128xf32>
    %25 = vector.shape_cast %24 : vector<1x128xf32> to vector<1x1x128xf32>
    %c0_23 = arith.constant 0 : index
    %c1_24 = arith.constant 1 : index
    %c0_25 = arith.constant 0 : index
    %26 = vector.load %arg9[%c0_23, %c1_24, %c0_25] : memref<18x18x128xf32, #tpu.memory_space<vmem>>, vector<16x16x128xf32>
    %27 = vector.broadcast %25 : vector<1x1x128xf32> to vector<16x16x128xf32>
    %28 = arith.mulf %26, %27 : vector<16x16x128xf32>
    %29 = arith.addf %23, %28 : vector<16x16x128xf32>
    %c2 = arith.constant 2 : index
    %c0_26 = arith.constant 0 : index
    %30 = vector.load %arg4[%c2, %c0_26] : memref<9x128xf32, #tpu.memory_space<vmem>>, vector<1x128xf32>
    %31 = vector.shape_cast %30 : vector<1x128xf32> to vector<1x1x128xf32>
    %c0_27 = arith.constant 0 : index
    %c2_28 = arith.constant 2 : index
    %c0_29 = arith.constant 0 : index
    %32 = vector.load %arg9[%c0_27, %c2_28, %c0_29] : memref<18x18x128xf32, #tpu.memory_space<vmem>>, vector<16x16x128xf32>
    %33 = vector.broadcast %31 : vector<1x1x128xf32> to vector<16x16x128xf32>
    %34 = arith.mulf %32, %33 : vector<16x16x128xf32>
    %35 = arith.addf %29, %34 : vector<16x16x128xf32>
    %c3 = arith.constant 3 : index
    %c0_30 = arith.constant 0 : index
    %36 = vector.load %arg4[%c3, %c0_30] : memref<9x128xf32, #tpu.memory_space<vmem>>, vector<1x128xf32>
    %37 = vector.shape_cast %36 : vector<1x128xf32> to vector<1x1x128xf32>
    %c1_31 = arith.constant 1 : index
    %c0_32 = arith.constant 0 : index
    %c0_33 = arith.constant 0 : index
    %38 = vector.load %arg9[%c1_31, %c0_32, %c0_33] : memref<18x18x128xf32, #tpu.memory_space<vmem>>, vector<16x16x128xf32>
    %39 = vector.broadcast %37 : vector<1x1x128xf32> to vector<16x16x128xf32>
    %40 = arith.mulf %38, %39 : vector<16x16x128xf32>
    %41 = arith.addf %35, %40 : vector<16x16x128xf32>
    %c4 = arith.constant 4 : index
    %c0_34 = arith.constant 0 : index
    %42 = vector.load %arg4[%c4, %c0_34] : memref<9x128xf32, #tpu.memory_space<vmem>>, vector<1x128xf32>
    %43 = vector.shape_cast %42 : vector<1x128xf32> to vector<1x1x128xf32>
    %c1_35 = arith.constant 1 : index
    %c1_36 = arith.constant 1 : index
    %c0_37 = arith.constant 0 : index
    %44 = vector.load %arg9[%c1_35, %c1_36, %c0_37] : memref<18x18x128xf32, #tpu.memory_space<vmem>>, vector<16x16x128xf32>
    %45 = vector.broadcast %43 : vector<1x1x128xf32> to vector<16x16x128xf32>
    %46 = arith.mulf %44, %45 : vector<16x16x128xf32>
    %47 = arith.addf %41, %46 : vector<16x16x128xf32>
    %c5 = arith.constant 5 : index
    %c0_38 = arith.constant 0 : index
    %48 = vector.load %arg4[%c5, %c0_38] : memref<9x128xf32, #tpu.memory_space<vmem>>, vector<1x128xf32>
    %49 = vector.shape_cast %48 : vector<1x128xf32> to vector<1x1x128xf32>
    %c1_39 = arith.constant 1 : index
    %c2_40 = arith.constant 2 : index
    %c0_41 = arith.constant 0 : index
    %50 = vector.load %arg9[%c1_39, %c2_40, %c0_41] : memref<18x18x128xf32, #tpu.memory_space<vmem>>, vector<16x16x128xf32>
    %51 = vector.broadcast %49 : vector<1x1x128xf32> to vector<16x16x128xf32>
    %52 = arith.mulf %50, %51 : vector<16x16x128xf32>
    %53 = arith.addf %47, %52 : vector<16x16x128xf32>
    %c6 = arith.constant 6 : index
    %c0_42 = arith.constant 0 : index
    %54 = vector.load %arg4[%c6, %c0_42] : memref<9x128xf32, #tpu.memory_space<vmem>>, vector<1x128xf32>
    %55 = vector.shape_cast %54 : vector<1x128xf32> to vector<1x1x128xf32>
    %c2_43 = arith.constant 2 : index
    %c0_44 = arith.constant 0 : index
    %c0_45 = arith.constant 0 : index
    %56 = vector.load %arg9[%c2_43, %c0_44, %c0_45] : memref<18x18x128xf32, #tpu.memory_space<vmem>>, vector<16x16x128xf32>
    %57 = vector.broadcast %55 : vector<1x1x128xf32> to vector<16x16x128xf32>
    %58 = arith.mulf %56, %57 : vector<16x16x128xf32>
    %59 = arith.addf %53, %58 : vector<16x16x128xf32>
    %c7 = arith.constant 7 : index
    %c0_46 = arith.constant 0 : index
    %60 = vector.load %arg4[%c7, %c0_46] : memref<9x128xf32, #tpu.memory_space<vmem>>, vector<1x128xf32>
    %61 = vector.shape_cast %60 : vector<1x128xf32> to vector<1x1x128xf32>
    %c2_47 = arith.constant 2 : index
    %c1_48 = arith.constant 1 : index
    %c0_49 = arith.constant 0 : index
    %62 = vector.load %arg9[%c2_47, %c1_48, %c0_49] : memref<18x18x128xf32, #tpu.memory_space<vmem>>, vector<16x16x128xf32>
    %63 = vector.broadcast %61 : vector<1x1x128xf32> to vector<16x16x128xf32>
    %64 = arith.mulf %62, %63 : vector<16x16x128xf32>
    %65 = arith.addf %59, %64 : vector<16x16x128xf32>
    %c8 = arith.constant 8 : index
    %c0_50 = arith.constant 0 : index
    %66 = vector.load %arg4[%c8, %c0_50] : memref<9x128xf32, #tpu.memory_space<vmem>>, vector<1x128xf32>
    %67 = vector.shape_cast %66 : vector<1x128xf32> to vector<1x1x128xf32>
    %c2_51 = arith.constant 2 : index
    %c2_52 = arith.constant 2 : index
    %c0_53 = arith.constant 0 : index
    %68 = vector.load %arg9[%c2_51, %c2_52, %c0_53] : memref<18x18x128xf32, #tpu.memory_space<vmem>>, vector<16x16x128xf32>
    %69 = vector.broadcast %67 : vector<1x1x128xf32> to vector<16x16x128xf32>
    %70 = arith.mulf %68, %69 : vector<16x16x128xf32>
    %71 = arith.addf %65, %70 : vector<16x16x128xf32>
    %c0_54 = arith.constant 0 : index
    %c0_55 = arith.constant 0 : index
    %72 = vector.load %arg5[%c0_54, %c0_55] : memref<1x128xf32, #tpu.memory_space<vmem>>, vector<1x128xf32>
    %73 = vector.shape_cast %72 : vector<1x128xf32> to vector<1x1x128xf32>
    %74 = vector.broadcast %73 : vector<1x1x128xf32> to vector<16x16x128xf32>
    %75 = arith.addf %71, %74 : vector<16x16x128xf32>
    %cst_56 = arith.constant 0.000000e+00 : f32
    %76 = vector.broadcast %cst_56 : f32 to vector<16x16x128xf32>
    %77 = arith.cmpf ogt, %75, %76 : vector<16x16x128xf32>
    %cst_57 = arith.constant 0.00999999977 : f32
    %78 = vector.broadcast %cst_57 : f32 to vector<16x16x128xf32>
    %79 = arith.mulf %78, %75 : vector<16x16x128xf32>
    %80 = arith.select %77, %75, %79 : vector<16x16x128xi1>, vector<16x16x128xf32>
    %81 = vector.shape_cast %80 : vector<16x16x128xf32> to vector<256x128xf32>
    %c0_58 = arith.constant 0 : index
    %c0_59 = arith.constant 0 : index
    %82 = vector.load %arg6[%c0_58, %c0_59] : memref<128x128xf32, #tpu.memory_space<vmem>>, vector<128x128xf32>
    %cst_60 = arith.constant dense<0.000000e+00> : vector<256x128xf32>
    %83 = tpu.matmul %81, %82, %cst_60 {dimension_numbers = #tpu.dot_dimension_numbers<[1], [0], [0], [1], [0, 0, 1, 1], [], []>, precision = #tpu.contract_precision<fp32>} : vector<256x128xf32>, vector<128x128xf32>, vector<256x128xf32> -> vector<256x128xf32>
    %c0_61 = arith.constant 0 : index
    %c0_62 = arith.constant 0 : index
    %84 = vector.load %arg7[%c0_61, %c0_62] : memref<1x128xf32, #tpu.memory_space<vmem>>, vector<1x128xf32>
    %85 = vector.broadcast %84 : vector<1x128xf32> to vector<256x128xf32>
    %86 = arith.addf %83, %85 : vector<256x128xf32>
    %87 = vector.shape_cast %86 : vector<256x128xf32> to vector<16x16x128xf32>
    %88 = arith.addf %87, %1 : vector<16x16x128xf32>
    %cst_63 = arith.constant 0.000000e+00 : f32
    %89 = vector.broadcast %cst_63 : f32 to vector<16x16x128xf32>
    %90 = arith.cmpf ogt, %88, %89 : vector<16x16x128xf32>
    %cst_64 = arith.constant 0.00999999977 : f32
    %91 = vector.broadcast %cst_64 : f32 to vector<16x16x128xf32>
    %92 = arith.mulf %91, %88 : vector<16x16x128xf32>
    %93 = arith.select %90, %88, %92 : vector<16x16x128xi1>, vector<16x16x128xf32>
    %c0_65 = arith.constant 0 : index
    %c0_66 = arith.constant 0 : index
    %c0_67 = arith.constant 0 : index
    %c0_68 = arith.constant 0 : index
    %94 = vector.load %arg8[%c0_65, %c0_66, %c0_67, %c0_68] : memref<1x16x16x128xf32, #tpu.memory_space<vmem>>, vector<1x16x16x128xf32>
    %95 = vector.shape_cast %94 : vector<1x16x16x128xf32> to vector<16x16x128xf32>
    %96 = vector.shape_cast %93 : vector<16x16x128xf32> to vector<1x16x16x128xf32>
    tpu.vector_store %arg8[%c0_65, %c0_66, %c0_67, %c0_68], %96 {strides = array<i32>} : memref<1x16x16x128xf32, #tpu.memory_space<vmem>>, vector<1x16x16x128xf32>,
    return
  }
  func.func @transform_0(%arg0: i32) -> (i32, i32, i32, i32) {
    %c0_i32 = arith.constant 0 : i32
    %c0_i32_0 = arith.constant 0 : i32
    %c0_i32_1 = arith.constant 0 : i32
    %c0_i32_2 = arith.constant 0 : i32
    return %arg0, %c0_i32, %c0_i32_0, %c0_i32_1 : i32, i32, i32, i32
  }
  func.func @transform_1(%arg0: i32) -> (i32, i32) {
    %c0_i32 = arith.constant 0 : i32
    %c0_i32_0 = arith.constant 0 : i32
    %c0_i32_1 = arith.constant 0 : i32
    return %c0_i32, %c0_i32_0 : i32, i32
  }
  func.func @transform_2(%arg0: i32) -> (i32, i32) {
    %c0_i32 = arith.constant 0 : i32
    %c0_i32_0 = arith.constant 0 : i32
    %c0_i32_1 = arith.constant 0 : i32
    return %c0_i32, %c0_i32_0 : i32, i32
  }
  func.func @transform_3(%arg0: i32) -> (i32, i32) {
    %c0_i32 = arith.constant 0 : i32
    %c0_i32_0 = arith.constant 0 : i32
    %c0_i32_1 = arith.constant 0 : i32
    return %c0_i32, %c0_i32_0 : i32, i32
  }
  func.func @transform_4(%arg0: i32) -> (i32, i32) {
    %c0_i32 = arith.constant 0 : i32
    %c0_i32_0 = arith.constant 0 : i32
    %c0_i32_1 = arith.constant 0 : i32
    return %c0_i32, %c0_i32_0 : i32, i32
  }
  func.func @transform_5(%arg0: i32) -> (i32, i32) {
    %c0_i32 = arith.constant 0 : i32
    %c0_i32_0 = arith.constant 0 : i32
    %c0_i32_1 = arith.constant 0 : i32
    return %c0_i32, %c0_i32_0 : i32, i32
  }
  func.func @transform_6(%arg0: i32) -> (i32, i32) {
    %c0_i32 = arith.constant 0 : i32
    %c0_i32_0 = arith.constant 0 : i32
    %c0_i32_1 = arith.constant 0 : i32
    return %c0_i32, %c0_i32_0 : i32, i32
  }
  func.func @transform_7(%arg0: i32) -> (i32, i32, i32, i32) {
    %c0_i32 = arith.constant 0 : i32
    %c0_i32_0 = arith.constant 0 : i32
    %c0_i32_1 = arith.constant 0 : i32
    %c0_i32_2 = arith.constant 0 : i32
    return %arg0, %c0_i32, %c0_i32_0, %c0_i32_1 : i32, i32, i32, i32
  }
}

</mosaic_0001>

<bundles_post_ra>
// kernel: squeeze.4
= control target key start
LH: loop header
LB: loop body
LE: loop exit
PB: predicated region body
PF: predicated region fallthrough
CT: control target
= control target key end

     0   :  { %vm15_vm0 = vcmask 130048   ;;  %s59_s0 = inlined_call_operand.vmem [shape: f32[16,3,3], index: 0, kind: input, shape index: {}]   ;;  %s60_s1 = inlined_call_operand.vmem [shape: f32[16,9], index: 1, kind: output, shape index: {}]  }
   0x1   :  { %v27_v0 = vld [vmem:[%s59_s0 + $0x8] sm:$0xf]  ;;  %v28_v1 = vld [vmem:[%s59_s0 + $0x4] sm:$0xf]  ;;  %v12_v2 = vld [vmem:[%s59_s0] sm:$0xf] }
   0x2   :  { %7 = vst [vmem:[#allocation0] sm:$0xf] %v27_v0 }
   0x3   :  { %11 = vst [vmem:[#allocation0 + $0x10] sm:$0xf] %v28_v1 }
   0x4   :  { %13 = vst [vmem:[#allocation0 + $0x8] sm:$0xf] %v12_v2 }
   0x9   :  { %v23_v3 = vld [vmem:[#allocation0] sm:$0x7]  }
   0xa   :  { %v18_v4 = vld [vmem:[#allocation0 + $0x10] sm:$0x7]   ;;  %30 = vst.msk [vmem:[%s60_s1 + $0x6] sm:$0x7] %vm15_vm0, %v23_v3  }
   0xb   :  { %v14_v5 = vld [vmem:[#allocation0 + $0x8] sm:$0x7]   ;;  %29 = vst.msk [vmem:[%s60_s1 + $0x3] sm:$0x7] %vm15_vm0, %v18_v4  }
   0xc   :  { %16 = vst.msk [vmem:[%s60_s1] sm:$0x7] %vm15_vm0, %v14_v5  }

// kernel: feed_forward_pallas.1
= control target key start
LH: loop header
LB: loop body
LE: loop exit
PB: predicated region body
PF: predicated region fallthrough
CT: control target
= control target key end

     0   :  { %s4506_s24 = smov 0   ;;  %s7512_s0 = inlined_call_operand.vmem [shape: f32[2,16,16,128], index: 0, kind: input, shape index: {}]   ;;  %s7513_s1 = inlined_call_operand.vmem [shape: f32[128,128], index: 1, kind: input, shape index: {}]   ;;  %s7514_s2 = inlined_call_operand.vmem [shape: f32[1,128], index: 2, kind: input, shape index: {}]   ;;  %s7515_s3 = inlined_call_operand.vmem [shape: f32[9,128], index: 3, kind: input, shape index: {}]   ;;  %s7516_s4 = inlined_call_operand.vmem [shape: f32[1,128], index: 4, kind: input, shape index: {}]   ;;  %s7517_s5 = inlined_call_operand.vmem [shape: f32[128,128], index: 5, kind: input, shape index: {}]   ;;  %s7518_s6 = inlined_call_operand.vmem [shape: f32[1,128], index: 6, kind: input, shape index: {}]   ;;  %s7519_s7 = inlined_call_operand.vmem [shape: f32[2,16,16,128], index: 7, kind: output, shape index: {}]  }
   0x1 LB: > { %s4368_s25 = sadd.s32 4294967295, %s4463_s24   ;;  %p4372_p0 = scmp.ge.s32.totalorder %s4463_s24, 1  ;;  %s4463_s24 = sphi %s4506_s24, %s17_s24  }
   0x2   : > { %p237_p1 = scmp.lt.s32.totalorder %s4463_s24, 3 }
   0x4   : > { %p238_p2 = pnand %p4372_p0, %p237_p1 }
   0x6   : > { %241 = sbr.rel (%p238_p2) target bundleno = 1143 (0x477), region = 48 }
   0xb   : > { %v326_v0 = vld [vmem:[%s7513_s1 + $0x78] sm:$0xff]  ;;  %v325_v1 = vld [vmem:[%s7513_s1 + $0x70] sm:$0xff]  ;;  %v324_v2 = vld [vmem:[%s7513_s1 + $0x68] sm:$0xff]  ;;  %p4525_p3 = scmp.lt.s32.totalorder %s4368_s25, 1 }
   0xc   : > { %v4529_v3 = vand.u32 4294901760, %v326_v0  ;;  %v4531_v4 = vand.u32 4294901760, %v325_v1  ;;  %v4533_v5 = vand.u32 4294901760, %v324_v2  ;;  %v323_v6 = vld [vmem:[%s7513_s1 + $0x60] sm:$0xff]  ;;  %v322_v7 = vld [vmem:[%s7513_s1 + $0x58] sm:$0xff]  ;;  %v321_v8 = vld [vmem:[%s7513_s1 + $0x50] sm:$0xff] }
   0xd   : > { %v4544_v9 = vand.u32 4294901760, %v323_v6  ;;  %v4546_v10 = vand.u32 4294901760, %v322_v7  ;;  %v4548_v11 = vand.u32 4294901760, %v321_v8  ;;  %v320_v12 = vld [vmem:[%s7513_s1 + $0x48] sm:$0xff]  ;;  %v319_v13 = vld [vmem:[%s7513_s1 + $0x40] sm:$0xff]  ;;  %v318_v18 = vld [vmem:[%s7513_s1 + $0x38] sm:$0xff] }
   0xe   : > { %332 = vmatpush.msra.mxu0 %v4529_v3  ;;  %v4558_v14 = vsub.f32 %v326_v0, %v4529_v3  ;;  %v4561_v15 = vsub.f32 %v325_v1, %v4531_v4  ;;  %1055 = vmatpush.msra.mxu3 %v4529_v3  ;;  %v4565_v16 = vsub.f32 %v324_v2, %v4533_v5  ;;  %v4567_v17 = vand.u32 4294901760, %v320_v12  ;;  %s7964_s25 = smov (!%p4525_p3, %s4368_s25), 1  ;;  %v317_v29 = vld [vmem:[%s7513_s1 + $0x30] sm:$0xff]  ;;  %v316_v34 = vld [vmem:[%s7513_s1 + $0x28] sm:$0xff]  ;;  %v315_v43 = vld [vmem:[%s7513_s1 + $0x20] sm:$0xff] }
   0xf   : > { %v4573_v19 = vsub.f32 %v323_v6, %v4544_v9  ;;  %v4576_v20 = vsub.f32 %v322_v7, %v4546_v10  ;;  %v4578_v21 = vand.u32 4294901760, %v319_v13  ;;  %v4581_v22 = vsub.f32 %v321_v8, %v4548_v11  ;;  %s4379_s28 = sshll.u32 %s7964_s25, 8  ;;  %v314_v49 = vld [vmem:[%s7513_s1 + $0x18] sm:$0xff]  ;;  %v313_v55 = vld [vmem:[%s7513_s1 + $0x10] sm:$0xff]  ;;  %v312_v62 = vld [vmem:[%s7513_s1 + $0x8] sm:$0xff] }
  0x10   : > { %334 = vmatpush.msra.mxu0 %v4531_v4  ;;  %847 = vmatpush.msra.mxu2 %v4558_v14  ;;  %v622_v23 = vand.u32 4294901760, %v4558_v14  ;;  %v628_v24 = vand.u32 4294901760, %v4561_v15  ;;  %v634_v25 = vand.u32 4294901760, %v4565_v16  ;;  %v4596_v27 = vand.u32 4294901760, %v318_v18  ;;  %s4651_s10 = scalar_lea.vmem %s7512_s0, %s4379_s28  ;;  %v311_v8 = vld [vmem:[%s7513_s1] sm:$0xff]  ;;  %s7321_s29 = scalar_lea.vmem %s7519_s7, %s4379_s28 }
  0x11   : > { %1057 = vmatpush.msra.mxu3 %v4531_v4  ;;  %v640_v26 = vand.u32 4294901760, %v4573_v19  ;;  %v4599_v28 = vsub.f32 %v320_v12, %v4567_v17  ;;  %v646_v33 = vand.u32 4294901760, %v4576_v20  ;;  %v652_v35 = vand.u32 4294901760, %v4581_v22  ;;  %v279_v56 = vld [vmem:[%s4651_s10] sm:$0xff] }
  0x12   : > { %336 = vmatpush.msra.mxu0 %v4533_v5  ;;  %850 = vmatpush.msra.mxu2 %v4561_v15  ;;  %v623_v30 = vsub.f32 %v4558_v14, %v622_v23  ;;  %v629_v31 = vsub.f32 %v4561_v15, %v628_v24  ;;  %v635_v32 = vsub.f32 %v4565_v16, %v634_v25  ;;  %v4630_v40 = vand.u32 4294901760, %v317_v29 }
  0x13   : > { %1059 = vmatpush.msra.mxu3 %v4533_v5  ;;  %v4622_v36 = vsub.f32 %v319_v13, %v4578_v21  ;;  %v641_v39 = vsub.f32 %v4573_v19, %v640_v26  ;;  %v658_v41 = vand.u32 4294901760, %v4599_v28  ;;  %v4635_v42 = vsub.f32 %v318_v18, %v4596_v27 }
  0x14   : > { %338 = vmatpush.msra.mxu0 %v4544_v9  ;;  %v624_v37 = vand.u32 4294901760, %v623_v30  ;;  %853 = vmatpush.msra.mxu2 %v4565_v16  ;;  %v630_v38 = vand.u32 4294901760, %v629_v31  ;;  %v636_v44 = vand.u32 4294901760, %v635_v32  ;;  %v647_v45 = vsub.f32 %v4576_v20, %v646_v33  ;;  %v280_v30 = vld [vmem:[%s4651_s10 + $0x8] sm:$0xff] }
  0x15   : > { %1061 = vmatpush.msra.mxu3 %v4544_v9  ;;  %v4644_v46 = vand.u32 4294901760, %v316_v34  ;;  %v653_v47 = vsub.f32 %v4581_v22, %v652_v35  ;;  %v664_v48 = vand.u32 4294901760, %v4622_v36  ;;  %v642_v50 = vand.u32 4294901760, %v641_v39  ;;  %v284_v16 = vld [vmem:[%s4651_s10 + $0x28] sm:$0xff] }
  0x16   : > { %340 = vmatpush.msra.mxu0 %v4546_v10  ;;  %625 = vmatpush.msra.mxu1 %v624_v37  ;;  %v4663_v51 = vand.u32 4294901760, %v315_v43  ;;  %v4666_v52 = vsub.f32 %v317_v29, %v4630_v40  ;;  %v659_v53 = vsub.f32 %v4599_v28, %v658_v41  ;;  %v670_v54 = vand.u32 4294901760, %v4635_v42 }
  0x17   : > { %856 = vmatpush.msra.mxu2 %v4573_v19  ;;  %1063 = vmatpush.msra.mxu3 %v4546_v10  ;;  %v648_v57 = vand.u32 4294901760, %v647_v45  ;;  %v4679_v58 = vand.u32 4294901760, %v314_v49  ;;  %v4682_v59 = vsub.f32 %v316_v34, %v4644_v46  ;;  %v654_v60 = vand.u32 4294901760, %v653_v47 }
  0x18   : > { %342 = vmatpush.msra.mxu0 %v4548_v11  ;;  %631 = vmatpush.msra.mxu1 %v630_v38  ;;  %v665_v61 = vsub.f32 %v4622_v36, %v664_v48  ;;  %v4693_v63 = vand.u32 4294901760, %v313_v55  ;;  %v676_v0 = vand.u32 4294901760, %v4666_v52  ;;  %v4697_v1 = vsub.f32 %v315_v43, %v4663_v51 }
  0x19   : > { %859 = vmatpush.msra.mxu2 %v4576_v20  ;;  %1065 = vmatpush.msra.mxu3 %v4548_v11  ;;  %v4699_v2 = vand.u32 4294901760, %v279_v56  ;;  %v660_v6 = vand.u32 4294901760, %v659_v53  ;;  %v671_v7 = vsub.f32 %v4635_v42, %v670_v54  ;;  %v4710_v12 = vand.u32 4294901760, %v312_v62  ;;  %v285_v20 = vld [vmem:[%s4651_s10 + $0x30] sm:$0xff] }
  0x1a   : > { %344 = vmatpush.msra.mxu0 %v4567_v17  ;;  %637 = vmatpush.msra.mxu1 %v636_v44  ;;  %v682_v13 = vand.u32 4294901760, %v4682_v59  ;;  %v4714_v18 = vsub.f32 %v314_v49, %v4679_v58  ;;  %v666_v31 = vand.u32 4294901760, %v665_v61  ;;  %v677_v32 = vsub.f32 %v4666_v52, %v676_v0 }
  0x1b   : > { %862 = vmatpush.msra.mxu2 %v4581_v22  ;;  %1067 = vmatpush.msra.mxu3 %v4567_v17  ;;  %v4717_v29 = vsub.f32 %v279_v56, %v4699_v2  ;;  %v4726_v34 = vand.u32 4294901760, %v311_v8  ;;  %v688_v37 = vand.u32 4294901760, %v4697_v1  ;;  %v4730_v38 = vsub.f32 %v313_v55, %v4693_v63 }
  0x1c   : > { %346 = vmatpush.msra.mxu0 %v4578_v21  ;;  %643 = vmatpush.msra.mxu1 %v642_v50  ;;  %v4735_v43 = vand.u32 4294901760, %v280_v30  ;;  %v672_v44 = vand.u32 4294901760, %v671_v7  ;;  %v683_v45 = vsub.f32 %v4682_v59, %v682_v13  ;;  %v7522_v47 = vand.u32 4294901760, %v4714_v18  ;;  %v281_v7 = vld [vmem:[%s4651_s10 + $0x10] sm:$0xff] }
  0x1d   : > { %865 = vmatpush.msra.mxu2 %v4599_v28  ;;  %1069 = vmatpush.msra.mxu3 %v4578_v21  ;;  %v365_v39 = vand.u32 4294901760, %v4717_v29  ;;  %v4743_v49 = vsub.f32 %v312_v62, %v4710_v12  ;;  %v678_v50 = vand.u32 4294901760, %v677_v32  ;;  %v689_v53 = vsub.f32 %v4697_v1, %v688_v37 }
  0x1e   : > { %348 = vmatpush.msra.mxu0 %v4596_v27  ;;  %649 = vmatpush.msra.mxu1 %v648_v57  ;;  %v7520_v55 = vand.u32 4294901760, %v4730_v38  ;;  %v4753_v56 = vsub.f32 %v311_v8, %v4726_v34  ;;  %v684_v61 = vand.u32 4294901760, %v683_v45  ;;  %v695_v62 = vsub.f32 %v4714_v18, %v7522_v47  ;;  %v282_v47 = vld [vmem:[%s4651_s10 + $0x18] sm:$0xff] }
  0x1f   : > { %868 = vmatpush.msra.mxu2 %v4622_v36  ;;  %1071 = vmatpush.msra.mxu3 %v4596_v27  ;;  %v366_v57 = vsub.f32 %v4717_v29, %v365_v39  ;;  %v690_v8 = vand.u32 4294901760, %v689_v53  ;;  %v4774_v45 = vand.u32 4294901760, %v281_v7  ;;  %v4836_v22 = vand.u32 4294901760, %v285_v20 }
  0x20   : > { %350 = vmatpush.msra.mxu0 %v4630_v40  ;;  %655 = vmatpush.msra.mxu1 %v654_v60  ;;  %v372_v60 = vsub.f32 %v280_v30, %v4735_v43  ;;  %v701_v30 = vsub.f32 %v4730_v38, %v7520_v55  ;;  %v7673_v36 = vand.u32 4294901760, %v4730_v38 }
  0x21   : > { %871 = vmatpush.msra.mxu2 %v4635_v42  ;;  %1073 = vmatpush.msra.mxu3 %v4630_v40  ;;  %v367_v32 = vand.u32 4294901760, %v366_v57 }
  0x22   : > { %352 = vmatpush.msra.mxu0 %v4644_v46  ;;  %661 = vmatpush.msra.mxu1 %v660_v6  ;;  %v7521_v6 = vand.u32 4294901760, %v4743_v49  ;;  %v702_v57 = vand.u32 4294901760, %v701_v30 }
  0x23   : > { %874 = vmatpush.msra.mxu2 %v4666_v52  ;;  %1075 = vmatpush.msra.mxu3 %v4644_v46 }
  0x24   : > { %354 = vmatpush.msra.mxu0 %v4663_v51  ;;  %667 = vmatpush.msra.mxu1 %v666_v31  ;;  %v7523_v31 = vand.u32 4294901760, %v4753_v56  ;;  %v707_v53 = vsub.f32 %v4743_v49, %v7521_v6 }
  0x25   : > { %877 = vmatpush.msra.mxu2 %v4682_v59  ;;  %1077 = vmatpush.msra.mxu3 %v4663_v51 }
  0x26   : > { %356 = vmatpush.msra.mxu0 %v4679_v58  ;;  %673 = vmatpush.msra.mxu1 %v672_v44  ;;  %v373_v44 = vand.u32 4294901760, %v372_v60  ;;  %v713_v55 = vsub.f32 %v4753_v56, %v7523_v31  ;;  %v708_v6 = vand.u32 4294901760, %v707_v53  ;;  %v4794_v31 = vand.u32 4294901760, %v282_v47 }
  0x27   : > { %880 = vmatpush.msra.mxu2 %v4697_v1  ;;  %1079 = vmatpush.msra.mxu3 %v4679_v58 }
  0x28   : > { %358 = vmatpush.msra.mxu0 %v4693_v63  ;;  %679 = vmatpush.msra.mxu1 %v678_v50  ;;  %v696_v50 = vand.u32 4294901760, %v695_v62  ;;  %v380_v62 = vsub.f32 %v281_v7, %v4774_v45  ;;  %v388_v7 = vsub.f32 %v282_v47, %v4794_v31 }
  0x29   : > { %883 = vmatpush.msra.mxu2 %v4714_v18  ;;  %1081 = vmatpush.msra.mxu3 %v4693_v63 }
  0x2a   : > { %360 = vmatpush.msra.mxu0 %v4710_v12  ;;  %685 = vmatpush.msra.mxu1 %v684_v61  ;;  %v374_v61 = vsub.f32 %v372_v60, %v373_v44  ;;  %v389_v15 = vand.u32 4294901760, %v388_v7 }
  0x2b   : > { %886 = vmatpush.msra.mxu2 %v4730_v38  ;;  %1083 = vmatpush.msra.mxu3 %v4710_v12 }
  0x2c   : > { %362 = vmatpush.msra.mxu0 %v4726_v34  ;;  %691 = vmatpush.msra.mxu1 %v690_v8  ;;  %v714_v8 = vand.u32 4294901760, %v713_v55  ;;  %v375_v30 = vand.u32 4294901760, %v374_v61 }
  0x2d   : > { %368 = vmatmul.f32.vlgmr.msra.gmra.mxu0 %v367_v32  ;;  %889 = vmatpush.msra.mxu2 %v4743_v49  ;;  %v381_v32 = vand.u32 4294901760, %v380_v62 }
  0x2e   : > { %697 = vmatpush.msra.mxu1 %v696_v50  ;;  %1085 = vmatpush.msra.mxu3 %v4726_v34 }
  0x2f   : > { %892 = vmatpush.msra.mxu2 %v4753_v56  ;;  %1089 = vmatmul.f32.vlgmr.msra.gmra.mxu3 %v365_v39  ;;  %v382_v39 = vsub.f32 %v380_v62, %v381_v32 }
  0x30   : > { %703 = vmatpush.msra.mxu1 %v702_v57  ;;  %895 = vmatmul.f32.vlgmr.msra.gmra.mxu2 %v4717_v29  ;;  %v283_v29 = vld [vmem:[%s4651_s10 + $0x20] sm:$0xff] }
  0x31   : > { %1282 = vmatpush.msrb.mxu0 %v622_v23  ;;  %v383_v14 = vand.u32 4294901760, %v382_v39  ;;  %v4805_v23 = vand.u32 4294901760, %v283_v29  ;;  %v291_v57 = vld [vmem:[%s4651_s10 + $0x60] sm:$0xff]  ;;  %v292_v39 = vld [vmem:[%s4651_s10 + $0x68] sm:$0xff] }
  0x32   : > { %709 = vmatpush.msra.mxu1 %v708_v6 }
  0x33   : > { %1286 = vmatpush.msrb.mxu0 %v628_v24 }
  0x34   : > { %715 = vmatpush.msra.mxu1 %v714_v8  ;;  %v4885_v8 = vand.u32 4294901760, %v291_v57 }
  0x35   : > { %376 = vmatmul.f32.gmra.mxu0 %v375_v30  ;;  %717 = vmatmul.f32.vlgmr.msra.gmra.mxu1 %v4699_v2 }
  0x36   : > { %1473 = vmatpush.msrb.mxu1 %v4529_v3  ;;  %1290 = vmatpush.msrb.mxu0 %v634_v25  ;;  %v390_v3 = vsub.f32 %v388_v7, %v389_v15  ;;  %v412_v25 = vsub.f32 %v285_v20, %v4836_v22  ;;  %v294_v20 = vld [vmem:[%s4651_s10 + $0x78] sm:$0xff] }
  0x37   : > { %1095 = vmatmul.f32.gmra.mxu3 %v373_v44 }
  0x38   : > { %900 = vmatmul.f32.gmra.mxu2 %v372_v60  ;;  %1475 = vmatpush.msrb.mxu1 %v4531_v4  ;;  %v396_v4 = vsub.f32 %v283_v29, %v4805_v23 }
  0x39   : > { %1294 = vmatpush.msrb.mxu0 %v640_v26  ;;  %v286_v26 = vld [vmem:[%s4651_s10 + $0x38] sm:$0xff] }
  0x3a   : > { %1477 = vmatpush.msrb.mxu1 %v4533_v5  ;;  %v391_v5 = vand.u32 4294901760, %v390_v3  ;;  %v397_v19 = vand.u32 4294901760, %v396_v4 }
  0x3b   : > { %1298 = vmatpush.msrb.mxu0 %v646_v33  ;;  %v413_v33 = vand.u32 4294901760, %v412_v25 }
  0x3c   : > { %1479 = vmatpush.msrb.mxu1 %v4544_v9  ;;  %v4820_v9 = vand.u32 4294901760, %v284_v16 }
  0x3d   : > { %384 = vmatmul.f32.gmra.mxu0 %v383_v14  ;;  %721 = vmatmul.f32.gmra.mxu1 %v4735_v43  ;;  %v4890_v14 = vand.u32 4294901760, %v292_v39 }
  0x3e   : > { %1481 = vmatpush.msrb.mxu1 %v4546_v10  ;;  %1302 = vmatpush.msrb.mxu0 %v652_v35  ;;  %v398_v10 = vsub.f32 %v396_v4, %v397_v19  ;;  %v4851_v35 = vand.u32 4294901760, %v286_v26 }
  0x3f   : > { %1101 = vmatmul.f32.gmra.mxu3 %v381_v32  ;;  %v460_v32 = vsub.f32 %v291_v57, %v4885_v8  ;;  %v468_v3 = vsub.f32 %v292_v39, %v4890_v14  ;;  %v299_v39 = vld [vmem:[%s4651_s10 + $0xa0] sm:$0xff] }
  0x40   : > { %905 = vmatmul.f32.gmra.mxu2 %v380_v62  ;;  %1483 = vmatpush.msrb.mxu1 %v4548_v11  ;;  %v404_v11 = vsub.f32 %v284_v16, %v4820_v9  ;;  %v420_v42 = vsub.f32 %v286_v26, %v4851_v35 }
  0x41   : > { %1306 = vmatpush.msrb.mxu0 %v658_v41  ;;  %v414_v41 = vsub.f32 %v412_v25, %v413_v33  ;;  %v461_v29 = vand.u32 4294901760, %v460_v32 }
  0x42   : > { %1485 = vmatpush.msrb.mxu1 %v4567_v17  ;;  %v399_v17 = vand.u32 4294901760, %v398_v10  ;;  %v421_v52 = vand.u32 4294901760, %v420_v42 }
  0x43   : > { %1310 = vmatpush.msrb.mxu0 %v664_v48  ;;  %v7675_v48 = vand.u32 4294901760, %v4753_v56  ;;  %v290_v56 = vld [vmem:[%s4651_s10 + $0x58] sm:$0xff] }
  0x44   : > { %1487 = vmatpush.msrb.mxu1 %v4578_v21  ;;  %v405_v21 = vand.u32 4294901760, %v404_v11  ;;  %v4880_v44 = vand.u32 4294901760, %v290_v56 }
  0x45   : > { %392 = vmatmul.f32.gmra.mxu0 %v391_v5  ;;  %725 = vmatmul.f32.gmra.mxu1 %v4774_v45  ;;  %v469_v5 = vand.u32 4294901760, %v468_v3 }
  0x46   : > { %1314 = vmatpush.msrb.mxu0 %v670_v54  ;;  %1489 = vmatpush.msrb.mxu1 %v4596_v27  ;;  %v406_v24 = vsub.f32 %v404_v11, %v405_v21  ;;  %v7672_v27 = vand.u32 4294901760, %v4714_v18  ;;  %v452_v53 = vsub.f32 %v290_v56, %v4880_v44 }
  0x47   : > { %1107 = vmatmul.f32.gmra.mxu3 %v389_v15  ;;  %v462_v15 = vsub.f32 %v460_v32, %v461_v29  ;;  %v470_v10 = vsub.f32 %v468_v3, %v469_v5 }
  0x48   : > { %910 = vmatmul.f32.gmra.mxu2 %v388_v7  ;;  %1318 = vmatpush.msrb.mxu0 %v676_v0  ;;  %v407_v28 = vand.u32 4294901760, %v406_v24  ;;  %v453_v62 = vand.u32 4294901760, %v452_v53  ;;  %v4900_v24 = vand.u32 4294901760, %v294_v20 }
  0x49   : > { %1491 = vmatpush.msrb.mxu1 %v4630_v40  ;;  %v7674_v40 = vand.u32 4294901760, %v4743_v49  ;;  %v463_v16 = vand.u32 4294901760, %v462_v15 }
  0x4a   : > { %1322 = vmatpush.msrb.mxu0 %v682_v13  ;;  %v454_v30 = vsub.f32 %v452_v53, %v453_v62  ;;  %v484_v26 = vsub.f32 %v294_v20, %v4900_v24 }
  0x4b   : > { %1493 = vmatpush.msrb.mxu1 %v4644_v46  ;;  %v287_v46 = vld [vmem:[%s4651_s10 + $0x40] sm:$0xff] }
  0x4c   : > { %1326 = vmatpush.msrb.mxu0 %v688_v37  ;;  %v4865_v54 = vand.u32 4294901760, %v287_v46  ;;  %v455_v7 = vand.u32 4294901760, %v454_v30 }
  0x4d   : > { %400 = vmatmul.f32.gmra.mxu0 %v399_v17  ;;  %729 = vmatmul.f32.gmra.mxu1 %v4794_v31  ;;  %v471_v17 = vand.u32 4294901760, %v470_v10 }
  0x4e   : > { %1495 = vmatpush.msrb.mxu1 %v4663_v51  ;;  %1330 = vmatpush.msrb.mxu0 %v7672_v27  ;;  %v415_v51 = vand.u32 4294901760, %v414_v41  ;;  %v428_v59 = vsub.f32 %v287_v46, %v4865_v54  ;;  %v295_v27 = vld [vmem:[%s4651_s10 + $0x80] sm:$0xff] }
  0x4f   : > { %1113 = vmatmul.f32.gmra.mxu3 %v397_v19 }
  0x50   : > { %915 = vmatmul.f32.gmra.mxu2 %v396_v4  ;;  %1497 = vmatpush.msrb.mxu1 %v4679_v58  ;;  %v422_v58 = vsub.f32 %v420_v42, %v421_v52  ;;  %v429_v1 = vand.u32 4294901760, %v428_v59  ;;  %v293_v4 = vld [vmem:[%s4651_s10 + $0x70] sm:$0xff] }
  0x51   : > { %1334 = vmatpush.msrb.mxu0 %v7673_v36  ;;  %v4895_v19 = vand.u32 4294901760, %v293_v4  ;;  %v4905_v36 = vand.u32 4294901760, %v295_v27 }
  0x52   : > { %1499 = vmatpush.msrb.mxu1 %v4693_v63  ;;  %v288_v63 = vld [vmem:[%s4651_s10 + $0x48] sm:$0xff]  ;;  %v423_v0 = vand.u32 4294901760, %v422_v58  ;;  %v430_v13 = vsub.f32 %v428_v59, %v429_v1 }
  0x53   : > { %1338 = vmatpush.msrb.mxu0 %v7674_v40  ;;  %v492_v41 = vsub.f32 %v295_v27, %v4905_v36 }
  0x54   : > { %1501 = vmatpush.msrb.mxu1 %v4710_v12  ;;  %v4870_v12 = vand.u32 4294901760, %v288_v63  ;;  %v431_v37 = vand.u32 4294901760, %v430_v13 }
  0x55   : > { %408 = vmatmul.f32.gmra.mxu0 %v407_v28  ;;  %733 = vmatmul.f32.gmra.mxu1 %v4805_v23 }
  0x56   : > { %1342 = vmatpush.msrb.mxu0 %v7675_v48  ;;  %1503 = vmatpush.msrb.mxu1 %v4726_v34  ;;  %v436_v18 = vsub.f32 %v288_v63, %v4870_v12  ;;  %v289_v34 = vld [vmem:[%s4651_s10 + $0x50] sm:$0xff]  ;;  %v493_v48 = vand.u32 4294901760, %v492_v41 }
  0x57   : > { %1119 = vmatmul.f32.gmra.mxu3 %v405_v21  ;;  %v4875_v47 = vand.u32 4294901760, %v289_v34 }
  0x58   : > { %920 = vmatmul.f32.gmra.mxu2 %v404_v11  ;;  %v437_v38 = vand.u32 4294901760, %v436_v18  ;;  %v476_v11 = vsub.f32 %v293_v4, %v4895_v19  ;;  %v4934_v4 = vand.u32 4294901760, %v299_v39 }
  0x59   : > { %v444_v55 = vsub.f32 %v289_v34, %v4875_v47 }
  0x5a   : > { %v438_v49 = vsub.f32 %v436_v18, %v437_v38  ;;  %v477_v21 = vand.u32 4294901760, %v476_v11  ;;  %7678 = vst [vmem:[#allocation5_spill] sm:$0xff] %v4934_v4 }
  0x5b   : > { %v445_v6 = vand.u32 4294901760, %v444_v55 }
  0x5c   : > { %v439_v60 = vand.u32 4294901760, %v438_v49 }
  0x5d   : > { %416 = vmatmul.f32.gmra.mxu0 %v415_v51  ;;  %737 = vmatmul.f32.gmra.mxu1 %v4820_v9  ;;  %v446_v50 = vsub.f32 %v444_v55, %v445_v6 }
  0x5f   : > { %1125 = vmatmul.f32.gmra.mxu3 %v413_v33  ;;  %v447_v61 = vand.u32 4294901760, %v446_v50  ;;  %v485_v33 = vand.u32 4294901760, %v484_v26 }
  0x60   : > { %925 = vmatmul.f32.gmra.mxu2 %v412_v25  ;;  %v478_v25 = vsub.f32 %v476_v11, %v477_v21 }
  0x61   : > { %v486_v40 = vsub.f32 %v484_v26, %v485_v33 }
  0x62   : > { %v479_v28 = vand.u32 4294901760, %v478_v25  ;;  %v524_v25 = vsub.f32 %v299_v39, %v4934_v4 }
  0x63   : > { %v487_v46 = vand.u32 4294901760, %v486_v40 }
  0x64   : > { %v525_v40 = vand.u32 4294901760, %v524_v25 }
  0x65   : > { %424 = vmatmul.f32.gmra.mxu0 %v423_v0  ;;  %741 = vmatmul.f32.gmra.mxu1 %v4836_v22 }
  0x67   : > { %1131 = vmatmul.f32.gmra.mxu3 %v421_v52  ;;  %v494_v52 = vsub.f32 %v492_v41, %v493_v48 }
  0x68   : > { %930 = vmatmul.f32.gmra.mxu2 %v420_v42  ;;  %v296_v42 = vld [vmem:[%s4651_s10 + $0x88] sm:$0xff] }
  0x69   : > { %v4910_v51 = vand.u32 4294901760, %v296_v42  ;;  %v495_v63 = vand.u32 4294901760, %v494_v52 }
  0x6b   : > { %v500_v58 = vsub.f32 %v296_v42, %v4910_v51 }
  0x6d   : > { %432 = vmatmul.f32.gmra.mxu0 %v431_v37  ;;  %745 = vmatmul.f32.gmra.mxu1 %v4851_v35  ;;  %v501_v0 = vand.u32 4294901760, %v500_v58 }
  0x6f   : > { %1137 = vmatmul.f32.gmra.mxu3 %v429_v1  ;;  %v502_v34 = vsub.f32 %v500_v58, %v501_v0 }
  0x70   : > { %935 = vmatmul.f32.gmra.mxu2 %v428_v59  ;;  %v297_v59 = vld [vmem:[%s4651_s10 + $0x90] sm:$0xff] }
  0x71   : > { %v4915_v1 = vand.u32 4294901760, %v297_v59 }
  0x73   : > { %7676 = vst [vmem:[#allocation3_spill] sm:$0xff] %v4915_v1  ;;  %v508_v37 = vsub.f32 %v297_v59, %v4915_v1 }
  0x75   : > { %440 = vmatmul.f32.gmra.mxu0 %v439_v60  ;;  %749 = vmatmul.f32.gmra.mxu1 %v4865_v54  ;;  %v509_v56 = vand.u32 4294901760, %v508_v37 }
  0x77   : > { %1143 = vmatmul.f32.gmra.mxu3 %v437_v38  ;;  %v298_v38 = vld [vmem:[%s4651_s10 + $0x98] sm:$0xff]  ;;  %v510_v30 = vsub.f32 %v508_v37, %v509_v56 }
  0x78   : > { %940 = vmatmul.f32.gmra.mxu2 %v436_v18  ;;  %v4920_v18 = vld [vmem:[%s7514_s2] ss:$0 sm:$0xff]  ;;  %v4926_v60 = vand.u32 4294901760, %v298_v38 }
  0x79   : > { %v511_v15 = vand.u32 4294901760, %v510_v30 }
  0x7a   : > { %7677 = vst [vmem:[#allocation4_spill] sm:$0xff] %v4926_v60 }
  0x7d   : > { %448 = vmatmul.f32.gmra.mxu0 %v447_v61  ;;  %753 = vmatmul.f32.gmra.mxu1 %v4870_v12 }
  0x7f   : > { %1149 = vmatmul.f32.gmra.mxu3 %v445_v6 }
  0x80   : > { %945 = vmatmul.f32.gmra.mxu2 %v444_v55  ;;  %v503_v55 = vand.u32 4294901760, %v502_v34 }
  0x85   : > { %456 = vmatmul.f32.gmra.mxu0 %v455_v7  ;;  %757 = vmatmul.f32.gmra.mxu1 %v4875_v47 }
  0x87   : > { %1155 = vmatmul.f32.gmra.mxu3 %v453_v62 }
  0x88   : > { %950 = vmatmul.f32.gmra.mxu2 %v452_v53 }
  0x8d   : > { %464 = vmatmul.f32.gmra.mxu0 %v463_v16  ;;  %761 = vmatmul.f32.gmra.mxu1 %v4880_v44 }
  0x8f   : > { %1161 = vmatmul.f32.gmra.mxu3 %v461_v29 }
  0x90   : > { %955 = vmatmul.f32.gmra.mxu2 %v460_v32  ;;  %v516_v32 = vsub.f32 %v298_v38, %v4926_v60 }
  0x95   : > { %472 = vmatmul.f32.gmra.mxu0 %v471_v17  ;;  %765 = vmatmul.f32.gmra.mxu1 %v4885_v8 }
  0x97   : > { %1167 = vmatmul.f32.gmra.mxu3 %v469_v5 }
  0x98   : > { %960 = vmatmul.f32.gmra.mxu2 %v468_v3  ;;  %v517_v3 = vand.u32 4294901760, %v516_v32 }
  0x9d   : > { %480 = vmatmul.f32.gmra.mxu0 %v479_v28  ;;  %769 = vmatmul.f32.gmra.mxu1 %v4890_v14 }
  0x9f   : > { %1173 = vmatmul.f32.gmra.mxu3 %v477_v21  ;;  %v518_v21 = vsub.f32 %v516_v32, %v517_v3 }
  0xa0   : > { %965 = vmatmul.f32.gmra.mxu2 %v476_v11 }
  0xa5   : > { %488 = vmatmul.f32.gmra.mxu0 %v487_v46  ;;  %773 = vmatmul.f32.gmra.mxu1 %v4895_v19 }
  0xa7   : > { %1179 = vmatmul.f32.gmra.mxu3 %v485_v33  ;;  %v519_v33 = vand.u32 4294901760, %v518_v21 }
  0xa8   : > { %970 = vmatmul.f32.gmra.mxu2 %v484_v26  ;;  %v300_v26 = vld [vmem:[%s4651_s10 + $0xa8] sm:$0xff] }
  0xaa   : > { %v369_v13 = vpop.f32.mrf.mxu0 }
  0xab   : > { %v370_v49 = vadd.f32 %v4920_v18, %v369_v13  ;;  %v301_v13 = vld [vmem:[%s4651_s10 + $0xb0] sm:$0xff] }
  0xad   : > { %496 = vmatmul.f32.gmra.mxu0 %v495_v63  ;;  %777 = vmatmul.f32.gmra.mxu1 %v4900_v24  ;;  %v526_v63 = vsub.f32 %v524_v25, %v525_v40 }
  0xaf   : > { %1185 = vmatmul.f32.gmra.mxu3 %v493_v48  ;;  %v527_v38 = vand.u32 4294901760, %v526_v63 }
  0xb0   : > { %975 = vmatmul.f32.gmra.mxu2 %v492_v41  ;;  %v4942_v41 = vand.u32 4294901760, %v300_v26 }
  0xb2   : > { %v377_v6 = vpop.f32.mrf.mxu0  ;;  %v718_v50 = vpop.f32.mrf.mxu1  ;;  %7680 = vst [vmem:[#allocation7_spill] sm:$0xff] %v4942_v41 }
  0xb3   : > { %v719_v53 = vadd.f32 %v718_v50, %v370_v49  ;;  %v896_v57 = vpop.f32.mrf.mxu2  ;;  %v1090_v61 = vpop.f32.mrf.mxu3  ;;  %v378_v7 = vadd.f32 %v4920_v18, %v377_v6 }
  0xb5   : > { %v897_v62 = vadd.f32 %v896_v57, %v719_v53  ;;  %504 = vmatmul.f32.gmra.mxu0 %v503_v55  ;;  %781 = vmatmul.f32.gmra.mxu1 %v4905_v36  ;;  %v4950_v55 = vand.u32 4294901760, %v301_v13 }
  0xb7   : > { %v4932_v29 = vadd.f32 %v1090_v61, %v897_v62  ;;  %1191 = vmatmul.f32.gmra.mxu3 %v501_v0  ;;  %v532_v0 = vsub.f32 %v300_v26, %v4942_v41  ;;  %7682 = vst [vmem:[#allocation9_spill] sm:$0xff] %v4950_v55  ;;  %v2846_v61 = vld [vmem:[%s7517_s5 + $0x78] sm:$0xff]  ;;  %v540_v39 = vsub.f32 %v301_v13, %v4950_v55 }
  0xb8   : > { %980 = vmatmul.f32.gmra.mxu2 %v500_v58  ;;  %v4955_v62 = vand.u32 4294901760, %v2846_v61 }
  0xb9   : > { %v533_v49 = vand.u32 4294901760, %v532_v0 }
  0xba   : > { %v385_v16 = vpop.f32.mrf.mxu0  ;;  %v722_v5 = vpop.f32.mrf.mxu1  ;;  %7683 = vst [vmem:[#allocation10_spill] sm:$0xff] %v4955_v62  ;;  %2852 = vmatpush.msrb.mxu2 %v4955_v62  ;;  %3575 = vmatpush.msra.mxu1 %v4955_v62 }
  0xbb   : > { %v723_v10 = vadd.f32 %v722_v5, %v378_v7  ;;  %v901_v11 = vpop.f32.mrf.mxu2  ;;  %v1096_v20 = vpop.f32.mrf.mxu3  ;;  %v386_v27 = vadd.f32 %v4920_v18, %v385_v16  ;;  %v302_v7 = vld [vmem:[%s4651_s10 + $0xb8] sm:$0xff] }
  0xbd   : > { %v902_v17 = vadd.f32 %v901_v11, %v723_v10  ;;  %512 = vmatmul.f32.gmra.mxu0 %v511_v15  ;;  %785 = vmatmul.f32.gmra.mxu1 %v4910_v51  ;;  %v4962_v15 = vsub.f32 %v2846_v61, %v4955_v62  ;;  %v541_v11 = vand.u32 4294901760, %v540_v39 }
  0xbf   : > { %v4940_v28 = vadd.f32 %v1096_v20, %v902_v17  ;;  %1197 = vmatmul.f32.gmra.mxu3 %v509_v56  ;;  %7684 = vst [vmem:[#allocation11_spill] sm:$0xff] %v4962_v15  ;;  %v7526_v5 = vand.u32 4294901760, %v4962_v15  ;;  %3367 = vmatpush.msra.mxu0 %v4962_v15  ;;  %v4970_v20 = vand.u32 4294901760, %v302_v7 }
  0xc0   : > { %985 = vmatmul.f32.gmra.mxu2 %v508_v37 }
  0xc1   : > { %7679 = vst [vmem:[#allocation6_spill] sm:$0xff] %v4940_v28  ;;  %v3143_v26 = vsub.f32 %v4962_v15, %v7526_v5  ;;  %v2839_v15 = vld [vmem:[%s7517_s5 + $0x40] sm:$0xff] }
  0xc2   : > { %v393_v42 = vpop.f32.mrf.mxu0  ;;  %v726_v46 = vpop.f32.mrf.mxu1  ;;  %7686 = vst [vmem:[#allocation13_spill] sm:$0xff] %v4970_v20 }
  0xc3   : > { %v727_v48 = vadd.f32 %v726_v46, %v386_v27  ;;  %v906_v52 = vpop.f32.mrf.mxu2  ;;  %v1102_v58 = vpop.f32.mrf.mxu3  ;;  %v394_v34 = vadd.f32 %v4920_v18, %v393_v42  ;;  %v542_v46 = vsub.f32 %v540_v39, %v541_v11 }
  0xc5   : > { %v907_v59 = vadd.f32 %v906_v52, %v727_v48  ;;  %520 = vmatmul.f32.gmra.mxu0 %v519_v33  ;;  %789 = vmatmul.f32.gmra.mxu1 %v4915_v1  ;;  %v548_v48 = vsub.f32 %v302_v7, %v4970_v20  ;;  %v303_v52 = vld [vmem:[%s4651_s10 + $0xc0] sm:$0xff]  ;;  %v543_v63 = vand.u32 4294901760, %v542_v46 }
  0xc7   : > { %v4948_v37 = vadd.f32 %v1102_v58, %v907_v59  ;;  %1203 = vmatmul.f32.gmra.mxu3 %v517_v3  ;;  %v549_v13 = vand.u32 4294901760, %v548_v48 }
  0xc8   : > { %990 = vmatmul.f32.gmra.mxu2 %v516_v32  ;;  %v534_v32 = vsub.f32 %v532_v0, %v533_v49 }
  0xc9   : > { %7681 = vst [vmem:[#allocation8_spill] sm:$0xff] %v4948_v37  ;;  %v5199_v37 = vand.u32 4294901760, %v2839_v15 }
  0xca   : > { %v401_v56 = vpop.f32.mrf.mxu0  ;;  %v730_v6 = vpop.f32.mrf.mxu1  ;;  %v535_v10 = vand.u32 4294901760, %v534_v32  ;;  %v304_v32 = vld [vmem:[%s4651_s10 + $0xc8] sm:$0xff] }
  0xcb   : > { %v731_v50 = vadd.f32 %v730_v6, %v394_v34  ;;  %v911_v53 = vpop.f32.mrf.mxu2  ;;  %v1108_v57 = vpop.f32.mrf.mxu3  ;;  %v402_v3 = vadd.f32 %v4920_v18, %v401_v56  ;;  %v4981_v34 = vand.u32 4294901760, %v303_v52  ;;  %7716 = vst [vmem:[#allocation43_spill] sm:$0xff] %v5199_v37 }
  0xcd   : > { %v912_v30 = vadd.f32 %v911_v53, %v731_v50  ;;  %528 = vmatmul.f32.gmra.mxu0 %v527_v38  ;;  %793 = vmatmul.f32.gmra.mxu1 %v4926_v60  ;;  %7688 = vst [vmem:[#allocation15_spill] sm:$0xff] %v4981_v34 }
  0xcf   : > { %v4966_v16 = vadd.f32 %v1108_v57, %v912_v30  ;;  %1209 = vmatmul.f32.gmra.mxu3 %v525_v40  ;;  %v3144_v40 = vand.u32 4294901760, %v3143_v26  ;;  %v2845_v57 = vld [vmem:[%s7517_s5 + $0x70] sm:$0xff] }
  0xd0   : > { %995 = vmatmul.f32.gmra.mxu2 %v524_v25  ;;  %v4986_v61 = vand.u32 4294901760, %v2845_v57 }
  0xd1   : > { %7685 = vst [vmem:[#allocation12_spill] sm:$0xff] %v4966_v16  ;;  %3145 = vmatpush.msrb.mxu3 %v3144_v40 }
  0xd2   : > { %v409_v17 = vpop.f32.mrf.mxu0  ;;  %v734_v21 = vpop.f32.mrf.mxu1  ;;  %7689 = vst [vmem:[#allocation16_spill] sm:$0xff] %v4986_v61  ;;  %2854 = vmatpush.msrb.mxu2 %v4986_v61  ;;  %v4993_v7 = vsub.f32 %v2845_v57, %v4986_v61  ;;  %3577 = vmatpush.msra.mxu1 %v4986_v61 }
  0xd3   : > { %v735_v27 = vadd.f32 %v734_v21, %v402_v3  ;;  %v916_v33 = vpop.f32.mrf.mxu2  ;;  %v1114_v42 = vpop.f32.mrf.mxu3  ;;  %v410_v58 = vadd.f32 %v4920_v18, %v409_v17 }
  0xd4   : > { %7690 = vst [vmem:[#allocation17_spill] sm:$0xff] %v4993_v7  ;;  %v7524_v17 = vand.u32 4294901760, %v4993_v7  ;;  %3370 = vmatpush.msra.mxu0 %v4993_v7 }
  0xd5   : > { %v917_v25 = vadd.f32 %v916_v33, %v735_v27  ;;  %536 = vmatmul.f32.gmra.mxu0 %v535_v10  ;;  %797 = vmatmul.f32.gmra.mxu1 %v4934_v4  ;;  %v5001_v27 = vand.u32 4294901760, %v304_v32 }
  0xd6   : > { %v3149_v40 = vsub.f32 %v4993_v7, %v7524_v17 }
  0xd7   : > { %v4979_v59 = vadd.f32 %v1114_v42, %v917_v25  ;;  %1215 = vmatmul.f32.gmra.mxu3 %v533_v49  ;;  %v556_v49 = vsub.f32 %v303_v52, %v4981_v34  ;;  %7692 = vst [vmem:[#allocation19_spill] sm:$0xff] %v5001_v27 }
  0xd8   : > { %1000 = vmatmul.f32.gmra.mxu2 %v532_v0  ;;  %v550_v0 = vsub.f32 %v548_v48, %v549_v13 }
  0xd9   : > { %7687 = vst [vmem:[#allocation14_spill] sm:$0xff] %v4979_v59  ;;  %v557_v26 = vand.u32 4294901760, %v556_v49 }
  0xda   : > { %v417_v38 = vpop.f32.mrf.mxu0  ;;  %v738_v56 = vpop.f32.mrf.mxu1  ;;  %v551_v21 = vand.u32 4294901760, %v550_v0 }
  0xdb   : > { %v739_v6 = vadd.f32 %v738_v56, %v410_v58  ;;  %v921_v50 = vpop.f32.mrf.mxu2  ;;  %v1120_v53 = vpop.f32.mrf.mxu3  ;;  %v418_v3 = vadd.f32 %v4920_v18, %v417_v38  ;;  %v558_v58 = vsub.f32 %v556_v49, %v557_v26  ;;  %v305_v38 = vld [vmem:[%s4651_s10 + $0xd0] sm:$0xff] }
  0xdc   : > { %v5012_v57 = vand.u32 4294901760, %v305_v38 }
  0xdd   : > { %v922_v30 = vadd.f32 %v921_v50, %v739_v6  ;;  %544 = vmatmul.f32.gmra.mxu0 %v543_v63  ;;  %801 = vmatmul.f32.gmra.mxu1 %v4942_v41  ;;  %v564_v63 = vsub.f32 %v304_v32, %v5001_v27  ;;  %v559_v50 = vand.u32 4294901760, %v558_v58  ;;  %v2844_v32 = vld [vmem:[%s7517_s5 + $0x68] sm:$0xff] }
  0xde   : > { %7694 = vst [vmem:[#allocation21_spill] sm:$0xff] %v5012_v57 }
  0xdf   : > { %v4997_v10 = vadd.f32 %v1120_v53, %v922_v30  ;;  %1221 = vmatmul.f32.gmra.mxu3 %v541_v11  ;;  %v3150_v11 = vand.u32 4294901760, %v3149_v40  ;;  %v565_v53 = vand.u32 4294901760, %v564_v63 }
  0xe0   : > { %1005 = vmatmul.f32.gmra.mxu2 %v540_v39 }
  0xe1   : > { %7691 = vst [vmem:[#allocation18_spill] sm:$0xff] %v4997_v10  ;;  %3151 = vmatpush.msrb.mxu3 %v3150_v11  ;;  %v309_v10 = vld [vmem:[%s4651_s10 + $0xf0] sm:$0xff] }
  0xe2   : > { %v425_v33 = vpop.f32.mrf.mxu0  ;;  %v742_v42 = vpop.f32.mrf.mxu1  ;;  %v5088_v59 = vand.u32 4294901760, %v309_v10 }
  0xe3   : > { %v743_v25 = vadd.f32 %v742_v42, %v418_v3  ;;  %v926_v46 = vpop.f32.mrf.mxu2  ;;  %v1126_v52 = vpop.f32.mrf.mxu3  ;;  %v426_v56 = vadd.f32 %v4920_v18, %v425_v33  ;;  %v5019_v33 = vand.u32 4294901760, %v2844_v32 }
  0xe4   : > { %7703 = vst [vmem:[#allocation30_spill] sm:$0xff] %v5088_v59 }
  0xe5   : > { %v927_v39 = vadd.f32 %v926_v46, %v743_v25  ;;  %552 = vmatmul.f32.gmra.mxu0 %v551_v21  ;;  %805 = vmatmul.f32.gmra.mxu1 %v4950_v55  ;;  %7695 = vst [vmem:[#allocation22_spill] sm:$0xff] %v5019_v33  ;;  %v306_v25 = vld [vmem:[%s4651_s10 + $0xd8] sm:$0xff]  ;;  %v5026_v46 = vsub.f32 %v2844_v32, %v5019_v33  ;;  %v307_v32 = vld [vmem:[%s4651_s10 + $0xe0] sm:$0xff] }
  0xe6   : > { %2856 = vmatpush.msrb.mxu2 %v5019_v33  ;;  %3579 = vmatpush.msra.mxu1 %v5019_v33  ;;  %v5049_v17 = vand.u32 4294901760, %v307_v32 }
  0xe7   : > { %v5010_v6 = vadd.f32 %v1126_v52, %v927_v39  ;;  %1227 = vmatmul.f32.gmra.mxu3 %v549_v13  ;;  %v572_v13 = vsub.f32 %v305_v38, %v5012_v57  ;;  %7696 = vst [vmem:[#allocation23_spill] sm:$0xff] %v5026_v46  ;;  %v7525_v11 = vand.u32 4294901760, %v5026_v46  ;;  %3373 = vmatpush.msra.mxu0 %v5026_v46  ;;  %v5033_v38 = vand.u32 4294901760, %v306_v25 }
  0xe8   : > { %1010 = vmatmul.f32.gmra.mxu2 %v548_v48  ;;  %v566_v48 = vsub.f32 %v564_v63, %v565_v53  ;;  %7699 = vst [vmem:[#allocation26_spill] sm:$0xff] %v5049_v17 }
  0xe9   : > { %7693 = vst [vmem:[#allocation20_spill] sm:$0xff] %v5010_v6  ;;  %v573_v58 = vand.u32 4294901760, %v572_v13 }
  0xea   : > { %v5014_v30 = vpop.f32.mrf.mxu0  ;;  %v746_v0 = vpop.f32.mrf.mxu1  ;;  %v567_v39 = vand.u32 4294901760, %v566_v48  ;;  %7698 = vst [vmem:[#allocation25_spill] sm:$0xff] %v5033_v38 }
  0xeb   : > { %v747_v3 = vadd.f32 %v746_v0, %v426_v56  ;;  %v931_v21 = vpop.f32.mrf.mxu2  ;;  %v1132_v42 = vpop.f32.mrf.mxu3  ;;  %v3155_v0 = vsub.f32 %v5026_v46, %v7525_v11 }
  0xed   : > { %v932_v40 = vadd.f32 %v931_v21, %v747_v3  ;;  %560 = vmatmul.f32.gmra.mxu0 %v559_v50  ;;  %809 = vmatmul.f32.gmra.mxu1 %v4970_v20  ;;  %v580_v21 = vsub.f32 %v306_v25, %v5033_v38  ;;  %v2843_v25 = vld [vmem:[%s7517_s5 + $0x60] sm:$0xff] }
  0xef   : > { %v5029_v52 = vadd.f32 %v1132_v42, %v932_v40  ;;  %1233 = vmatmul.f32.gmra.mxu3 %v557_v26  ;;  %v3156_v26 = vand.u32 4294901760, %v3155_v0  ;;  %v581_v48 = vand.u32 4294901760, %v580_v21 }
  0xf0   : > { %1015 = vmatmul.f32.gmra.mxu2 %v556_v49  ;;  %v574_v49 = vsub.f32 %v572_v13, %v573_v58 }
  0xf1   : > { %7697 = vst [vmem:[#allocation24_spill] sm:$0xff] %v5029_v52  ;;  %3157 = vmatpush.msrb.mxu3 %v3156_v26  ;;  %v5060_v26 = vand.u32 4294901760, %v2843_v25 }
  0xf2   : > { %v5035_v56 = vpop.f32.mrf.mxu0  ;;  %v5037_v50 = vpop.f32.mrf.mxu1  ;;  %v575_v40 = vand.u32 4294901760, %v574_v49  ;;  %v308_v49 = vld [vmem:[%s4651_s10 + $0xe8] sm:$0xff] }
  0xf3   : > { %v5042_v3 = vpop.f32.mrf.mxu2  ;;  %v5047_v42 = vpop.f32.mrf.mxu3  ;;  %7700 = vst [vmem:[#allocation27_spill] sm:$0xff] %v5060_v26  ;;  %2858 = vmatpush.msrb.mxu2 %v5060_v26  ;;  %v5067_v5 = vsub.f32 %v2843_v25, %v5060_v26  ;;  %3581 = vmatpush.msra.mxu1 %v5060_v26  ;;  %v5072_v52 = vand.u32 4294901760, %v308_v49 }
  0xf5   : > { %568 = vmatmul.f32.gmra.mxu0 %v567_v39  ;;  %813 = vmatmul.f32.gmra.mxu1 %v4981_v34  ;;  %7701 = vst [vmem:[#allocation28_spill] sm:$0xff] %v5067_v5  ;;  %v7538_v34 = vand.u32 4294901760, %v5067_v5  ;;  %v596_v55 = vsub.f32 %v308_v49, %v5072_v52 }
  0xf6   : > { %3376 = vmatpush.msra.mxu0 %v5067_v5  ;;  %7702 = vst [vmem:[#allocation29_spill] sm:$0xff] %v5072_v52 }
  0xf7   : > { %1239 = vmatmul.f32.gmra.mxu3 %v565_v53  ;;  %v588_v53 = vsub.f32 %v307_v32, %v5049_v17  ;;  %v3161_v25 = vsub.f32 %v5067_v5, %v7538_v34  ;;  %v597_v26 = vand.u32 4294901760, %v596_v55 }
  0xf8   : > { %1020 = vmatmul.f32.gmra.mxu2 %v564_v63  ;;  %v582_v63 = vsub.f32 %v580_v21, %v581_v48 }
  0xfa   : > { %v5051_v11 = vpop.f32.mrf.mxu0  ;;  %v5053_v0 = vpop.f32.mrf.mxu1 }
  0xfb   : > { %v5055_v39 = vpop.f32.mrf.mxu2  ;;  %v5081_v6 = vpop.f32.mrf.mxu3 }
  0xfd   : > { %576 = vmatmul.f32.gmra.mxu0 %v575_v40  ;;  %817 = vmatmul.f32.gmra.mxu1 %v5001_v27  ;;  %v583_v40 = vand.u32 4294901760, %v582_v63  ;;  %v589_v27 = vand.u32 4294901760, %v588_v53 }
  0xff   : > { %1245 = vmatmul.f32.gmra.mxu3 %v573_v58  ;;  %v590_v63 = vsub.f32 %v588_v53, %v589_v27 }
 0x100   : > { %1025 = vmatmul.f32.gmra.mxu2 %v572_v13  ;;  %v3162_v13 = vand.u32 4294901760, %v3161_v25 }
 0x101   : > { %v591_v41 = vand.u32 4294901760, %v590_v63 }
 0x102   : > { %v5074_v32 = vpop.f32.mrf.mxu0  ;;  %v5076_v20 = vpop.f32.mrf.mxu1  ;;  %3163 = vmatpush.msrb.mxu3 %v3162_v13  ;;  %v310_v13 = vld [vmem:[%s4651_s10 + $0xf8] sm:$0xff] }
 0x103   : > { %v5083_v58 = vpop.f32.mrf.mxu2  ;;  %v5099_v49 = vpop.f32.mrf.mxu3  ;;  %v5113_v4 = vand.u32 4294901760, %v310_v13 }
 0x105   : > { %584 = vmatmul.f32.gmra.mxu0 %v583_v40  ;;  %821 = vmatmul.f32.gmra.mxu1 %v5012_v57  ;;  %v2842_v40 = vld [vmem:[%s7517_s5 + $0x58] sm:$0xff]  ;;  %7706 = vst [vmem:[#allocation33_spill] sm:$0xff] %v5113_v4 }
 0x106   : > { %v5097_v57 = vand.u32 4294901760, %v2842_v40 }
 0x107   : > { %1251 = vmatmul.f32.gmra.mxu3 %v581_v48  ;;  %v604_v48 = vsub.f32 %v309_v10, %v5088_v59 }
 0x108   : > { %1030 = vmatmul.f32.gmra.mxu2 %v580_v21  ;;  %7704 = vst [vmem:[#allocation31_spill] sm:$0xff] %v5097_v57  ;;  %v598_v21 = vsub.f32 %v596_v55, %v597_v26  ;;  %v5106_v63 = vsub.f32 %v2842_v40, %v5097_v57  ;;  %3583 = vmatpush.msra.mxu1 %v5097_v57 }
 0x109   : > { %2860 = vmatpush.msrb.mxu2 %v5097_v57 }
 0x10a   : > { %v5090_v34 = vpop.f32.mrf.mxu0  ;;  %v5092_v25 = vpop.f32.mrf.mxu1  ;;  %7705 = vst [vmem:[#allocation32_spill] sm:$0xff] %v5106_v63  ;;  %v7554_v61 = vand.u32 4294901760, %v5106_v63  ;;  %3379 = vmatpush.msra.mxu0 %v5106_v63 }
 0x10b   : > { %v5109_v33 = vpop.f32.mrf.mxu2 }
 0x10c   : > { %v3167_v40 = vsub.f32 %v5106_v63, %v7554_v61 }
 0x10d   : > { %592 = vmatmul.f32.gmra.mxu0 %v591_v41  ;;  %825 = vmatmul.f32.gmra.mxu1 %v5033_v38  ;;  %v599_v41 = vand.u32 4294901760, %v598_v21  ;;  %v605_v38 = vand.u32 4294901760, %v604_v48  ;;  %v5124_v21 = vpop.f32.mrf.mxu3 }
 0x10e   : > { %v3168_v57 = vand.u32 4294901760, %v3167_v40  ;;  %7707 = vst [vmem:[#allocation34_spill] sm:$0xff] %v5124_v21 }
 0x10f   : > { %1257 = vmatmul.f32.gmra.mxu3 %v589_v27  ;;  %v606_v27 = vsub.f32 %v604_v48, %v605_v38 }
 0x110   : > { %1035 = vmatmul.f32.gmra.mxu2 %v588_v53  ;;  %v612_v53 = vsub.f32 %v310_v13, %v5113_v4  ;;  %3169 = vmatpush.msrb.mxu3 %v3168_v57 }
 0x111   : > { %v607_v16 = vand.u32 4294901760, %v606_v27 }
 0x112   : > { %v5115_v10 = vpop.f32.mrf.mxu0  ;;  %v5117_v62 = vpop.f32.mrf.mxu1  ;;  %v613_v46 = vand.u32 4294901760, %v612_v53 }
 0x113   : > { %v5126_v5 = vpop.f32.mrf.mxu2 }
 0x114   : > { %v614_v57 = vsub.f32 %v612_v53, %v613_v46 }
 0x115   : > { %600 = vmatmul.f32.gmra.mxu0 %v599_v41  ;;  %829 = vmatmul.f32.gmra.mxu1 %v5049_v17  ;;  %v2841_v41 = vld [vmem:[%s7517_s5 + $0x50] sm:$0xff]  ;;  %v5145_v13 = vpop.f32.mrf.mxu3 }
 0x116   : > { %v5135_v40 = vand.u32 4294901760, %v2841_v41  ;;  %7710 = vst [vmem:[#allocation37_spill] sm:$0xff] %v5145_v13  ;;  %v615_v27 = vand.u32 4294901760, %v614_v57 }
 0x117   : > { %1263 = vmatmul.f32.gmra.mxu3 %v597_v26 }
 0x118   : > { %1040 = vmatmul.f32.gmra.mxu2 %v596_v55  ;;  %7708 = vst [vmem:[#allocation35_spill] sm:$0xff] %v5135_v40  ;;  %v5140_v55 = vsub.f32 %v2841_v41, %v5135_v40  ;;  %3585 = vmatpush.msra.mxu1 %v5135_v40 }
 0x119   : > { %2862 = vmatpush.msrb.mxu2 %v5135_v40  ;;  %v2840_v40 = vld [vmem:[%s7517_s5 + $0x48] sm:$0xff] }
 0x11a   : > { %v5128_v7 = vpop.f32.mrf.mxu0  ;;  %v5130_v60 = vpop.f32.mrf.mxu1  ;;  %7709 = vst [vmem:[#allocation36_spill] sm:$0xff] %v5140_v55  ;;  %v7560_v26 = vand.u32 4294901760, %v5140_v55  ;;  %3382 = vmatpush.msra.mxu0 %v5140_v55 }
 0x11c   : > { %v3173_v41 = vsub.f32 %v5140_v55, %v7560_v26  ;;  %v5166_v26 = vand.u32 4294901760, %v2840_v40 }
 0x11d   : > { %608 = vmatmul.f32.gmra.mxu0 %v607_v16  ;;  %833 = vmatmul.f32.gmra.mxu1 %v5072_v52  ;;  %v5154_v52 = vpop.f32.mrf.mxu2  ;;  %v5161_v57 = vpop.f32.mrf.mxu3 }
 0x11e   : > { %v3174_v17 = vand.u32 4294901760, %v3173_v41  ;;  %7711 = vst [vmem:[#allocation38_spill] sm:$0xff] %v5161_v57  ;;  %2864 = vmatpush.msrb.mxu2 %v5166_v26  ;;  %3587 = vmatpush.msra.mxu1 %v5166_v26  ;;  %v2838_v57 = vld [vmem:[%s7517_s5 + $0x38] sm:$0xff] }
 0x11f   : > { %1269 = vmatmul.f32.gmra.mxu3 %v605_v38  ;;  %7712 = vst [vmem:[#allocation39_spill] sm:$0xff] %v5166_v26  ;;  %v5234_v13 = vand.u32 4294901760, %v2838_v57 }
 0x120   : > { %1045 = vmatmul.f32.gmra.mxu2 %v604_v48  ;;  %3175 = vmatpush.msrb.mxu3 %v3174_v17  ;;  %v5174_v17 = vsub.f32 %v2840_v40, %v5166_v26 }
 0x121   : > { %2866 = vmatpush.msrb.mxu2 %v5199_v37  ;;  %3589 = vmatpush.msra.mxu1 %v5199_v37  ;;  %7722 = vst [vmem:[#allocation49_spill] sm:$0xff] %v5234_v13 }
 0x122   : > { %v5147_v16 = vpop.f32.mrf.mxu0  ;;  %v5149_v61 = vpop.f32.mrf.mxu1  ;;  %7713 = vst [vmem:[#allocation40_spill] sm:$0xff] %v5174_v17  ;;  %3385 = vmatpush.msra.mxu0 %v5174_v17 }
 0x123   : > { %2868 = vmatpush.msrb.mxu2 %v5234_v13  ;;  %3591 = vmatpush.msra.mxu1 %v5234_v13 }
 0x125   : > { %616 = vmatmul.f32.gmra.mxu0 %v615_v27  ;;  %837 = vmatmul.f32.gmra.mxu1 %v5088_v59  ;;  %v5168_v55 = vpop.f32.mrf.mxu2  ;;  %v5186_v59 = vpop.f32.mrf.mxu3 }
 0x126   : > { %7714 = vst [vmem:[#allocation41_spill] sm:$0xff] %v5186_v59 }
 0x127   : > { %1275 = vmatmul.f32.gmra.mxu3 %v613_v46  ;;  %v7569_v46 = vand.u32 4294901760, %v5174_v17 }
 0x128   : > { %1050 = vmatmul.f32.gmra.mxu2 %v612_v53 }
 0x129   : > { %v3179_v41 = vsub.f32 %v5174_v17, %v7569_v46 }
 0x12a   : > { %v5157_v38 = vpop.f32.mrf.mxu0  ;;  %v5159_v48 = vpop.f32.mrf.mxu1 }
 0x12d   : > { %841 = vmatmul.f32.gmra.mxu1 %v5113_v4  ;;  %1344 = vmatmul.f32.vlgmr.msrb.gmra.mxu0 %v4699_v2  ;;  %v3180_v4 = vand.u32 4294901760, %v3179_v41  ;;  %v5190_v40 = vpop.f32.mrf.mxu2 }
 0x12e   : > { %7715 = vst [vmem:[#allocation42_spill] sm:$0xff] %v5190_v40 }
 0x12f   : > { %3181 = vmatpush.msrb.mxu3 %v3180_v4  ;;  %v5208_v4 = vpop.f32.mrf.mxu3 }
 0x130   : > { %7718 = vst [vmem:[#allocation45_spill] sm:$0xff] %v5208_v4 }
 0x132   : > { %v5179_v53 = vpop.f32.mrf.mxu0  ;;  %v5181_v27 = vpop.f32.mrf.mxu1 }
 0x135   : > { %1348 = vmatmul.f32.gmra.mxu0 %v4735_v43  ;;  %1505 = vmatmul.f32.vlgmr.msrb.gmra.mxu1 %v4699_v2  ;;  %v5205_v2 = vsub.f32 %v2839_v15, %v5199_v37  ;;  %v5212_v46 = vpop.f32.mrf.mxu2 }
 0x136   : > { %7719 = vst [vmem:[#allocation46_spill] sm:$0xff] %v5212_v46  ;;  %v2837_v46 = vld [vmem:[%s7517_s5 + $0x30] sm:$0xff] }
 0x137   : > { %7717 = vst [vmem:[#allocation44_spill] sm:$0xff] %v5205_v2  ;;  %v7574_v41 = vand.u32 4294901760, %v5205_v2  ;;  %3388 = vmatpush.msra.mxu0 %v5205_v2  ;;  %v5223_v37 = vpop.f32.mrf.mxu3  ;;  %v5265_v21 = vand.u32 4294901760, %v2837_v46 }
 0x138   : > { %7720 = vst [vmem:[#allocation47_spill] sm:$0xff] %v5223_v37 }
 0x139   : > { %7726 = vst [vmem:[#allocation53_spill] sm:$0xff] %v5265_v21  ;;  %2870 = vmatpush.msrb.mxu2 %v5265_v21  ;;  %3593 = vmatpush.msra.mxu1 %v5265_v21 }
 0x13a   : > { %v5192_v26 = vpop.f32.mrf.mxu0  ;;  %v5194_v63 = vpop.f32.mrf.mxu1 }
 0x13d   : > { %1352 = vmatmul.f32.gmra.mxu0 %v4774_v45  ;;  %1509 = vmatmul.f32.gmra.mxu1 %v4735_v43  ;;  %v3185_v43 = vsub.f32 %v5205_v2, %v7574_v41  ;;  %v5229_v59 = vpop.f32.mrf.mxu2 }
 0x13e   : > { %7721 = vst [vmem:[#allocation48_spill] sm:$0xff] %v5229_v59 }
 0x13f   : > { %v3186_v15 = vand.u32 4294901760, %v3185_v43 }
 0x141   : > { %3187 = vmatpush.msrb.mxu3 %v3186_v15 }
 0x142   : > { %v5214_v17 = vpop.f32.mrf.mxu0  ;;  %v5216_v28 = vpop.f32.mrf.mxu1 }
 0x145   : > { %1356 = vmatmul.f32.gmra.mxu0 %v4794_v31  ;;  %1513 = vmatmul.f32.gmra.mxu1 %v4774_v45  ;;  %v5240_v45 = vsub.f32 %v2838_v57, %v5234_v13  ;;  %v5254_v59 = vpop.f32.mrf.mxu2 }
 0x146   : > { %7725 = vst [vmem:[#allocation52_spill] sm:$0xff] %v5254_v59 }
 0x147   : > { %7723 = vst [vmem:[#allocation50_spill] sm:$0xff] %v5240_v45  ;;  %v7577_v43 = vand.u32 4294901760, %v5240_v45  ;;  %3391 = vmatpush.msra.mxu0 %v5240_v45 }
 0x149   : > { %v3191_v2 = vsub.f32 %v5240_v45, %v7577_v43 }
 0x14a   : > { %v5225_v1 = vpop.f32.mrf.mxu0  ;;  %v5227_v4 = vpop.f32.mrf.mxu1 }
 0x14b   : > { %v3192_v37 = vand.u32 4294901760, %v3191_v2 }
 0x14d   : > { %1360 = vmatmul.f32.gmra.mxu0 %v4805_v23  ;;  %1517 = vmatmul.f32.gmra.mxu1 %v4794_v31  ;;  %v5252_v31 = vpop.f32.mrf.mxu3 }
 0x14e   : > { %7724 = vst [vmem:[#allocation51_spill] sm:$0xff] %v5252_v31  ;;  %3193 = vmatpush.msrb.mxu3 %v3192_v37  ;;  %v5276_v37 = vpop.f32.mrf.mxu2 }
 0x14f   : > { %7729 = vst [vmem:[#allocation56_spill] sm:$0xff] %v5276_v37 }
 0x152   : > { %v5245_v15 = vpop.f32.mrf.mxu0  ;;  %v5247_v41 = vpop.f32.mrf.mxu1 }
 0x155   : > { %1364 = vmatmul.f32.gmra.mxu0 %v4820_v9  ;;  %1521 = vmatmul.f32.gmra.mxu1 %v4805_v23  ;;  %v5267_v43 = vpop.f32.mrf.mxu3  ;;  %v5273_v23 = vsub.f32 %v2837_v46, %v5265_v21 }
 0x156   : > { %7727 = vst [vmem:[#allocation54_spill] sm:$0xff] %v5267_v43  ;;  %v5291_v21 = vpop.f32.mrf.mxu2 }
 0x157   : > { %7728 = vst [vmem:[#allocation55_spill] sm:$0xff] %v5273_v23  ;;  %v7580_v2 = vand.u32 4294901760, %v5273_v23  ;;  %3394 = vmatpush.msra.mxu0 %v5273_v23 }
 0x15a   : > { %v5258_v57 = vpop.f32.mrf.mxu0  ;;  %v5260_v13 = vpop.f32.mrf.mxu1 }
 0x15d   : > { %1368 = vmatmul.f32.gmra.mxu0 %v4836_v22  ;;  %1525 = vmatmul.f32.gmra.mxu1 %v4820_v9  ;;  %v3197_v9 = vsub.f32 %v5273_v23, %v7580_v2  ;;  %v5289_v46 = vpop.f32.mrf.mxu3 }
 0x15e   : > { %7731 = vst [vmem:[#allocation58_spill] sm:$0xff] %v5289_v46  ;;  %v5320_v46 = vpop.f32.mrf.mxu2 }
 0x15f   : > { %v3198_v31 = vand.u32 4294901760, %v3197_v9 }
 0x161   : > { %3199 = vmatpush.msrb.mxu3 %v3198_v31 }
 0x162   : > { %v5280_v45 = vpop.f32.mrf.mxu0  ;;  %v5282_v43 = vpop.f32.mrf.mxu1 }
 0x163   : > { %7730 = vst [vmem:[#allocation57_spill] sm:$0xff] %v5282_v43  ;;  %v2836_v43 = vld [vmem:[%s7517_s5 + $0x28] sm:$0xff] }
 0x164   : > { %v5300_v40 = vand.u32 4294901760, %v2836_v43 }
 0x165   : > { %1372 = vmatmul.f32.gmra.mxu0 %v4851_v35  ;;  %1529 = vmatmul.f32.gmra.mxu1 %v4836_v22  ;;  %v5311_v9 = vpop.f32.mrf.mxu3 }
 0x166   : > { %7733 = vst [vmem:[#allocation60_spill] sm:$0xff] %v5300_v40  ;;  %2872 = vmatpush.msrb.mxu2 %v5300_v40  ;;  %v5306_v22 = vsub.f32 %v2836_v43, %v5300_v40  ;;  %3595 = vmatpush.msra.mxu1 %v5300_v40 }
 0x167   : > { %7735 = vst [vmem:[#allocation62_spill] sm:$0xff] %v5311_v9 }
 0x168   : > { %7734 = vst [vmem:[#allocation61_spill] sm:$0xff] %v5306_v22  ;;  %v7583_v31 = vand.u32 4294901760, %v5306_v22  ;;  %3397 = vmatpush.msra.mxu0 %v5306_v22 }
 0x16a   : > { %v5293_v37 = vpop.f32.mrf.mxu0  ;;  %v5295_v59 = vpop.f32.mrf.mxu1 }
 0x16b   : > { %7732 = vst [vmem:[#allocation59_spill] sm:$0xff] %v5295_v59 }
 0x16d   : > { %1376 = vmatmul.f32.gmra.mxu0 %v4865_v54  ;;  %1533 = vmatmul.f32.gmra.mxu1 %v4851_v35  ;;  %v3203_v35 = vsub.f32 %v5306_v22, %v7583_v31  ;;  %v5328_v9 = vpop.f32.mrf.mxu3  ;;  %v5335_v31 = vpop.f32.mrf.mxu2 }
 0x16e   : > { %7740 = vst [vmem:[#allocation67_spill] sm:$0xff] %v5328_v9 }
 0x16f   : > { %v3204_v43 = vand.u32 4294901760, %v3203_v35 }
 0x171   : > { %3205 = vmatpush.msrb.mxu3 %v3204_v43 }
 0x172   : > { %v5313_v2 = vpop.f32.mrf.mxu0  ;;  %v5315_v23 = vpop.f32.mrf.mxu1 }
 0x173   : > { %7736 = vst [vmem:[#allocation63_spill] sm:$0xff] %v5313_v2  ;;  %v2835_v2 = vld [vmem:[%s7517_s5 + $0x20] sm:$0xff] }
 0x174   : > { %7737 = vst [vmem:[#allocation64_spill] sm:$0xff] %v5315_v23  ;;  %v5333_v23 = vand.u32 4294901760, %v2835_v2 }
 0x175   : > { %1380 = vmatmul.f32.gmra.mxu0 %v4870_v12  ;;  %1537 = vmatmul.f32.gmra.mxu1 %v4865_v54 }
 0x176   : > { %7741 = vst [vmem:[#allocation68_spill] sm:$0xff] %v5333_v23  ;;  %2874 = vmatpush.msrb.mxu2 %v5333_v23  ;;  %v5341_v54 = vsub.f32 %v2835_v2, %v5333_v23  ;;  %3597 = vmatpush.msra.mxu1 %v5333_v23  ;;  %v5357_v2 = vpop.f32.mrf.mxu2 }
 0x178   : > { %7742 = vst [vmem:[#allocation69_spill] sm:$0xff] %v5341_v54  ;;  %v7586_v35 = vand.u32 4294901760, %v5341_v54  ;;  %3400 = vmatpush.msra.mxu0 %v5341_v54 }
 0x17a   : > { %v5324_v40 = vpop.f32.mrf.mxu0  ;;  %v5326_v59 = vpop.f32.mrf.mxu1 }
 0x17b   : > { %7738 = vst [vmem:[#allocation65_spill] sm:$0xff] %v5324_v40  ;;  %v5353_v40 = vpop.f32.mrf.mxu3 }
 0x17c   : > { %7739 = vst [vmem:[#allocation66_spill] sm:$0xff] %v5326_v59  ;;  %v3209_v59 = vsub.f32 %v5341_v54, %v7586_v35 }
 0x17d   : > { %1384 = vmatmul.f32.gmra.mxu0 %v4875_v47  ;;  %1541 = vmatmul.f32.gmra.mxu1 %v4870_v12 }
 0x17e   : > { %v3210_v12 = vand.u32 4294901760, %v3209_v59  ;;  %v5379_v35 = vpop.f32.mrf.mxu2 }
 0x180   : > { %3211 = vmatpush.msrb.mxu3 %v3210_v12 }
 0x182   : > { %v5346_v43 = vpop.f32.mrf.mxu0  ;;  %v5348_v22 = vpop.f32.mrf.mxu1 }
 0x183   : > { %7743 = vst [vmem:[#allocation70_spill] sm:$0xff] %v5346_v43  ;;  %v5375_v59 = vpop.f32.mrf.mxu3 }
 0x184   : > { %7744 = vst [vmem:[#allocation71_spill] sm:$0xff] %v5348_v22  ;;  %v2834_v22 = vld [vmem:[%s7517_s5 + $0x18] sm:$0xff] }
 0x185   : > { %1388 = vmatmul.f32.gmra.mxu0 %v4880_v44  ;;  %1545 = vmatmul.f32.gmra.mxu1 %v4875_v47  ;;  %v5366_v43 = vand.u32 4294901760, %v2834_v22 }
 0x187   : > { %7747 = vst [vmem:[#allocation74_spill] sm:$0xff] %v5366_v43  ;;  %2876 = vmatpush.msrb.mxu2 %v5366_v43  ;;  %v5372_v47 = vsub.f32 %v2834_v22, %v5366_v43  ;;  %3599 = vmatpush.msra.mxu1 %v5366_v43 }
 0x189   : > { %7748 = vst [vmem:[#allocation75_spill] sm:$0xff] %v5372_v47  ;;  %v7589_v12 = vand.u32 4294901760, %v5372_v47  ;;  %3403 = vmatpush.msra.mxu0 %v5372_v47 }
 0x18a   : > { %v5359_v23 = vpop.f32.mrf.mxu0  ;;  %v5361_v9 = vpop.f32.mrf.mxu1 }
 0x18b   : > { %7745 = vst [vmem:[#allocation72_spill] sm:$0xff] %v5359_v23  ;;  %v4465_v23 = vmov 0.0   ;;  %v5395_v43 = vpop.f32.mrf.mxu3 }
 0x18c   : > { %7746 = vst [vmem:[#allocation73_spill] sm:$0xff] %v5361_v9 }
 0x18d   : > { %1392 = vmatmul.f32.gmra.mxu0 %v4885_v8  ;;  %1549 = vmatmul.f32.gmra.mxu1 %v4880_v44  ;;  %v3215_v44 = vsub.f32 %v5372_v47, %v7589_v12  ;;  %1732 = vst [vmem:[#allocation2 + $0x18] sm:$0xff] %v4465_v23 }
 0x18e   : > { %1733 = vst [vmem:[#allocation2 + $0x20] sm:$0xff] %v4465_v23 }
 0x18f   : > { %v3216_v22 = vand.u32 4294901760, %v3215_v44  ;;  %1729 = vst [vmem:[#allocation2] sm:$0xff] %v4465_v23 }
 0x190   : > { %1730 = vst [vmem:[#allocation2 + $0x8] sm:$0xff] %v4465_v23 }
 0x191   : > { %3217 = vmatpush.msrb.mxu3 %v3216_v22  ;;  %1731 = vst [vmem:[#allocation2 + $0x10] sm:$0x3] %v4465_v23  ;;  %v434_v22 = vadd.f32 %v4920_v18, %v5014_v30 }
 0x192   : > { %v5381_v54 = vpop.f32.mrf.mxu0  ;;  %v5383_v9 = vpop.f32.mrf.mxu1  ;;  %1734 = vst [vmem:[#allocation2 + $0x28] sm:$0x3] %v4465_v23 }
 0x193   : > { %7749 = vst [vmem:[#allocation76_spill] sm:$0xff] %v5383_v9  ;;  %v5425_v9 = vpop.f32.mrf.mxu3  ;;  %v751_v30 = vadd.f32 %v5037_v50, %v434_v22 }
 0x194   : > { %1735 = vst [vmem:[#allocation2 + $0x30] sm:$0xff] %v4465_v23 }
 0x195   : > { %1396 = vmatmul.f32.gmra.mxu0 %v4890_v14  ;;  %1553 = vmatmul.f32.gmra.mxu1 %v4885_v8  ;;  %v5403_v8 = vpop.f32.mrf.mxu2  ;;  %1736 = vst [vmem:[#allocation2 + $0x38] sm:$0xff] %v4465_v23 }
 0x196   : > { %7752 = vst [vmem:[#allocation79_spill] sm:$0xff] %v5403_v8 }
 0x197   : > { %1737 = vst [vmem:[#allocation2 + $0x40] sm:$0x3] %v4465_v23 }
 0x198   : > { %1738 = vst [vmem:[#allocation2 + $0x48] sm:$0xff] %v4465_v23 }
 0x199   : > { %1739 = vst [vmem:[#allocation2 + $0x50] sm:$0xff] %v4465_v23 }
 0x19a   : > { %v5398_v44 = vpop.f32.mrf.mxu0  ;;  %v5400_v12 = vpop.f32.mrf.mxu1  ;;  %1740 = vst [vmem:[#allocation2 + $0x58] sm:$0x3] %v4465_v23 }
 0x19b   : > { %7750 = vst [vmem:[#allocation77_spill] sm:$0xff] %v5398_v44 }
 0x19c   : > { %7751 = vst [vmem:[#allocation78_spill] sm:$0xff] %v5400_v12  ;;  %v450_v12 = vadd.f32 %v4920_v18, %v5051_v11 }
 0x19d   : > { %1400 = vmatmul.f32.gmra.mxu0 %v4895_v19  ;;  %1557 = vmatmul.f32.gmra.mxu1 %v4890_v14  ;;  %1741 = vst [vmem:[#allocation2 + $0x60] sm:$0xff] %v4465_v23  ;;  %v442_v14 = vadd.f32 %v4920_v18, %v5035_v56  ;;  %v5429_v8 = vpop.f32.mrf.mxu2  ;;  %v458_v56 = vadd.f32 %v4920_v18, %v5074_v32 }
 0x19e   : > { %1742 = vst [vmem:[#allocation2 + $0x68] sm:$0xff] %v4465_v23 }
 0x19f   : > { %1743 = vst [vmem:[#allocation2 + $0x70] sm:$0x3] %v4465_v23  ;;  %v755_v11 = vadd.f32 %v5053_v0, %v442_v14  ;;  %v763_v32 = vadd.f32 %v5092_v25, %v458_v56  ;;  %v5461_v14 = vpop.f32.mrf.mxu3 }
 0x1a0   : > { %1744 = vst [vmem:[#allocation2 + $0x78] sm:$0xff] %v4465_v23 }
 0x1a1   : > { %1745 = vst [vmem:[#allocation2 + $0x80] sm:$0xff] %v4465_v23  ;;  %v942_v0 = vadd.f32 %v5055_v39, %v755_v11  ;;  %v474_v39 = vadd.f32 %v4920_v18, %v5115_v10 }
 0x1a2   : > { %v5416_v47 = vpop.f32.mrf.mxu0  ;;  %v5418_v44 = vpop.f32.mrf.mxu1  ;;  %1746 = vst [vmem:[#allocation2 + $0x88] sm:$0x3] %v4465_v23 }
 0x1a3   : > { %7753 = vst [vmem:[#allocation80_spill] sm:$0xff] %v5416_v47  ;;  %v771_v11 = vadd.f32 %v5130_v60, %v474_v39 }
 0x1a4   : > { %7754 = vst [vmem:[#allocation81_spill] sm:$0xff] %v5418_v44  ;;  %v759_v44 = vadd.f32 %v5076_v20, %v450_v12  ;;  %v466_v20 = vadd.f32 %v4920_v18, %v5090_v34  ;;  %v5476_v18 = vadd.f32 %v5081_v6, %v942_v0 }
 0x1a5   : > { %1404 = vmatmul.f32.gmra.mxu0 %v4900_v24  ;;  %1561 = vmatmul.f32.gmra.mxu1 %v4895_v19  ;;  %1747 = vst [vmem:[#allocation2 + $0x90] sm:$0xff] %v4465_v23  ;;  %v937_v19 = vadd.f32 %v5042_v3, %v751_v30  ;;  %v2833_v3 = vld [vmem:[%s7517_s5 + $0x10] sm:$0xff]  ;;  %v5485_v10 = vpop.f32.mrf.mxu2  ;;  %v2832_v30 = vld [vmem:[%s7517_s5 + $0x8] sm:$0xff] }
 0x1a6   : > { %1748 = vst [vmem:[#allocation2 + $0x98] sm:$0xff] %v4465_v23  ;;  %v947_v22 = vadd.f32 %v5083_v58, %v759_v44  ;;  %v5457_v12 = vand.u32 4294901760, %v2833_v3  ;;  %v5491_v44 = vld [vmem:[%s7514_s2] ss:$0 sm:$0xff] }
 0x1a7   : > { %1749 = vst [vmem:[#allocation2 + $0xa0] sm:$0x3] %v4465_v23  ;;  %v5467_v34 = vadd.f32 %v5047_v42, %v937_v19  ;;  %v767_v42 = vadd.f32 %v5117_v62, %v466_v20  ;;  %v482_v6 = vadd.f32 %v5491_v44, %v5128_v7  ;;  %v506_v7 = vadd.f32 %v5491_v44, %v5179_v53 }
 0x1a8   : > { %1750 = vst [vmem:[#allocation2 + $0xa8] sm:$0xff] %v4465_v23  ;;  %2878 = vmatpush.msrb.mxu2 %v5457_v12  ;;  %v5472_v58 = vsub.f32 %v2833_v3, %v5457_v12  ;;  %3601 = vmatpush.msra.mxu1 %v5457_v12  ;;  %v5479_v25 = vadd.f32 %v5099_v49, %v947_v22 }
 0x1a9   : > { %1751 = vst [vmem:[#allocation2 + $0xb0] sm:$0xff] %v4465_v23  ;;  %v490_v49 = vadd.f32 %v5491_v44, %v5147_v16  ;;  %v514_v56 = vadd.f32 %v5491_v44, %v5192_v26  ;;  %v522_v19 = vadd.f32 %v5491_v44, %v5214_v17  ;;  %v530_v0 = vadd.f32 %v5491_v44, %v5225_v1 }
 0x1aa   : > { %v5444_v47 = vpop.f32.mrf.mxu1  ;;  %v1345_v50 = vpop.f32.mrf.mxu0  ;;  %1752 = vst [vmem:[#allocation2 + $0xb8] sm:$0x3] %v4465_v23  ;;  %v7592_v62 = vand.u32 4294901760, %v5472_v58  ;;  %3406 = vmatpush.msra.mxu0 %v5472_v58  ;;  %v538_v53 = vadd.f32 %v5491_v44, %v5245_v15  ;;  %v775_v1 = vadd.f32 %v5149_v61, %v482_v6  ;;  %v546_v15 = vadd.f32 %v5491_v44, %v5258_v57 }
 0x1ab   : > { %1753 = vst [vmem:[#allocation2 + $0xc0] sm:$0xff] %v4465_v23  ;;  %v1346_v16 = vadd.f32 %v1345_v50, %v4932_v29  ;;  %v779_v17 = vadd.f32 %v5159_v48, %v490_v49  ;;  %v787_v48 = vadd.f32 %v5194_v63, %v506_v7  ;;  %v795_v39 = vadd.f32 %v5227_v4, %v522_v19  ;;  %v5549_v49 = vpop.f32.mrf.mxu3 }
 0x1ac   : > { %1754 = vst [vmem:[#allocation2 + $0xc8] sm:$0xff] %v4465_v23  ;;  %v3221_v29 = vsub.f32 %v5472_v58, %v7592_v62  ;;  %v799_v57 = vadd.f32 %v5247_v41, %v530_v0  ;;  %v803_v6 = vadd.f32 %v5260_v13, %v538_v53  ;;  %v957_v63 = vadd.f32 %v5126_v5, %v767_v42  ;;  %v7796_v62 = vld [vmem:[#allocation78_spill] sm:$0xff] }
 0x1ad   : > { %1408 = vmatmul.f32.gmra.mxu0 %v4905_v36  ;;  %1565 = vmatmul.f32.gmra.mxu1 %v4900_v24  ;;  %1755 = vst [vmem:[#allocation2 + $0xd0] sm:$0x3] %v4465_v23  ;;  %v5482_v24 = vadd.f32 %v5109_v33, %v763_v32  ;;  %v498_v33 = vadd.f32 %v5491_v44, %v5157_v38  ;;  %v5510_v38 = vand.u32 4294901760, %v2832_v30  ;;  %v5567_v19 = vpop.f32.mrf.mxu2 }
 0x1ae   : > { %1756 = vst [vmem:[#allocation2 + $0xd8] sm:$0xff] %v4465_v23  ;;  %v3222_v32 = vand.u32 4294901760, %v3221_v29  ;;  %v962_v4 = vadd.f32 %v5154_v52, %v771_v11  ;;  %v562_v13 = vadd.f32 %v5491_v44, %v5293_v37  ;;  %v967_v41 = vadd.f32 %v5168_v55, %v775_v1  ;;  %v7757_v52 = vld [vmem:[#allocation34_spill] sm:$0xff]  ;;  %v7759_v37 = vld [vmem:[#allocation48_spill] sm:$0xff] }
 0x1af   : > { %1757 = vst [vmem:[#allocation2 + $0xe0] sm:$0xff] %v4465_v23  ;;  %2880 = vmatpush.msrb.mxu2 %v5510_v38  ;;  %v5529_v26 = vsub.f32 %v2832_v30, %v5510_v38  ;;  %3603 = vmatpush.msra.mxu1 %v5510_v38  ;;  %v783_v20 = vadd.f32 %v5181_v27, %v498_v33  ;;  %v7755_v30 = vld [vmem:[#allocation42_spill] sm:$0xff] }
 0x1b0   : > { %1758 = vst [vmem:[#allocation2 + $0xe8] sm:$0x3] %v4465_v23  ;;  %v791_v27 = vadd.f32 %v5216_v28, %v514_v56  ;;  %3223 = vmatpush.msrb.mxu3 %v3222_v32  ;;  %v554_v33 = vadd.f32 %v5491_v44, %v5280_v45  ;;  %v972_v7 = vadd.f32 %v7755_v30, %v779_v17  ;;  %v7758_v45 = vld [vmem:[#allocation46_spill] sm:$0xff] }
 0x1b1   : > { %1759 = vst [vmem:[#allocation2 + $0xf0] sm:$0xff] %v4465_v23  ;;  %v7591_v61 = vand.u32 4294901760, %v5529_v26  ;;  %3409 = vmatpush.msra.mxu0 %v5529_v26  ;;  %v5572_v42 = vadd.f32 %v7757_v52, %v5482_v24  ;;  %v977_v11 = vadd.f32 %v7758_v45, %v783_v20  ;;  %v982_v0 = vadd.f32 %v7759_v37, %v787_v48  ;;  %v7762_v24 = vld [vmem:[#allocation37_spill] sm:$0xff]  ;;  %v7763_v20 = vld [vmem:[#allocation38_spill] sm:$0xff]  ;;  %v7764_v48 = vld [vmem:[#allocation59_spill] sm:$0xff] }
 0x1b2   : > { %v5518_v22 = vpop.f32.mrf.mxu0  ;;  %v1506_v60 = vpop.f32.mrf.mxu1  ;;  %1760 = vst [vmem:[#allocation2 + $0xf8] sm:$0xff] %v4465_v23  ;;  %v997_v17 = vadd.f32 %v5291_v21, %v799_v57  ;;  %v1002_v32 = vadd.f32 %v5320_v46, %v803_v6  ;;  %v7767_v21 = vld [vmem:[#allocation45_spill] sm:$0xff]  ;;  %v7768_v6 = vld [vmem:[#allocation3_spill] sm:$0xff]  ;;  %v7772_v52 = vld [vmem:[#allocation6_spill] sm:$0xff] }
 0x1b3   : > { %v1507_v50 = vadd.f32 %v1506_v60, %v1346_v16  ;;  %1761 = vst [vmem:[#allocation2 + $0x100] sm:$0x3] %v4465_v23  ;;  %v3227_v28 = vsub.f32 %v5529_v26, %v7591_v61  ;;  %v7756_v16 = vld [vmem:[#allocation57_spill] sm:$0xff]  ;;  %v7760_v60 = vld [vmem:[#allocation52_spill] sm:$0xff]  ;;  %v5595_v46 = vadd.f32 %v7767_v21, %v972_v7  ;;  %v1350_v7 = vadd.f32 %v5518_v22, %v7772_v52  ;;  %v7774_v45 = vld [vmem:[#allocation58_spill] sm:$0xff] }
 0x1b4   : > { %1762 = vst [vmem:[#allocation2 + $0x108] sm:$0xff] %v4465_v23  ;;  %v807_v56 = vadd.f32 %v7756_v16, %v546_v15  ;;  %v987_v29 = vadd.f32 %v7760_v60, %v791_v27  ;;  %v5583_v15 = vadd.f32 %v7762_v24, %v957_v63  ;;  %v811_v27 = vadd.f32 %v7764_v48, %v554_v33  ;;  %v7769_v63 = vld [vmem:[#allocation47_spill] sm:$0xff]  ;;  %v7775_v37 = vld [vmem:[#allocation62_spill] sm:$0xff]  ;;  %v7779_v48 = vld [vmem:[#allocation65_spill] sm:$0xff] }
 0x1b5   : > { %vm1633_vm0 = vcmp.gt.f32.partialorder %v1507_v50, 0.0  ;;  %v1665_v3 = vmul.f32 0.01, %v1507_v50  ;;  %1412 = vmatmul.f32.gmra.mxu0 %v4910_v51  ;;  %1569 = vmatmul.f32.gmra.mxu1 %v4905_v36  ;;  %1763 = vst [vmem:[#allocation2 + $0x110] sm:$0xff] %v4465_v23  ;;  %v3228_v5 = vand.u32 4294901760, %v3227_v28  ;;  %v7765_v28 = vld [vmem:[#allocation64_spill] sm:$0xff] }
 0x1b6   : > { %1764 = vst [vmem:[#allocation2 + $0x118] sm:$0x3] %v4465_v23  ;;  %v815_v30 = vadd.f32 %v7765_v28, %v562_v13  ;;  %v1007_v57 = vadd.f32 %v5335_v31, %v807_v56  ;;  %v7770_v33 = vld [vmem:[#allocation51_spill] sm:$0xff]  ;;  %v5615_v31 = vld [vmem:[%s7515_s3] ss:$0 sm:$0xff]  ;;  %v1915_v22 = vld [vmem:[#allocation2 + $0x1] sm:$0xff]  ;;  %v1012_v24 = vadd.f32 %v5357_v2, %v811_v27  ;;  %v5648_v27 = vpop.f32.mrf.mxu3 }
 0x1b7   : > { %v5551_v36 = vsel %vm1633_vm0, %v1507_v50, %v1665_v3  ;;  %1765 = vst [vmem:[#allocation2 + $0x120] sm:$0xff] %v4465_v23  ;;  %v7761_v50 = vld [vmem:[#allocation56_spill] sm:$0xff]  ;;  %3229 = vmatpush.msrb.mxu3 %v3228_v5  ;;  %v5586_v3 = vadd.f32 %v7763_v20, %v962_v4  ;;  %v5602_v4 = vadd.f32 %v7769_v63, %v977_v11  ;;  %v7771_v5 = vld [vmem:[#allocation63_spill] sm:$0xff]  ;;  %v7781_v2 = vld [vmem:[#allocation70_spill] sm:$0xff]  ;;  %v5659_v52 = vmul.f32 0.0, %v5615_v31 }
 0x1b8   : > { %1784 = vst [vmem:[#allocation2 + $0x19] sm:$0xff] %v5551_v36  ;;  %v992_v1 = vadd.f32 %v7761_v50, %v795_v39  ;;  %v7766_v39 = vld [vmem:[#allocation41_spill] sm:$0xff]  ;;  %v5605_v13 = vadd.f32 %v7770_v33, %v982_v0  ;;  %v5624_v0 = vadd.f32 %v7775_v37, %v997_v17  ;;  %v7777_v60 = vld [vmem:[#allocation67_spill] sm:$0xff]  ;;  %v1017_v20 = vadd.f32 %v5379_v35, %v815_v30  ;;  %v7783_v21 = vld [vmem:[#allocation66_spill] sm:$0xff] }
 0x1b9   : > { %1766 = vst [vmem:[#allocation2 + $0x128] sm:$0xff] %v4465_v23  ;;  %v5592_v16 = vadd.f32 %v7766_v39, %v967_v41  ;;  %v570_v41 = vadd.f32 %v5491_v44, %v7771_v5  ;;  %v5627_v50 = vadd.f32 %v7777_v60, %v1002_v32  ;;  %v2831_v17 = vld [vmem:[%s7517_s5] sm:$0xff]  ;;  %v5644_v28 = vadd.f32 %v5353_v40, %v1007_v57  ;;  %v7784_v33 = vld [vmem:[#allocation72_spill] sm:$0xff] }
 0x1ba   : > { %v1353_v55 = vpop.f32.mrf.mxu0  ;;  %v1510_v53 = vpop.f32.mrf.mxu1  ;;  %1767 = vst [vmem:[#allocation2 + $0x130] sm:$0x3] %v4465_v23  ;;  %v5621_v11 = vadd.f32 %v7774_v45, %v992_v1  ;;  %v5641_v32 = vld [vmem:[%s7515_s3 + $0x1] ss:$0 sm:$0xff]  ;;  %v586_v35 = vadd.f32 %v5491_v44, %v7781_v2  ;;  %v5652_v39 = vand.u32 4294901760, %v2831_v17  ;;  %v594_v5 = vadd.f32 %v5491_v44, %v7784_v33  ;;  %v2013_v60 = vld [vmem:[#allocation2 + $0x2] sm:$0xff] }
 0x1bb   : > { %1768 = vst [vmem:[#allocation2 + $0x138] sm:$0xff] %v4465_v23  ;;  %v1511_v1 = vadd.f32 %v1510_v53, %v1350_v7  ;;  %v7782_v53 = vld [vmem:[#allocation8_spill] sm:$0xff]  ;;  %v819_v63 = vadd.f32 %v7783_v21, %v570_v41  ;;  %v1948_v7 = vmul.f32 %v5641_v32, %v1915_v22  ;;  %v602_v41 = vadd.f32 %v5491_v44, %v5381_v54  ;;  %v7787_v2 = vld [vmem:[#allocation71_spill] sm:$0xff]  ;;  %v7790_v33 = vld [vmem:[#allocation73_spill] sm:$0xff] }
 0x1bc   : > { %1769 = vst [vmem:[#allocation2 + $0x140] sm:$0xff] %v4465_v23  ;;  %v1354_v30 = vadd.f32 %v1353_v55, %v7782_v53  ;;  %v5665_v55 = vld [vmem:[%s7515_s3 + $0x2] ss:$0 sm:$0xff]  ;;  %2882 = vmatpush.msrb.mxu2 %v5652_v39  ;;  %v5672_v37 = vsub.f32 %v2831_v17, %v5652_v39  ;;  %3605 = vmatpush.msra.mxu1 %v5652_v39  ;;  %v7791_v61 = vld [vmem:[#allocation4_spill] sm:$0xff] }
 0x1bd   : > { %1416 = vmatmul.f32.gmra.mxu0 %v7768_v6  ;;  %1573 = vmatmul.f32.gmra.mxu1 %v4910_v51  ;;  %1770 = vst [vmem:[#allocation2 + $0x148] sm:$0x3] %v4465_v23  ;;  %v7773_v51 = vld [vmem:[#allocation54_spill] sm:$0xff]  ;;  %v5676_v22 = vadd.f32 %v5375_v59, %v1012_v24  ;;  %v1666_v53 = vmul.f32 0.01, %v1511_v1  ;;  %v827_v17 = vadd.f32 %v7790_v33, %v586_v35  ;;  %vm1634_vm1 = vcmp.gt.f32.partialorder %v1511_v1, 0.0 }
 0x1be   : > { %v5618_v56 = vadd.f32 %v7773_v51, %v987_v29  ;;  %7776 = vst [vmem:[#allocation42_spill] sm:$0xff] %v5624_v0  ;;  %v578_v29 = vadd.f32 %v5491_v44, %v7779_v48  ;;  %v1041_v51 = vpop.f32.mrf.mxu2  ;;  %v5679_v48 = vadd.f32 %v5395_v43, %v1017_v20  ;;  %v1980_v59 = vadd.f32 %v1948_v7, %v5659_v52  ;;  %v5696_v20 = vld [vmem:[%s7515_s3 + $0x3] ss:$0 sm:$0xff] }
 0x1bf   : > { %7778 = vst [vmem:[#allocation57_spill] sm:$0xff] %v5627_v50  ;;  %v2046_v24 = vmul.f32 %v5665_v55, %v2013_v60  ;;  %v7792_v35 = vld [vmem:[#allocation17_spill] sm:$0xff]  ;;  %3412 = vmatpush.msra.mxu0 %v5672_v37  ;;  %v835_v43 = vadd.f32 %v7796_v62, %v602_v41  ;;  %v7797_v7 = vand.u32 4294901760, %v5672_v37  ;;  %v7801_v62 = vld [vmem:[#allocation12_spill] sm:$0xff] }
 0x1c0   : > { %1771 = vst [vmem:[#allocation2 + $0x150] sm:$0xff] %v4465_v23  ;;  %v823_v54 = vadd.f32 %v7787_v2, %v578_v29  ;;  %v1916_v29 = vld [vmem:[#allocation2 + $0x9] sm:$0xff]  ;;  %v7793_v2 = vand.u32 4294901760, %v7792_v35 }
 0x1c1   : > { %1772 = vst [vmem:[#allocation2 + $0x158] sm:$0xff] %v4465_v23  ;;  %v3233_v60 = vsub.f32 %v5672_v37, %v7797_v7 }
 0x1c2   : > { %7780 = vst [vmem:[#allocation34_spill] sm:$0xff] %v5644_v28  ;;  %v1357_v40 = vpop.f32.mrf.mxu0  ;;  %v1514_v57 = vpop.f32.mrf.mxu1  ;;  %v7798_v28 = vld [vmem:[#allocation77_spill] sm:$0xff] }
 0x1c3   : > { %1773 = vst [vmem:[#allocation2 + $0x160] sm:$0x3] %v4465_v23  ;;  %v1515_v45 = vadd.f32 %v1514_v57, %v1354_v30  ;;  %v7788_v30 = vld [vmem:[#allocation11_spill] sm:$0xff]  ;;  %v610_v35 = vadd.f32 %v5491_v44, %v7798_v28  ;;  %v1358_v41 = vadd.f32 %v1357_v40, %v7801_v62  ;;  %v1032_v28 = vadd.f32 %v5485_v10, %v827_v17  ;;  %v7805_v17 = vld [vmem:[#allocation80_spill] sm:$0xff] }
 0x1c4   : > { %1774 = vst [vmem:[#allocation2 + $0x168] sm:$0xff] %v4465_v23  ;;  %v7789_v21 = vand.u32 4294901760, %v7788_v30 }
 0x1c5   : > { %1775 = vst [vmem:[#allocation2 + $0x170] sm:$0xff] %v4465_v23  ;;  %v1667_v57 = vmul.f32 0.01, %v1515_v45  ;;  %1420 = vmatmul.f32.gmra.mxu0 %v7791_v61  ;;  %1577 = vmatmul.f32.gmra.mxu1 %v7768_v6  ;;  %vm1635_vm2 = vcmp.gt.f32.partialorder %v1515_v45, 0.0  ;;  %v7794_v6 = vld [vmem:[#allocation79_spill] sm:$0xff] }
 0x1c6   : > { %7785 = vst [vmem:[#allocation46_spill] sm:$0xff] %v5676_v22  ;;  %3802 = vmatpush.msra.mxu2 %v7789_v21  ;;  %v1022_v30 = vadd.f32 %v7794_v6, %v819_v63  ;;  %v7795_v21 = vld [vmem:[#allocation76_spill] sm:$0xff]  ;;  %v1027_v22 = vadd.f32 %v5429_v8, %v823_v54  ;;  %v5713_v63 = vsel %vm1634_vm1, %v1511_v1, %v1666_v53 }
 0x1c7   : > { %7786 = vst [vmem:[#allocation48_spill] sm:$0xff] %v5679_v48  ;;  %v831_v33 = vadd.f32 %v7795_v21, %v594_v5  ;;  %v2111_v48 = vld [vmem:[#allocation2 + $0x18] sm:$0xff]  ;;  %v7799_v5 = vld [vmem:[#allocation23_spill] sm:$0xff]  ;;  %v5720_v6 = vsel %vm1635_vm2, %v1515_v45, %v1667_v57  ;;  %v3234_v21 = vand.u32 4294901760, %v3233_v60  ;;  %v1949_v8 = vmul.f32 %v5641_v32, %v1916_v29 }
 0x1c8   : > { %1776 = vst [vmem:[#allocation2 + $0x178] sm:$0x3] %v4465_v23  ;;  %3806 = vmatpush.msra.mxu2 %v7793_v2  ;;  %v7800_v2 = vand.u32 4294901760, %v7799_v5  ;;  %v2078_v53 = vadd.f32 %v2046_v24, %v1980_v59  ;;  %v2144_v7 = vmul.f32 %v5696_v20, %v2111_v48  ;;  %v2014_v5 = vld [vmem:[#allocation2 + $0xa] sm:$0xff]  ;;  %v1042_v45 = vadd.f32 %v1041_v51, %v835_v43  ;;  %v7806_v24 = vld [vmem:[#allocation81_spill] sm:$0xff]  ;;  %v7808_v51 = vld [vmem:[#allocation32_spill] sm:$0xff] }
 0x1c9   : > { %1777 = vst [vmem:[#allocation2 + $0x180] sm:$0xff] %v4465_v23  ;;  %v1037_v40 = vadd.f32 %v5567_v19, %v831_v33  ;;  %3235 = vmatpush.msrb.mxu3 %v3234_v21  ;;  %v5731_v10 = vadd.f32 %v5425_v9, %v1022_v30  ;;  %v618_v59 = vadd.f32 %v5491_v44, %v7805_v17  ;;  %v5740_v19 = vld [vmem:[%s7515_s3 + $0x4] ss:$0 sm:$0xff]  ;;  %v7809_v43 = vand.u32 4294901760, %v7808_v51  ;;  %v1046_v9 = vpop.f32.mrf.mxu2  ;;  %v7812_v21 = vld [vmem:[#allocation16_spill] sm:$0xff] }
 0x1ca   : > { %1778 = vst [vmem:[#allocation2 + $0x188] sm:$0xff] %v4465_v23  ;;  %3810 = vmatpush.msra.mxu2 %v7800_v2  ;;  %v1361_v54 = vpop.f32.mrf.mxu0  ;;  %v1518_v1 = vpop.f32.mrf.mxu1  ;;  %v7802_v2 = vld [vmem:[#allocation28_spill] sm:$0xff]  ;;  %v839_v29 = vadd.f32 %v7806_v24, %v610_v35  ;;  %v7810_v33 = vld [vmem:[#allocation5_spill] sm:$0xff]  ;;  %v1981_v44 = vadd.f32 %v1949_v8, %v5659_v52  ;;  %v2047_v60 = vmul.f32 %v5665_v55, %v2014_v5 }
 0x1cb   : > { %1779 = vst [vmem:[#allocation2 + $0x190] sm:$0x3] %v4465_v23  ;;  %v7803_v50 = vand.u32 4294901760, %v7802_v2  ;;  %v1519_v57 = vadd.f32 %v1518_v1, %v1358_v41  ;;  %v5750_v35 = vadd.f32 %v5461_v14, %v1027_v22  ;;  %v2176_v62 = vadd.f32 %v2144_v7, %v2078_v53  ;;  %v7813_v1 = vld [vmem:[#allocation36_spill] sm:$0xff]  ;;  %v5769_v14 = vld [vmem:[%s7515_s3 + $0x5] ss:$0 sm:$0xff] }
 0x1cc   : > { %1780 = vst [vmem:[#allocation2 + $0x198] sm:$0xff] %v4465_v23  ;;  %v1852_v41 = vmul.f32 %v5615_v31, %v2111_v48  ;;  %v7814_v2 = vand.u32 4294901760, %v7813_v1  ;;  %v5757_v17 = vadd.f32 %v5549_v49, %v1032_v28  ;;  %v5774_v22 = vld [vmem:[%s7515_s3 + $0x7] ss:$0 sm:$0xff]  ;;  %v5776_v48 = vadd.f32 %v1046_v9, %v839_v29  ;;  %v7818_v53 = vld [vmem:[#allocation22_spill] sm:$0xff]  ;;  %v7819_v7 = vld [vmem:[#allocation40_spill] sm:$0xff] }
 0x1cd   : > { %1781 = vst [vmem:[#allocation2 + $0x1a0] sm:$0xff] %v4465_v23  ;;  %3814 = vmatpush.msra.mxu2 %v7803_v50  ;;  %v7807_v50 = vld [vmem:[#allocation10_spill] sm:$0xff]  ;;  %vm1636_vm3 = vcmp.gt.f32.partialorder %v1519_v57, 0.0  ;;  %v1668_v30 = vmul.f32 0.01, %v1519_v57  ;;  %1424 = vmatmul.f32.gmra.mxu0 %v7810_v33  ;;  %v2242_v49 = vmul.f32 %v5740_v19, %v5551_v36  ;;  %v1950_v28 = vmul.f32 %v5641_v32, %v5551_v36  ;;  %v7823_v1 = vld [vmem:[#allocation44_spill] sm:$0xff] }
 0x1ce   : > { %1782 = vst [vmem:[#allocation2 + $0x1a8] sm:$0x3] %v4465_v23  ;;  %v1264_v23 = vpop.f32.mrf.mxu3  ;;  %3993 = vmatpush.msra.mxu3 %v7807_v50  ;;  %1581 = vmatmul.f32.gmra.mxu1 %v7791_v61  ;;  %v5760_v61 = vadd.f32 %v5648_v27, %v1037_v40  ;;  %v5784_v27 = vld [vmem:[%s7515_s3 + $0x6] ss:$0 sm:$0xff]  ;;  %v7820_v5 = vand.u32 4294901760, %v7819_v7  ;;  %v5792_v40 = vadd.f32 %v5444_v47, %v618_v59  ;;  %v7824_v47 = vand.u32 4294901760, %v7823_v1 }
 0x1cf   : > { %1785 = vst [vmem:[#allocation2 + $0x21] sm:$0xff] %v5713_v63  ;;  %3818 = vmatpush.msra.mxu2 %v7809_v43  ;;  %v5762_v52 = vadd.f32 %v1264_v23, %v1042_v45  ;;  %v5764_v8 = vsel %vm1636_vm3, %v1519_v57, %v1668_v30  ;;  %v7821_v45 = vld [vmem:[#allocation14_spill] sm:$0xff]  ;;  %v2079_v23 = vadd.f32 %v2047_v60, %v1981_v44  ;;  %v7825_v7 = vld [vmem:[#allocation31_spill] sm:$0xff] }
 0x1d0   : > { %7804 = vst [vmem:[#allocation52_spill] sm:$0xff] %v5731_v10  ;;  %3995 = vmatpush.msra.mxu3 %v7812_v21  ;;  %v1362_v57 = vadd.f32 %v1361_v54, %v7821_v45  ;;  %v2243_v24 = vmul.f32 %v5740_v19, %v5713_v63  ;;  %v2274_v51 = vadd.f32 %v2242_v49, %v2176_v62  ;;  %v7822_v21 = vld [vmem:[#allocation27_spill] sm:$0xff] }
 0x1d1   : > { %1786 = vst [vmem:[#allocation2 + $0x31] sm:$0xff] %v5720_v6  ;;  %3822 = vmatpush.msra.mxu2 %v7814_v2  ;;  %v1982_v36 = vadd.f32 %v1950_v28, %v1852_v41  ;;  %v1951_v30 = vmul.f32 %v5641_v32, %v5713_v63  ;;  %v2537_v60 = vmul.f32 %v5774_v22, %v5720_v6  ;;  %v5810_v63 = vld [vmem:[%s7515_s3 + $0x8] ss:$0 sm:$0xff]  ;;  %v7826_v45 = vld [vmem:[#allocation7_spill] sm:$0xff] }
 0x1d2   : > { %7811 = vst [vmem:[#allocation56_spill] sm:$0xff] %v5750_v35  ;;  %3997 = vmatpush.msra.mxu3 %v7818_v53  ;;  %v1365_v29 = vpop.f32.mrf.mxu0  ;;  %v1522_v50 = vpop.f32.mrf.mxu1  ;;  %v2244_v53 = vmul.f32 %v5740_v19, %v5720_v6 }
 0x1d3   : > { %7815 = vst [vmem:[#allocation37_spill] sm:$0xff] %v5757_v17  ;;  %3826 = vmatpush.msra.mxu2 %v7820_v5  ;;  %v1523_v59 = vadd.f32 %v1522_v50, %v1362_v57 }
 0x1d4   : > { %7816 = vst [vmem:[#allocation38_spill] sm:$0xff] %v5760_v61  ;;  %3999 = vmatpush.msra.mxu3 %v7822_v21  ;;  %v2538_v21 = vmul.f32 %v5774_v22, %v5764_v8 }
 0x1d5   : > { %7817 = vst [vmem:[#allocation59_spill] sm:$0xff] %v5762_v52  ;;  %3830 = vmatpush.msra.mxu2 %v7824_v47  ;;  %vm1637_vm4 = vcmp.gt.f32.partialorder %v1523_v59, 0.0  ;;  %v1669_v5 = vmul.f32 0.01, %v1523_v59  ;;  %1428 = vmatmul.f32.gmra.mxu0 %v7826_v45  ;;  %v1952_v47 = vmul.f32 %v5641_v32, %v5720_v6  ;;  %v7827_v52 = vld [vmem:[#allocation35_spill] sm:$0xff] }
 0x1d6   : > { %1787 = vst [vmem:[#allocation2 + $0x39] sm:$0xff] %v5764_v8  ;;  %v2307_v43 = vld [vmem:[#allocation2 + $0x1a] sm:$0xff]  ;;  %v2308_v41 = vld [vmem:[#allocation2 + $0x22] sm:$0xff]  ;;  %4001 = vmatpush.msra.mxu3 %v7825_v7  ;;  %1585 = vmatmul.f32.gmra.mxu1 %v7810_v33 }
 0x1d7   : > { %v2112_v9 = vld [vmem:[#allocation2 + $0x20] sm:$0xff]  ;;  %v2340_v54 = vmul.f32 %v5769_v14, %v2307_v43  ;;  %v2048_v49 = vmul.f32 %v5665_v55, %v2307_v43  ;;  %v5825_v7 = vsel %vm1637_vm4, %v1523_v59, %v1669_v5  ;;  %v2341_v33 = vmul.f32 %v5769_v14, %v2308_v41 }
 0x1d8   : > { %v2406_v44 = vld [vmem:[#allocation2 + $0x30] sm:$0xff]  ;;  %v2145_v62 = vmul.f32 %v5696_v20, %v2112_v9  ;;  %v1853_v43 = vmul.f32 %v5615_v31, %v2112_v9  ;;  %4003 = vmatpush.msra.mxu3 %v7827_v52  ;;  %1788 = vst [vmem:[#allocation2 + $0x49] sm:$0xff] %v5825_v7  ;;  %v2049_v5 = vmul.f32 %v5665_v55, %v2308_v41 }
 0x1d9   : > { %v2439_v2 = vmul.f32 %v5784_v27, %v2406_v44  ;;  %v2146_v28 = vmul.f32 %v5696_v20, %v2406_v44  ;;  %v2372_v57 = vadd.f32 %v2340_v54, %v2274_v51  ;;  %v2080_v1 = vadd.f32 %v2048_v49, %v1982_v36 }
 0x1da   : > { %v2177_v50 = vadd.f32 %v2145_v62, %v2079_v23  ;;  %v7828_v23 = vld [vmem:[#allocation50_spill] sm:$0xff]  ;;  %v2245_v41 = vmul.f32 %v5740_v19, %v5764_v8 }
 0x1db   : > { %v2471_v61 = vadd.f32 %v2439_v2, %v2372_v57  ;;  %v7829_v54 = vand.u32 4294901760, %v7828_v23  ;;  %v7830_v62 = vld [vmem:[#allocation18_spill] sm:$0xff]  ;;  %v2178_v52 = vadd.f32 %v2146_v28, %v2080_v1  ;;  %v7831_v57 = vld [vmem:[#allocation39_spill] sm:$0xff]  ;;  %v1526_v23 = vpop.f32.mrf.mxu1 }
 0x1dc   : > { %v2275_v35 = vadd.f32 %v2243_v24, %v2177_v50  ;;  %v1366_v36 = vadd.f32 %v1365_v29, %v7830_v62  ;;  %v5837_v24 = vld [vmem:[%s7516_s4] ss:$0 sm:$0xff]  ;;  %v1854_v29 = vmul.f32 %v5615_v31, %v2406_v44  ;;  %4005 = vmatpush.msra.mxu3 %v7831_v57  ;;  %v1369_v50 = vpop.f32.mrf.mxu0  ;;  %v7832_v1 = vld [vmem:[#allocation55_spill] sm:$0xff] }
 0x1dd   : > { %v2602_v17 = vld [vmem:[#allocation2 + $0x32] sm:$0xff]  ;;  %3834 = vmatpush.msra.mxu2 %v7829_v54  ;;  %v2569_v59 = vadd.f32 %v2537_v60, %v2471_v61  ;;  %v5839_v49 = vld [vmem:[#allocation2 + $0x3a] sm:$0xff]  ;;  %v2276_v54 = vadd.f32 %v2244_v53, %v2178_v52  ;;  %v1983_v61 = vadd.f32 %v1951_v30, %v1853_v43  ;;  %v7833_v62 = vand.u32 4294901760, %v7832_v1 }
 0x1de   : > { %v2407_v51 = vld [vmem:[#allocation2 + $0x38] sm:$0xff]  ;;  %v2635_v9 = vmul.f32 %v5810_v63, %v2602_v17  ;;  %v2373_v2 = vadd.f32 %v2341_v33, %v2275_v35  ;;  %v2342_v28 = vmul.f32 %v5769_v14, %v2602_v17  ;;  %v1527_v35 = vadd.f32 %v1526_v23, %v1366_v36  ;;  %v7834_v44 = vld [vmem:[#allocation43_spill] sm:$0xff]  ;;  %v7835_v43 = vld [vmem:[#allocation61_spill] sm:$0xff]  ;;  %1589 = vmatmul.f32.gmra.mxu1 %v7826_v45 }
 0x1df   : > { %v2440_v6 = vmul.f32 %v5784_v27, %v2407_v51  ;;  %v2147_v60 = vmul.f32 %v5696_v20, %v2407_v51  ;;  %3838 = vmatpush.msra.mxu2 %v7833_v62  ;;  %4007 = vmatpush.msra.mxu3 %v7834_v44  ;;  %v2636_v57 = vmul.f32 %v5810_v63, %v5839_v49  ;;  %v7836_v1 = vand.u32 4294901760, %v7835_v43  ;;  %v2408_v43 = vld [vmem:[#allocation2 + $0x48] sm:$0xff] }
 0x1e0   : > { %v2667_v33 = vadd.f32 %v2635_v9, %v2569_v59  ;;  %v2081_v53 = vadd.f32 %v2049_v5, %v1983_v61  ;;  %v2050_v52 = vmul.f32 %v5665_v55, %v2602_v17  ;;  %v1953_v30 = vmul.f32 %v5641_v32, %v5764_v8  ;;  %v7837_v9 = vld [vmem:[#allocation9_spill] sm:$0xff] }
 0x1e1   : > { %v2472_v10 = vadd.f32 %v2440_v6, %v2373_v2  ;;  %3842 = vmatpush.msra.mxu2 %v7836_v1  ;;  %vm1638_vm5 = vcmp.gt.f32.partialorder %v1527_v35, 0.0  ;;  %v1670_v36 = vmul.f32 0.01, %v1527_v35  ;;  %1432 = vmatmul.f32.gmra.mxu0 %v7837_v9  ;;  %v2374_v2 = vadd.f32 %v2342_v28, %v2276_v54  ;;  %v7838_v61 = vld [vmem:[#allocation49_spill] sm:$0xff] }
 0x1e2   : > { %v2703_v6 = vadd.f32 %v5837_v24, %v2667_v33  ;;  %v2179_v23 = vadd.f32 %v2147_v60, %v2081_v53  ;;  %v1984_v5 = vadd.f32 %v1952_v47, %v1854_v29  ;;  %v1855_v17 = vmul.f32 %v5615_v31, %v2407_v51  ;;  %4009 = vmatpush.msra.mxu3 %v7838_v61  ;;  %v7839_v1 = vld [vmem:[#allocation69_spill] sm:$0xff]  ;;  %v7841_v51 = vld [vmem:[#allocation20_spill] sm:$0xff] }
 0x1e3   : > { %v2570_v59 = vadd.f32 %v2538_v21, %v2472_v10  ;;  %v5863_v8 = vsel %vm1638_vm5, %v1527_v35, %v1670_v36  ;;  %v7840_v0 = vand.u32 4294901760, %v7839_v1  ;;  %v2441_v10 = vmul.f32 %v5784_v27, %v2408_v43  ;;  %v7842_v35 = vld [vmem:[#allocation53_spill] sm:$0xff]  ;;  %v7846_v61 = vld [vmem:[#allocation60_spill] sm:$0xff] }
 0x1e4   : > { %vm2735_vm6 = vcmp.gt.f32.partialorder %v2703_v6, 0.0  ;;  %v2767_v62 = vmul.f32 0.01, %v2703_v6  ;;  %1789 = vst [vmem:[#allocation2 + $0x51] sm:$0xff] %v5863_v8  ;;  %v2277_v45 = vadd.f32 %v2245_v41, %v2179_v23  ;;  %v2082_v21 = vadd.f32 %v2050_v52, %v1984_v5  ;;  %4011 = vmatpush.msra.mxu3 %v7842_v35  ;;  %v1373_v33 = vpop.f32.mrf.mxu0  ;;  %v7844_v52 = vld [vmem:[#allocation75_spill] sm:$0xff] }
 0x1e5   : > { %v2668_v44 = vadd.f32 %v2636_v57, %v2570_v59  ;;  %3846 = vmatpush.msra.mxu2 %v7840_v0  ;;  %v2148_v47 = vmul.f32 %v5696_v20, %v2408_v43  ;;  %v1370_v29 = vadd.f32 %v1369_v50, %v7841_v51  ;;  %v2539_v60 = vmul.f32 %v5774_v22, %v5825_v7  ;;  %v1530_v0 = vpop.f32.mrf.mxu1  ;;  %v1051_v50 = vpop.f32.mrf.mxu2 }
 0x1e6   : > { %v2799_v54 = vsel %vm2735_vm6, %v2703_v6, %v2767_v62  ;;  %v2473_v53 = vadd.f32 %v2441_v10, %v2374_v2  ;;  %v2246_v41 = vmul.f32 %v5740_v19, %v5825_v7  ;;  %v7845_v59 = vand.u32 4294901760, %v7844_v52  ;;  %4013 = vmatpush.msra.mxu3 %v7846_v61  ;;  %1593 = vmatmul.f32.gmra.mxu1 %v7837_v9  ;;  %v7851_v9 = vld [vmem:[#allocation24_spill] sm:$0xff]  ;;  %v7852_v61 = vld [vmem:[#allocation74_spill] sm:$0xff] }
 0x1e7   : > { %v2704_v28 = vadd.f32 %v5837_v24, %v2668_v44  ;;  %v5875_v57 = vand.u32 4294901760, %v2799_v54  ;;  %v2180_v36 = vadd.f32 %v2148_v47, %v2082_v21  ;;  %v1531_v6 = vadd.f32 %v1530_v0, %v1370_v29  ;;  %v7847_v21 = vld [vmem:[#allocation13_spill] sm:$0xff] }
 0x1e8   : > { %3850 = vmatpush.msra.mxu2 %v7845_v59  ;;  %v1985_v5 = vadd.f32 %v1953_v30, %v1855_v17  ;;  %v2571_v2 = vadd.f32 %v2539_v60, %v2473_v53  ;;  %v2343_v44 = vmul.f32 %v5769_v14, %v5839_v49  ;;  %v2051_v17 = vmul.f32 %v5665_v55, %v5839_v49  ;;  %v7849_v60 = vld [vmem:[#allocation68_spill] sm:$0xff] }
 0x1e9   : > { %7843 = vst [vmem:[#allocation64_spill] sm:$0xff] %v5875_v57  ;;  %vm2736_vm7 = vcmp.gt.f32.partialorder %v2704_v28, 0.0  ;;  %v2768_v23 = vmul.f32 0.01, %v2704_v28  ;;  %v5883_v62 = vsub.f32 %v2799_v54, %v5875_v57  ;;  %3237 = vmatmul.f32.vlgmr.msrb.gmra.mxu3 %v5875_v57  ;;  %v5888_v1 = vadd.f32 %v2246_v41, %v2180_v36  ;;  %1436 = vmatmul.f32.gmra.mxu0 %v7847_v21 }
 0x1ea   : > { %vm1639_vm8 = vcmp.gt.f32.partialorder %v1531_v6, 0.0  ;;  %v1671_v10 = vmul.f32 0.01, %v1531_v6  ;;  %v5895_v47 = vadd.f32 %v1051_v50, %v5792_v40  ;;  %v2540_v54 = vmul.f32 %v5774_v22, %v5863_v8  ;;  %4015 = vmatpush.msra.mxu3 %v7849_v60 }
 0x1eb   : > { %v2800_v30 = vsel %vm2736_vm7, %v2704_v28, %v2768_v23  ;;  %v7593_v51 = vand.u32 4294901760, %v5883_v62  ;;  %v7850_v35 = vand.u32 4294901760, %v5472_v58  ;;  %v1374_v28 = vadd.f32 %v1373_v33, %v7851_v9  ;;  %v2604_v49 = vld [vmem:[#allocation2 + $0x4a] sm:$0xff]  ;;  %v5920_v59 = vld [vmem:[#allocation2 + $0x52] sm:$0xff] }
 0x1ec   : > { %v5898_v29 = vand.u32 4294901760, %v2800_v30  ;;  %v5906_v0 = vsel %vm1639_vm8, %v1531_v6, %v1671_v10  ;;  %v2375_v53 = vadd.f32 %v2343_v44, %v2277_v45  ;;  %v5908_v40 = vld [vmem:[#allocation2 + $0x50] sm:$0xff]  ;;  %v2083_v36 = vadd.f32 %v2051_v17, %v1985_v5  ;;  %v5922_v45 = vpop.f32.mrf.mxu3  ;;  %4017 = vmatpush.msra.mxu3 %v7852_v61  ;;  %v1377_v44 = vpop.f32.mrf.mxu0 }
 0x1ed   : > { %3854 = vmatpush.msra.mxu2 %v7850_v35  ;;  %1790 = vst [vmem:[#allocation2 + $0x61] sm:$0xff] %v5906_v0  ;;  %v2886_v41 = vsub.f32 %v5883_v62, %v7593_v51  ;;  %v2637_v58 = vmul.f32 %v5810_v63, %v2604_v49  ;;  %v2442_v33 = vmul.f32 %v5784_v27, %v5908_v40  ;;  %v1534_v10 = vpop.f32.mrf.mxu1  ;;  %v7853_v9 = vand.u32 4294901760, %v5529_v26 }
 0x1ee   : > { %7848 = vst [vmem:[#allocation41_spill] sm:$0xff] %v5898_v29  ;;  %v5915_v52 = vsub.f32 %v2800_v30, %v5898_v29  ;;  %v2149_v50 = vmul.f32 %v5696_v20, %v5908_v40  ;;  %v2247_v6 = vmul.f32 %v5740_v19, %v5863_v8  ;;  %v1856_v23 = vmul.f32 %v5615_v31, %v2408_v43 }
 0x1ef   : > { %v1954_v5 = vmul.f32 %v5641_v32, %v5825_v7  ;;  %v2887_v30 = vand.u32 4294901760, %v2886_v41  ;;  %v2669_v60 = vadd.f32 %v2637_v58, %v2571_v2  ;;  %v2474_v35 = vadd.f32 %v2442_v33, %v2375_v53  ;;  %3858 = vmatpush.msra.mxu2 %v7853_v9  ;;  %4019 = vmatpush.msra.mxu3 %v5457_v12 }
 0x1f0   : > { %v7600_v17 = vand.u32 4294901760, %v5915_v52  ;;  %v1535_v51 = vadd.f32 %v1534_v10, %v1374_v28  ;;  %v2638_v57 = vmul.f32 %v5810_v63, %v5920_v59  ;;  %v2181_v43 = vadd.f32 %v2149_v50, %v2083_v36  ;;  %v7854_v28 = vld [vmem:[#allocation15_spill] sm:$0xff]  ;;  %1597 = vmatmul.f32.gmra.mxu1 %v7847_v21 }
 0x1f1   : > { %v1955_v7 = vmul.f32 %v5641_v32, %v5863_v8  ;;  %2888 = vmatmul.f32.vlgmr.msrb.gmra.mxu2 %v2887_v30  ;;  %3241 = vmatmul.f32.gmra.mxu3 %v5898_v29  ;;  %v2705_v41 = vadd.f32 %v5837_v24, %v2669_v60  ;;  %v2572_v2 = vadd.f32 %v2540_v54, %v2474_v35  ;;  %v7855_v54 = vand.u32 4294901760, %v5672_v37 }
 0x1f2   : > { %v2344_v53 = vmul.f32 %v5769_v14, %v2604_v49  ;;  %vm1640_vm9 = vcmp.gt.f32.partialorder %v1535_v51, 0.0  ;;  %v1672_v26 = vmul.f32 0.01, %v1535_v51  ;;  %1440 = vmatmul.f32.gmra.mxu0 %v7854_v28  ;;  %v2894_v8 = vsub.f32 %v5915_v52, %v7600_v17  ;;  %4021 = vmatpush.msra.mxu3 %v5510_v38 }
 0x1f3   : > { %v2279_v36 = vadd.f32 %v2247_v6, %v2181_v43  ;;  %vm2737_vm10 = vcmp.gt.f32.partialorder %v2705_v41, 0.0  ;;  %v2769_v12 = vmul.f32 0.01, %v2705_v41  ;;  %v2670_v58 = vadd.f32 %v2638_v57, %v2572_v2  ;;  %3862 = vmatpush.msra.mxu2 %v7855_v54 }
 0x1f4   : > { %v2541_v33 = vmul.f32 %v5774_v22, %v5906_v0  ;;  %v1378_v50 = vadd.f32 %v1377_v44, %v5467_v34  ;;  %v5954_v61 = vsel %vm1640_vm9, %v1535_v51, %v1672_v26  ;;  %v5956_v21 = vld [vmem:[#allocation2 + $0x60] sm:$0xff]  ;;  %v1986_v10 = vadd.f32 %v1954_v5, %v1856_v23  ;;  %4023 = vmatpush.msra.mxu3 %v5652_v39  ;;  %v1276_v9 = vpop.f32.mrf.mxu3 }
 0x1f5   : > { %v2052_v6 = vmul.f32 %v5665_v55, %v2604_v49  ;;  %1791 = vst [vmem:[#allocation2 + $0x69] sm:$0xff] %v5954_v61  ;;  %v2801_v57 = vsel %vm2737_vm10, %v2705_v41, %v2769_v12  ;;  %v2706_v30 = vadd.f32 %v5837_v24, %v2670_v58  ;;  %v2376_v60 = vadd.f32 %v2344_v53, %v5888_v1  ;;  %v1381_v49 = vpop.f32.mrf.mxu0  ;;  %v1538_v23 = vpop.f32.mrf.mxu1 }
 0x1f6   : > { %v2443_v38 = vmul.f32 %v5784_v27, %v5956_v21  ;;  %v2895_v37 = vand.u32 4294901760, %v2894_v8  ;;  %v5964_v35 = vand.u32 4294901760, %v2801_v57  ;;  %v2150_v51 = vmul.f32 %v5696_v20, %v5956_v21 }
 0x1f7   : > { %v2084_v34 = vadd.f32 %v2052_v6, %v1986_v10  ;;  %vm2738_vm11 = vcmp.gt.f32.partialorder %v2706_v30, 0.0  ;;  %v2770_v5 = vmul.f32 0.01, %v2706_v30  ;;  %v1857_v1 = vmul.f32 %v5615_v31, %v5908_v40  ;;  %v7857_v40 = vld [vmem:[#allocation19_spill] sm:$0xff] }
 0x1f8   : > { %7856 = vst [vmem:[#allocation45_spill] sm:$0xff] %v5964_v35  ;;  %v2475_v44 = vadd.f32 %v2443_v38, %v2376_v60  ;;  %v1539_v43 = vadd.f32 %v1538_v23, %v1378_v50  ;;  %v5972_v41 = vsub.f32 %v2801_v57, %v5964_v35  ;;  %v2345_v2 = vmul.f32 %v5769_v14, %v5920_v59 }
 0x1f9   : > { %v2182_v53 = vadd.f32 %v2150_v51, %v2084_v34  ;;  %2896 = vmatmul.f32.gmra.mxu2 %v2895_v37  ;;  %3245 = vmatmul.f32.gmra.mxu3 %v5964_v35  ;;  %v2802_v39 = vsel %vm2738_vm11, %v2706_v30, %v2770_v5  ;;  %v2248_v8 = vmul.f32 %v5740_v19, %v5906_v0  ;;  %v6730_v35 = vld [vmem:[%s7515_s3 + $0x2] ss:$0 sm:$0xff] }
 0x1fa   : > { %v2573_v26 = vadd.f32 %v2541_v33, %v2475_v44  ;;  %vm1641_vm12 = vcmp.gt.f32.partialorder %v1539_v43, 0.0  ;;  %v1673_v12 = vmul.f32 0.01, %v1539_v43  ;;  %1444 = vmatmul.f32.gmra.mxu0 %v7857_v40  ;;  %1601 = vmatmul.f32.gmra.mxu1 %v7854_v28  ;;  %v7598_v58 = vand.u32 4294901760, %v5972_v41 }
 0x1fb   : > { %v5982_v54 = vand.u32 4294901760, %v2802_v39  ;;  %v5986_v50 = vadd.f32 %v5922_v45, %v5776_v48  ;;  %v5989_v10 = vadd.f32 %v1276_v9, %v5895_v47  ;;  %v2280_v33 = vadd.f32 %v2248_v8, %v2182_v53 }
 0x1fc   : > { %v1987_v6 = vadd.f32 %v1955_v7, %v1857_v1  ;;  %v5991_v57 = vsel %vm1641_vm12, %v1539_v43, %v1673_v12  ;;  %v2902_v30 = vsub.f32 %v5972_v41, %v7598_v58  ;;  %v2606_v60 = vld [vmem:[#allocation2 + $0x62] sm:$0xff]  ;;  %v2377_v38 = vadd.f32 %v2345_v2, %v2279_v36  ;;  %v6007_v7 = vld [vmem:[#allocation2 + $0x6a] sm:$0xff] }
 0x1fd   : > { %7858 = vst [vmem:[#allocation3_spill] sm:$0xff] %v5982_v54  ;;  %v5997_v28 = vsub.f32 %v2802_v39, %v5982_v54  ;;  %v5999_v37 = vld [vmem:[#allocation2 + $0x68] sm:$0xff]  ;;  %v2639_v48 = vmul.f32 %v5810_v63, %v2606_v60  ;;  %v2542_v45 = vmul.f32 %v5774_v22, %v5954_v61  ;;  %v2053_v34 = vmul.f32 %v5665_v55, %v5920_v59  ;;  %v1385_v44 = vpop.f32.mrf.mxu0  ;;  %v1542_v1 = vpop.f32.mrf.mxu1 }
 0x1fe   : > { %1792 = vst [vmem:[#allocation2 + $0x79] sm:$0xff] %v5991_v57  ;;  %v2444_v47 = vmul.f32 %v5784_v27, %v5999_v37  ;;  %v1382_v51 = vadd.f32 %v1381_v49, %v5476_v18  ;;  %v2903_v36 = vand.u32 4294901760, %v2902_v30  ;;  %v2249_v5 = vmul.f32 %v5740_v19, %v5954_v61  ;;  %v7859_v30 = vld [vmem:[#allocation21_spill] sm:$0xff] }
 0x1ff   : > { %v7597_v23 = vand.u32 4294901760, %v5997_v28  ;;  %v2671_v9 = vadd.f32 %v2639_v48, %v2573_v26  ;;  %v2085_v2 = vadd.f32 %v2053_v34, %v1987_v6  ;;  %v2151_v53 = vmul.f32 %v5696_v20, %v5999_v37 }
 0x200   : > { %v2476_v43 = vadd.f32 %v2444_v47, %v2377_v38  ;;  %v1543_v39 = vadd.f32 %v1542_v1, %v1382_v51  ;;  %v2640_v59 = vmul.f32 %v5810_v63, %v6007_v7  ;;  %v2346_v18 = vmul.f32 %v5769_v14, %v2606_v60 }
 0x201   : > { %v1858_v49 = vmul.f32 %v5615_v31, %v5956_v21  ;;  %2904 = vmatmul.f32.gmra.mxu2 %v2903_v36  ;;  %3249 = vmatmul.f32.gmra.mxu3 %v5982_v54  ;;  %v2707_v8 = vadd.f32 %v5837_v24, %v2671_v9  ;;  %v2183_v12 = vadd.f32 %v2151_v53, %v2085_v2 }
 0x202   : > { %v2574_v26 = vadd.f32 %v2542_v45, %v2476_v43  ;;  %vm1642_vm13 = vcmp.gt.f32.partialorder %v1543_v39, 0.0  ;;  %v1674_v6 = vmul.f32 0.01, %v1543_v39  ;;  %1448 = vmatmul.f32.gmra.mxu0 %v7859_v30  ;;  %1605 = vmatmul.f32.gmra.mxu1 %v7857_v40  ;;  %v2910_v38 = vsub.f32 %v5997_v28, %v7597_v23 }
 0x203   : > { %v1956_v21 = vmul.f32 %v5641_v32, %v5906_v0  ;;  %vm2739_vm14 = vcmp.gt.f32.partialorder %v2707_v8, 0.0  ;;  %v2771_v48 = vmul.f32 0.01, %v2707_v8  ;;  %v2281_v34 = vadd.f32 %v2249_v5, %v2183_v12 }
 0x204   : > { %v2672_v47 = vadd.f32 %v2640_v59, %v2574_v26  ;;  %v6031_v51 = vsel %vm1642_vm13, %v1543_v39, %v1674_v6  ;;  %v2378_v45 = vadd.f32 %v2346_v18, %v2280_v33  ;;  %v2543_v1 = vmul.f32 %v5774_v22, %v5991_v57 }
 0x205   : > { %v2412_v36 = vld [vmem:[#allocation2 + $0x78] sm:$0xff]  ;;  %v2054_v40 = vmul.f32 %v5665_v55, %v2606_v60  ;;  %1793 = vst [vmem:[#allocation2 + $0x81] sm:$0xff] %v6031_v51  ;;  %v2803_v9 = vsel %vm2739_vm14, %v2707_v8, %v2771_v48  ;;  %v1988_v2 = vadd.f32 %v1956_v21, %v1858_v49  ;;  %v1386_v53 = vadd.f32 %v1385_v44, %v5479_v25  ;;  %v1389_v59 = vpop.f32.mrf.mxu0  ;;  %v1546_v18 = vpop.f32.mrf.mxu1 }
 0x206   : > { %v2708_v43 = vadd.f32 %v5837_v24, %v2672_v47  ;;  %v2445_v0 = vmul.f32 %v5784_v27, %v2412_v36  ;;  %v6040_v5 = vand.u32 4294901760, %v2803_v9  ;;  %v2347_v33 = vmul.f32 %v5769_v14, %v6007_v7  ;;  %v7861_v47 = vld [vmem:[#allocation25_spill] sm:$0xff] }
 0x207   : > { %v2152_v39 = vmul.f32 %v5696_v20, %v2412_v36  ;;  %v2911_v60 = vand.u32 4294901760, %v2910_v38  ;;  %v2086_v8 = vadd.f32 %v2054_v40, %v1988_v2  ;;  %v1547_v12 = vadd.f32 %v1546_v18, %v1386_v53 }
 0x208   : > { %7860 = vst [vmem:[#allocation47_spill] sm:$0xff] %v6040_v5  ;;  %vm2740_vm15 = vcmp.gt.f32.partialorder %v2708_v43, 0.0  ;;  %v2772_v26 = vmul.f32 0.01, %v2708_v43  ;;  %v6046_v6 = vsub.f32 %v2803_v9, %v6040_v5  ;;  %v2477_v49 = vadd.f32 %v2445_v0, %v2378_v45 }
 0x209   : > { %v2250_v25 = vmul.f32 %v5740_v19, %v5991_v57  ;;  %2912 = vmatmul.f32.gmra.mxu2 %v2911_v60  ;;  %3253 = vmatmul.f32.gmra.mxu3 %v6040_v5  ;;  %v2184_v21 = vadd.f32 %v2152_v39, %v2086_v8  ;;  %v1859_v48 = vmul.f32 %v5615_v31, %v5999_v37  ;;  %vm1643_vm0 = vcmp.gt.f32.partialorder %v1547_v12, 0.0 }
 0x20a   : > { %v2804_v44 = vsel %vm2740_vm15, %v2708_v43, %v2772_v26  ;;  %v1675_v38 = vmul.f32 0.01, %v1547_v12  ;;  %1452 = vmatmul.f32.gmra.mxu0 %v7861_v47  ;;  %1609 = vmatmul.f32.gmra.mxu1 %v7859_v30  ;;  %v7596_v40 = vand.u32 4294901760, %v6046_v6  ;;  %v1390_v9 = vadd.f32 %v1389_v59, %v5572_v42 }
 0x20b   : > { %v6056_v45 = vand.u32 4294901760, %v2804_v44  ;;  %v2379_v0 = vadd.f32 %v2347_v33, %v2281_v34  ;;  %v2544_v43 = vmul.f32 %v5774_v22, %v6031_v51  ;;  %v1957_v2 = vmul.f32 %v5641_v32, %v5954_v61 }
 0x20c   : > { %v6063_v37 = vsel %vm1643_vm0, %v1547_v12, %v1675_v38  ;;  %v2918_v53 = vsub.f32 %v6046_v6, %v7596_v40  ;;  %v2575_v39 = vadd.f32 %v2543_v1, %v2477_v49  ;;  %v2608_v18 = vld [vmem:[#allocation2 + $0x7a] sm:$0xff]  ;;  %v6077_v34 = vld [vmem:[#allocation2 + $0x82] sm:$0xff]  ;;  %v2282_v33 = vadd.f32 %v2250_v25, %v2184_v21 }
 0x20d   : > { %7862 = vst [vmem:[#allocation51_spill] sm:$0xff] %v6056_v45  ;;  %v6069_v30 = vsub.f32 %v2804_v44, %v6056_v45  ;;  %v6071_v60 = vld [vmem:[#allocation2 + $0x80] sm:$0xff]  ;;  %v2641_v42 = vmul.f32 %v5810_v63, %v2608_v18  ;;  %v1989_v59 = vadd.f32 %v1957_v2, %v1859_v48  ;;  %v2055_v1 = vmul.f32 %v5665_v55, %v6007_v7  ;;  %v1393_v49 = vpop.f32.mrf.mxu0  ;;  %v1550_v44 = vpop.f32.mrf.mxu1 }
 0x20e   : > { %1794 = vst [vmem:[#allocation2 + $0x91] sm:$0xff] %v6063_v37  ;;  %v2446_v61 = vmul.f32 %v5784_v27, %v6071_v60  ;;  %v2919_v26 = vand.u32 4294901760, %v2918_v53  ;;  %v2251_v12 = vmul.f32 %v5740_v19, %v6031_v51  ;;  %v2153_v23 = vmul.f32 %v5696_v20, %v6071_v60 }
 0x20f   : > { %v7599_v8 = vand.u32 4294901760, %v6069_v30  ;;  %v2673_v38 = vadd.f32 %v2641_v42, %v2575_v39  ;;  %v1860_v58 = vmul.f32 %v5615_v31, %v2412_v36  ;;  %v1551_v25 = vadd.f32 %v1550_v44, %v1390_v9  ;;  %v7863_v42 = vld [vmem:[#allocation26_spill] sm:$0xff] }
 0x210   : > { %v2478_v40 = vadd.f32 %v2446_v61, %v2379_v0  ;;  %v2642_v21 = vmul.f32 %v5810_v63, %v6077_v34  ;;  %v2348_v48 = vmul.f32 %v5769_v14, %v2608_v18  ;;  %v1958_v7 = vmul.f32 %v5641_v32, %v5991_v57 }
 0x211   : > { %2920 = vmatmul.f32.gmra.mxu2 %v2919_v26  ;;  %3257 = vmatmul.f32.gmra.mxu3 %v6056_v45  ;;  %v2709_v2 = vadd.f32 %v5837_v24, %v2673_v38  ;;  %v2087_v53 = vadd.f32 %v2055_v1, %v1989_v59  ;;  %vm1644_vm1 = vcmp.gt.f32.partialorder %v1551_v25, 0.0  ;;  %v1676_v39 = vmul.f32 0.01, %v1551_v25 }
 0x212   : > { %v2576_v0 = vadd.f32 %v2544_v43, %v2478_v40  ;;  %1456 = vmatmul.f32.gmra.mxu0 %v7863_v42  ;;  %1613 = vmatmul.f32.gmra.mxu1 %v7861_v47  ;;  %v2926_v36 = vsub.f32 %v6069_v30, %v7599_v8  ;;  %v2545_v57 = vmul.f32 %v5774_v22, %v6063_v37 }
 0x213   : > { %vm2741_vm2 = vcmp.gt.f32.partialorder %v2709_v2, 0.0  ;;  %v2773_v9 = vmul.f32 0.01, %v2709_v2  ;;  %v2185_v26 = vadd.f32 %v2153_v23, %v2087_v53  ;;  %v1394_v40 = vadd.f32 %v1393_v49, %v5583_v15 }
 0x214   : > { %v2674_v61 = vadd.f32 %v2642_v21, %v2576_v0  ;;  %v6102_v43 = vsel %vm1644_vm1, %v1551_v25, %v1676_v39  ;;  %v2380_v59 = vadd.f32 %v2348_v48, %v2282_v33  ;;  %v2056_v44 = vmul.f32 %v5665_v55, %v2608_v18 }
 0x215   : > { %v2414_v1 = vld [vmem:[#allocation2 + $0x90] sm:$0xff]  ;;  %1795 = vst [vmem:[#allocation2 + $0x99] sm:$0xff] %v6102_v43  ;;  %v2805_v47 = vsel %vm2741_vm2, %v2709_v2, %v2773_v9  ;;  %v1990_v17 = vadd.f32 %v1958_v7, %v1860_v58  ;;  %v2927_v45 = vand.u32 4294901760, %v2926_v36  ;;  %v2349_v15 = vmul.f32 %v5769_v14, %v6077_v34  ;;  %v1397_v33 = vpop.f32.mrf.mxu0  ;;  %v1554_v49 = vpop.f32.mrf.mxu1 }
 0x216   : > { %v2710_v38 = vadd.f32 %v5837_v24, %v2674_v61  ;;  %v2447_v8 = vmul.f32 %v5784_v27, %v2414_v1  ;;  %v6108_v5 = vand.u32 4294901760, %v2805_v47  ;;  %v2154_v23 = vmul.f32 %v5696_v20, %v2414_v1 }
 0x217   : > { %v2283_v25 = vadd.f32 %v2251_v12, %v2185_v26  ;;  %v2088_v21 = vadd.f32 %v2056_v44, %v1990_v17  ;;  %v1555_v48 = vadd.f32 %v1554_v49, %v1394_v40  ;;  %v2252_v58 = vmul.f32 %v5740_v19, %v6063_v37  ;;  %v7865_v12 = vld [vmem:[#allocation29_spill] sm:$0xff] }
 0x218   : > { %7864 = vst [vmem:[#allocation63_spill] sm:$0xff] %v6108_v5  ;;  %vm2742_vm3 = vcmp.gt.f32.partialorder %v2710_v38, 0.0  ;;  %v2774_v18 = vmul.f32 0.01, %v2710_v38  ;;  %v6114_v2 = vsub.f32 %v2805_v47, %v6108_v5  ;;  %v2479_v0 = vadd.f32 %v2447_v8, %v2380_v59 }
 0x219   : > { %2928 = vmatmul.f32.gmra.mxu2 %v2927_v45  ;;  %3261 = vmatmul.f32.gmra.mxu3 %v6108_v5  ;;  %v2186_v53 = vadd.f32 %v2154_v23, %v2088_v21  ;;  %v1861_v39 = vmul.f32 %v5615_v31, %v6071_v60  ;;  %vm1645_vm4 = vcmp.gt.f32.partialorder %v1555_v48, 0.0  ;;  %v1677_v36 = vmul.f32 0.01, %v1555_v48 }
 0x21a   : > { %v2806_v7 = vsel %vm2742_vm3, %v2710_v38, %v2774_v18  ;;  %1460 = vmatmul.f32.gmra.mxu0 %v7865_v12  ;;  %1617 = vmatmul.f32.gmra.mxu1 %v7863_v42  ;;  %v7609_v17 = vand.u32 4294901760, %v6114_v2  ;;  %v1398_v9 = vadd.f32 %v1397_v33, %v5586_v3  ;;  %v2381_v45 = vadd.f32 %v2349_v15, %v2283_v25 }
 0x21b   : > { %v6124_v8 = vand.u32 4294901760, %v2806_v7  ;;  %v2546_v61 = vmul.f32 %v5774_v22, %v6102_v43  ;;  %v1959_v26 = vmul.f32 %v5641_v32, %v6031_v51  ;;  %v6131_v31 = vsel %vm1645_vm4, %v1555_v48, %v1677_v36 }
 0x21c   : > { %v2934_v60 = vsub.f32 %v6114_v2, %v7609_v17  ;;  %v2577_v40 = vadd.f32 %v2545_v57, %v2479_v0  ;;  %v2610_v59 = vld [vmem:[#allocation2 + $0x92] sm:$0xff]  ;;  %1796 = vst [vmem:[#allocation2 + $0xa9] sm:$0xff] %v6131_v31  ;;  %v6145_v47 = vld [vmem:[#allocation2 + $0x9a] sm:$0xff]  ;;  %v2284_v38 = vadd.f32 %v2252_v58, %v2186_v53  ;;  %v2057_v57 = vmul.f32 %v5665_v55, %v6077_v34 }
 0x21d   : > { %7866 = vst [vmem:[#allocation6_spill] sm:$0xff] %v6124_v8  ;;  %v6137_v42 = vsub.f32 %v2806_v7, %v6124_v8  ;;  %v6139_v44 = vld [vmem:[#allocation2 + $0x98] sm:$0xff]  ;;  %v2643_v3 = vmul.f32 %v5810_v63, %v2610_v59  ;;  %v1991_v15 = vadd.f32 %v1959_v26, %v1861_v39  ;;  %v2253_v49 = vmul.f32 %v5740_v19, %v6102_v43  ;;  %v1401_v18 = vpop.f32.mrf.mxu0  ;;  %v1558_v25 = vpop.f32.mrf.mxu1  ;;  %v6157_v58 = vld [vmem:[%s7515_s3] ss:$0 sm:$0xff] }
 0x21e   : > { %v2448_v51 = vmul.f32 %v5784_v27, %v6139_v44  ;;  %v2935_v23 = vand.u32 4294901760, %v2934_v60  ;;  %v2155_v0 = vmul.f32 %v5696_v20, %v6139_v44  ;;  %v1862_v7 = vmul.f32 %v6157_v58, %v2414_v1 }
 0x21f   : > { %v7606_v33 = vand.u32 4294901760, %v6137_v42  ;;  %v2675_v21 = vadd.f32 %v2643_v3, %v2577_v40  ;;  %v1559_v53 = vadd.f32 %v1558_v25, %v1398_v9  ;;  %v2644_v55 = vmul.f32 %v5810_v63, %v6145_v47  ;;  %v7867_v40 = vld [vmem:[#allocation30_spill] sm:$0xff] }
 0x220   : > { %v2480_v48 = vadd.f32 %v2448_v51, %v2381_v45  ;;  %v2350_v34 = vmul.f32 %v5769_v14, %v2610_v59  ;;  %v1960_v39 = vmul.f32 %v5641_v32, %v6063_v37  ;;  %v2089_v26 = vadd.f32 %v2057_v57, %v1991_v15 }
 0x221   : > { %2936 = vmatmul.f32.gmra.mxu2 %v2935_v23  ;;  %3265 = vmatmul.f32.gmra.mxu3 %v6124_v8  ;;  %v2711_v36 = vadd.f32 %v5837_v24, %v2675_v21  ;;  %vm1646_vm5 = vcmp.gt.f32.partialorder %v1559_v53, 0.0  ;;  %v1678_v60 = vmul.f32 0.01, %v1559_v53  ;;  %v2942_v1 = vsub.f32 %v6137_v42, %v7606_v33  ;;  %v6238_v33 = vld [vmem:[%s7515_s3 + $0x3] ss:$0 sm:$0xff] }
 0x222   : > { %v2578_v45 = vadd.f32 %v2546_v61, %v2480_v48  ;;  %1464 = vmatmul.f32.gmra.mxu0 %v7867_v40  ;;  %1621 = vmatmul.f32.gmra.mxu1 %v7865_v12  ;;  %v2547_v32 = vmul.f32 %v5774_v22, %v6131_v31  ;;  %v2187_v3 = vadd.f32 %v2155_v0, %v2089_v26  ;;  %v6180_v12 = vld [vmem:[%s7515_s3 + $0x2] ss:$0 sm:$0xff] }
 0x223   : > { %vm2743_vm6 = vcmp.gt.f32.partialorder %v2711_v36, 0.0  ;;  %v2775_v37 = vmul.f32 0.01, %v2711_v36  ;;  %v1402_v61 = vadd.f32 %v1401_v18, %v5592_v16  ;;  %v6175_v51 = vsel %vm1646_vm5, %v1559_v53, %v1678_v60  ;;  %v2416_v23 = vld [vmem:[#allocation2 + $0xa8] sm:$0xff] }
 0x224   : > { %v2676_v9 = vadd.f32 %v2644_v55, %v2578_v45  ;;  %v2382_v15 = vadd.f32 %v2350_v34, %v2284_v38  ;;  %v2058_v57 = vmul.f32 %v6180_v12, %v2610_v59  ;;  %1797 = vst [vmem:[#allocation2 + $0xb1] sm:$0xff] %v6175_v51  ;;  %v2449_v48 = vmul.f32 %v5784_v27, %v2416_v23 }
 0x225   : > { %v2807_v25 = vsel %vm2743_vm6, %v2711_v36, %v2775_v37  ;;  %v1992_v0 = vadd.f32 %v1960_v39, %v1862_v7  ;;  %v2943_v16 = vand.u32 4294901760, %v2942_v1  ;;  %v2351_v38 = vmul.f32 %v5769_v14, %v6145_v47  ;;  %v1405_v55 = vpop.f32.mrf.mxu0  ;;  %v1562_v34 = vpop.f32.mrf.mxu1 }
 0x226   : > { %v2712_v21 = vadd.f32 %v5837_v24, %v2676_v9  ;;  %v6186_v18 = vand.u32 4294901760, %v2807_v25  ;;  %v2156_v53 = vmul.f32 %v5696_v20, %v2416_v23  ;;  %v2285_v45 = vadd.f32 %v2253_v49, %v2187_v3  ;;  %v7869_v49 = vld [vmem:[#allocation33_spill] sm:$0xff] }
 0x227   : > { %v2090_v26 = vadd.f32 %v2058_v57, %v1992_v0  ;;  %v1563_v36 = vadd.f32 %v1562_v34, %v1402_v61  ;;  %v2481_v37 = vadd.f32 %v2449_v48, %v2382_v15  ;;  %v2254_v7 = vmul.f32 %v5740_v19, %v6131_v31 }
 0x228   : > { %7868 = vst [vmem:[#allocation54_spill] sm:$0xff] %v6186_v18  ;;  %vm2744_vm7 = vcmp.gt.f32.partialorder %v2712_v21, 0.0  ;;  %v2776_v59 = vmul.f32 0.01, %v2712_v21  ;;  %v6192_v60 = vsub.f32 %v2807_v25, %v6186_v18  ;;  %v1863_v20 = vmul.f32 %v6157_v58, %v6139_v44  ;;  %v6210_v44 = vld [vmem:[%s7515_s3 + $0x1] ss:$0 sm:$0xff] }
 0x229   : > { %2944 = vmatmul.f32.gmra.mxu2 %v2943_v16  ;;  %3269 = vmatmul.f32.gmra.mxu3 %v6186_v18  ;;  %v2188_v1 = vadd.f32 %v2156_v53, %v2090_v26  ;;  %vm1647_vm8 = vcmp.gt.f32.partialorder %v1563_v36, 0.0  ;;  %v1679_v9 = vmul.f32 0.01, %v1563_v36  ;;  %v1406_v15 = vadd.f32 %v1405_v55, %v5595_v46 }
 0x22a   : > { %v2808_v39 = vsel %vm2744_vm7, %v2712_v21, %v2776_v59  ;;  %1468 = vmatmul.f32.gmra.mxu0 %v7869_v49  ;;  %1625 = vmatmul.f32.gmra.mxu1 %v7867_v40  ;;  %v7605_v3 = vand.u32 4294901760, %v6192_v60  ;;  %v2383_v57 = vadd.f32 %v2351_v38, %v2285_v45  ;;  %v2548_v25 = vmul.f32 %v5774_v22, %v6175_v51 }
 0x22b   : > { %v6202_v61 = vand.u32 4294901760, %v2808_v39  ;;  %v1961_v21 = vmul.f32 %v6210_v44, %v6102_v43  ;;  %v6214_v48 = vsel %vm1647_vm8, %v1563_v36, %v1679_v9  ;;  %v2579_v0 = vadd.f32 %v2547_v32, %v2481_v37  ;;  %v2612_v16 = vld [vmem:[#allocation2 + $0xaa] sm:$0xff]  ;;  %v6228_v55 = vld [vmem:[#allocation2 + $0xb2] sm:$0xff] }
 0x22c   : > { %v2950_v40 = vsub.f32 %v6192_v60, %v7605_v3  ;;  %v6222_v38 = vld [vmem:[#allocation2 + $0xb0] sm:$0xff]  ;;  %1798 = vst [vmem:[#allocation2 + $0xc1] sm:$0xff] %v6214_v48  ;;  %v2645_v53 = vmul.f32 %v5810_v63, %v2612_v16  ;;  %v2286_v34 = vadd.f32 %v2254_v7, %v2188_v1  ;;  %v2059_v32 = vmul.f32 %v6180_v12, %v6145_v47 }
 0x22d   : > { %7870 = vst [vmem:[#allocation58_spill] sm:$0xff] %v6202_v61  ;;  %v6220_v46 = vsub.f32 %v2808_v39, %v6202_v61  ;;  %v2450_v43 = vmul.f32 %v5784_v27, %v6222_v38  ;;  %v1993_v59 = vadd.f32 %v1961_v21, %v1863_v20  ;;  %v2255_v36 = vmul.f32 %v5740_v19, %v6175_v51  ;;  %v1409_v37 = vpop.f32.mrf.mxu0  ;;  %v1566_v39 = vpop.f32.mrf.mxu1 }
 0x22e   : > { %v2951_v45 = vand.u32 4294901760, %v2950_v40  ;;  %v2677_v9 = vadd.f32 %v2645_v53, %v2579_v0  ;;  %v2157_v7 = vmul.f32 %v6238_v33, %v6222_v38  ;;  %v1864_v1 = vmul.f32 %v6157_v58, %v2416_v23 }
 0x22f   : > { %v7607_v26 = vand.u32 4294901760, %v6220_v46  ;;  %v2482_v3 = vadd.f32 %v2450_v43, %v2383_v57  ;;  %v1567_v20 = vadd.f32 %v1566_v39, %v1406_v15  ;;  %v2646_v47 = vmul.f32 %v5810_v63, %v6228_v55 }
 0x230   : > { %v2352_v19 = vmul.f32 %v5769_v14, %v2612_v16  ;;  %v1962_v21 = vmul.f32 %v6210_v44, %v6131_v31  ;;  %v2713_v57 = vadd.f32 %v5837_v24, %v2677_v9  ;;  %v2091_v0 = vadd.f32 %v2059_v32, %v1993_v59 }
 0x231   : > { %2952 = vmatmul.f32.gmra.mxu2 %v2951_v45  ;;  %3273 = vmatmul.f32.gmra.mxu3 %v6202_v61  ;;  %v2580_v40 = vadd.f32 %v2548_v25, %v2482_v3  ;;  %vm1648_vm9 = vcmp.gt.f32.partialorder %v1567_v20, 0.0  ;;  %v1680_v53 = vmul.f32 0.01, %v1567_v20  ;;  %v2958_v14 = vsub.f32 %v6220_v46, %v7607_v26 }
 0x232   : > { %1629 = vmatmul.f32.gmra.mxu1 %v7869_v49  ;;  %3415 = vmatmul.f32.vlgmr.msra.gmra.mxu0 %v5883_v62  ;;  %v2549_v63 = vmul.f32 %v5774_v22, %v6214_v48  ;;  %vm2745_vm10 = vcmp.gt.f32.partialorder %v2713_v57, 0.0  ;;  %v2777_v31 = vmul.f32 0.01, %v2713_v57  ;;  %v2189_v15 = vadd.f32 %v2157_v7, %v2091_v0 }
 0x233   : > { %v2678_v23 = vadd.f32 %v2646_v47, %v2580_v40  ;;  %v1410_v3 = vadd.f32 %v1409_v37, %v5602_v4  ;;  %v6258_v25 = vsel %vm1648_vm9, %v1567_v20, %v1680_v53  ;;  %v2384_v43 = vadd.f32 %v2352_v19, %v2286_v34  ;;  %v2418_v59 = vld [vmem:[#allocation2 + $0xc0] sm:$0xff] }
 0x234   : > { %v2060_v49 = vmul.f32 %v6180_v12, %v2612_v16  ;;  %1799 = vst [vmem:[#allocation2 + $0xc9] sm:$0xff] %v6258_v25  ;;  %v2809_v45 = vsel %vm2745_vm10, %v2713_v57, %v2777_v31  ;;  %v2451_v39 = vmul.f32 %v5784_v27, %v2418_v59  ;;  %v1994_v22 = vadd.f32 %v1962_v21, %v1864_v1  ;;  %v6269_v4 = vld [vmem:[%s7515_s3 + $0x5] ss:$0 sm:$0xff]  ;;  %v6280_v21 = vld [vmem:[%s7515_s3 + $0x4] ss:$0 sm:$0xff] }
 0x235   : > { %v2714_v32 = vadd.f32 %v5837_v24, %v2678_v23  ;;  %v2959_v9 = vand.u32 4294901760, %v2958_v14  ;;  %v6264_v26 = vand.u32 4294901760, %v2809_v45  ;;  %v2353_v34 = vmul.f32 %v6269_v4, %v6228_v55  ;;  %v1413_v37 = vpop.f32.mrf.mxu0  ;;  %v1570_v7 = vpop.f32.mrf.mxu1 }
 0x236   : > { %v2158_v16 = vmul.f32 %v6238_v33, %v2418_v59  ;;  %v2287_v20 = vadd.f32 %v2255_v36, %v2189_v15  ;;  %v2092_v27 = vadd.f32 %v2060_v49, %v1994_v22  ;;  %v1571_v1 = vadd.f32 %v1570_v7, %v1410_v3 }
 0x237   : > { %7871 = vst [vmem:[#allocation62_spill] sm:$0xff] %v6264_v26  ;;  %vm2746_vm11 = vcmp.gt.f32.partialorder %v2714_v32, 0.0  ;;  %v2778_v24 = vmul.f32 0.01, %v2714_v32  ;;  %v6275_v47 = vsub.f32 %v2809_v45, %v6264_v26  ;;  %v2483_v19 = vadd.f32 %v2451_v39, %v2384_v43  ;;  %v6297_v43 = vld [vmem:[%s7515_s3 + $0x7] ss:$0 sm:$0xff] }
 0x238   : > { %v2256_v57 = vmul.f32 %v6280_v21, %v6214_v48  ;;  %v2190_v0 = vadd.f32 %v2158_v16, %v2092_v27  ;;  %v1865_v36 = vmul.f32 %v6157_v58, %v6222_v38  ;;  %vm1649_vm12 = vcmp.gt.f32.partialorder %v1571_v1, 0.0 }
 0x239   : > { %2960 = vmatmul.f32.gmra.mxu2 %v2959_v9  ;;  %3277 = vmatmul.f32.gmra.mxu3 %v6264_v26  ;;  %v2810_v40 = vsel %vm2746_vm11, %v2714_v32, %v2778_v24  ;;  %v1681_v53 = vmul.f32 0.01, %v1571_v1  ;;  %v7872_v14 = vand.u32 4294901760, %v5883_v62  ;;  %v7608_v31 = vand.u32 4294901760, %v6275_v47  ;;  %v6317_v9 = vld [vmem:[%s7515_s3 + $0x8] ss:$0 sm:$0xff] }
 0x23a   : > { %3420 = vmatmul.f32.gmra.mxu0 %v5915_v52  ;;  %v6291_v23 = vand.u32 4294901760, %v2810_v40  ;;  %v1414_v15 = vadd.f32 %v1413_v37, %v5605_v13  ;;  %v2385_v3 = vadd.f32 %v2353_v34, %v2287_v20  ;;  %v2550_v38 = vmul.f32 %v6297_v43, %v6258_v25  ;;  %v6323_v34 = vld [vmem:[%s7515_s3 + $0x6] ss:$0 sm:$0xff] }
 0x23b   : > { %3609 = vmatmul.f32.vlgmr.msra.gmra.mxu1 %v7872_v14  ;;  %v1963_v49 = vmul.f32 %v6210_v44, %v6175_v51  ;;  %v6303_v62 = vsel %vm1649_vm12, %v1571_v1, %v1681_v53  ;;  %v2966_v45 = vsub.f32 %v6275_v47, %v7608_v31  ;;  %v2581_v32 = vadd.f32 %v2549_v63, %v2483_v19  ;;  %v2614_v39 = vld [vmem:[#allocation2 + $0xc2] sm:$0xff]  ;;  %v6327_v16 = vld [vmem:[#allocation2 + $0xca] sm:$0xff] }
 0x23c   : > { %7873 = vst [vmem:[#allocation67_spill] sm:$0xff] %v6291_v23  ;;  %v6309_v13 = vsub.f32 %v2810_v40, %v6291_v23  ;;  %v6311_v22 = vld [vmem:[#allocation2 + $0xc8] sm:$0xff]  ;;  %v2647_v51 = vmul.f32 %v6317_v9, %v2614_v39  ;;  %v2288_v37 = vadd.f32 %v2256_v57, %v2190_v0  ;;  %v2061_v27 = vmul.f32 %v6180_v12, %v6228_v55 }
 0x23d   : > { %1800 = vst [vmem:[#allocation2 + $0xd9] sm:$0xff] %v6303_v62  ;;  %v2452_v63 = vmul.f32 %v6323_v34, %v6311_v22  ;;  %v1995_v7 = vadd.f32 %v1963_v49, %v1865_v36  ;;  %v2967_v24 = vand.u32 4294901760, %v2966_v45  ;;  %v2257_v1 = vmul.f32 %v6280_v21, %v6258_v25  ;;  %v1417_v19 = vpop.f32.mrf.mxu0  ;;  %v1574_v40 = vpop.f32.mrf.mxu1 }
 0x23e   : > { %v7610_v20 = vand.u32 4294901760, %v6309_v13  ;;  %v2679_v53 = vadd.f32 %v2647_v51, %v2581_v32  ;;  %v2159_v31 = vmul.f32 %v6238_v33, %v6311_v22  ;;  %v1866_v17 = vmul.f32 %v6157_v58, %v2418_v59 }
 0x23f   : > { %v2484_v14 = vadd.f32 %v2452_v63, %v2385_v3  ;;  %v1575_v57 = vadd.f32 %v1574_v40, %v1414_v15  ;;  %v2648_v0 = vmul.f32 %v6317_v9, %v6327_v16  ;;  %v2354_v36 = vmul.f32 %v6269_v4, %v2614_v39  ;;  %v6346_v3 = vld [vmem:[%s7516_s4] ss:$0 sm:$0xff] }
 0x240   : > { %v1964_v55 = vmul.f32 %v6210_v44, %v6214_v48  ;;  %v2715_v49 = vadd.f32 %v6346_v3, %v2679_v53  ;;  %v2093_v15 = vadd.f32 %v2061_v27, %v1995_v7  ;;  %v7874_v32 = vand.u32 4294901760, %v5915_v52 }
 0x241   : > { %2968 = vmatmul.f32.gmra.mxu2 %v2967_v24  ;;  %3281 = vmatmul.f32.gmra.mxu3 %v6291_v23  ;;  %v2582_v59 = vadd.f32 %v2550_v38, %v2484_v14  ;;  %vm1650_vm13 = vcmp.gt.f32.partialorder %v1575_v57, 0.0  ;;  %v1682_v45 = vmul.f32 0.01, %v1575_v57  ;;  %v2974_v48 = vsub.f32 %v6309_v13, %v7610_v20 }
 0x242   : > { %3425 = vmatmul.f32.gmra.mxu0 %v5972_v41  ;;  %v2551_v51 = vmul.f32 %v6297_v43, %v6303_v62  ;;  %vm2747_vm14 = vcmp.gt.f32.partialorder %v2715_v49, 0.0  ;;  %v2779_v63 = vmul.f32 0.01, %v2715_v49  ;;  %v2191_v40 = vadd.f32 %v2159_v31, %v2093_v15 }
 0x243   : > { %3615 = vmatmul.f32.gmra.mxu1 %v7874_v32  ;;  %v2680_v24 = vadd.f32 %v2648_v0, %v2582_v59  ;;  %v1418_v38 = vadd.f32 %v1417_v19, %v5618_v56  ;;  %v6358_v7 = vsel %vm1650_vm13, %v1575_v57, %v1682_v45  ;;  %v2386_v27 = vadd.f32 %v2354_v36, %v2288_v37 }
 0x244   : > { %v2420_v53 = vld [vmem:[#allocation2 + $0xd8] sm:$0xff]  ;;  %v2062_v52 = vmul.f32 %v6180_v12, %v2614_v39  ;;  %1801 = vst [vmem:[#allocation2 + $0xe1] sm:$0xff] %v6358_v7  ;;  %v2811_v14 = vsel %vm2747_vm14, %v2715_v49, %v2779_v63  ;;  %v1996_v23 = vadd.f32 %v1964_v55, %v1866_v17  ;;  %v2975_v26 = vand.u32 4294901760, %v2974_v48 }
 0x245   : > { %v2716_v32 = vadd.f32 %v6346_v3, %v2680_v24  ;;  %v2453_v20 = vmul.f32 %v6323_v34, %v2420_v53  ;;  %v6364_v61 = vand.u32 4294901760, %v2811_v14  ;;  %v2355_v56 = vmul.f32 %v6269_v4, %v6327_v16  ;;  %v1421_v37 = vpop.f32.mrf.mxu0  ;;  %v1578_v19 = vpop.f32.mrf.mxu1 }
 0x246   : > { %v2160_v31 = vmul.f32 %v6238_v33, %v2420_v53  ;;  %v2289_v57 = vadd.f32 %v2257_v1, %v2191_v40  ;;  %v2094_v0 = vadd.f32 %v2062_v52, %v1996_v23  ;;  %v1579_v36 = vadd.f32 %v1578_v19, %v1418_v38 }
 0x247   : > { %7875 = vst [vmem:[#allocation65_spill] sm:$0xff] %v6364_v61  ;;  %vm2748_vm15 = vcmp.gt.f32.partialorder %v2716_v32, 0.0  ;;  %v2780_v39 = vmul.f32 0.01, %v2716_v32  ;;  %v6370_v49 = vsub.f32 %v2811_v14, %v6364_v61  ;;  %v2485_v59 = vadd.f32 %v2453_v20, %v2386_v27 }
 0x248   : > { %v2258_v17 = vmul.f32 %v6280_v21, %v6303_v62  ;;  %v2192_v15 = vadd.f32 %v2160_v31, %v2094_v0  ;;  %v1867_v45 = vmul.f32 %v6157_v58, %v6311_v22  ;;  %vm1651_vm0 = vcmp.gt.f32.partialorder %v1579_v36, 0.0 }
 0x249   : > { %2976 = vmatmul.f32.gmra.mxu2 %v2975_v26  ;;  %3285 = vmatmul.f32.gmra.mxu3 %v6364_v61  ;;  %v2812_v55 = vsel %vm2748_vm15, %v2716_v32, %v2780_v39  ;;  %v1683_v48 = vmul.f32 0.01, %v1579_v36  ;;  %v7876_v23 = vand.u32 4294901760, %v5972_v41  ;;  %v7618_v20 = vand.u32 4294901760, %v6370_v49 }
 0x24a   : > { %3430 = vmatmul.f32.gmra.mxu0 %v5997_v28  ;;  %v6381_v1 = vand.u32 4294901760, %v2812_v55  ;;  %v1422_v26 = vadd.f32 %v1421_v37, %v5621_v11  ;;  %v2387_v63 = vadd.f32 %v2355_v56, %v2289_v57  ;;  %v2552_v24 = vmul.f32 %v6297_v43, %v6358_v7 }
 0x24b   : > { %3621 = vmatmul.f32.gmra.mxu1 %v7876_v23  ;;  %v1965_v22 = vmul.f32 %v6210_v44, %v6258_v25  ;;  %v6388_v40 = vsel %vm1651_vm0, %v1579_v36, %v1683_v48  ;;  %v2982_v41 = vsub.f32 %v6370_v49, %v7618_v20  ;;  %v2583_v27 = vadd.f32 %v2551_v51, %v2485_v59  ;;  %v2616_v52 = vld [vmem:[#allocation2 + $0xda] sm:$0xff]  ;;  %v6402_v32 = vld [vmem:[#allocation2 + $0xe2] sm:$0xff] }
 0x24c   : > { %7877 = vst [vmem:[#allocation70_spill] sm:$0xff] %v6381_v1  ;;  %v6394_v38 = vsub.f32 %v2812_v55, %v6381_v1  ;;  %v6396_v14 = vld [vmem:[#allocation2 + $0xe0] sm:$0xff]  ;;  %v2649_v11 = vmul.f32 %v6317_v9, %v2616_v52  ;;  %v2290_v56 = vadd.f32 %v2258_v17, %v2192_v15  ;;  %v2063_v51 = vmul.f32 %v6180_v12, %v6327_v16 }
 0x24d   : > { %1802 = vst [vmem:[#allocation2 + $0xf1] sm:$0xff] %v6388_v40  ;;  %v2454_v25 = vmul.f32 %v6323_v34, %v6396_v14  ;;  %v1997_v31 = vadd.f32 %v1965_v22, %v1867_v45  ;;  %v2983_v37 = vand.u32 4294901760, %v2982_v41  ;;  %v2259_v39 = vmul.f32 %v6280_v21, %v6358_v7  ;;  %v1425_v57 = vpop.f32.mrf.mxu0  ;;  %v1582_v0 = vpop.f32.mrf.mxu1 }
 0x24e   : > { %v7617_v19 = vand.u32 4294901760, %v6394_v38  ;;  %v2681_v36 = vadd.f32 %v2649_v11, %v2583_v27  ;;  %v2161_v55 = vmul.f32 %v6238_v33, %v6396_v14  ;;  %v1868_v48 = vmul.f32 %v6157_v58, %v2420_v53 }
 0x24f   : > { %v2486_v59 = vadd.f32 %v2454_v25, %v2387_v63  ;;  %v1583_v17 = vadd.f32 %v1582_v0, %v1422_v26  ;;  %v2650_v15 = vmul.f32 %v6317_v9, %v6402_v32  ;;  %v2356_v45 = vmul.f32 %v6269_v4, %v2616_v52 }
 0x250   : > { %v1966_v16 = vmul.f32 %v6210_v44, %v6303_v62  ;;  %v2717_v23 = vadd.f32 %v6346_v3, %v2681_v36  ;;  %v2095_v22 = vadd.f32 %v2063_v51, %v1997_v31  ;;  %v7878_v53 = vand.u32 4294901760, %v5997_v28 }
 0x251   : > { %2984 = vmatmul.f32.gmra.mxu2 %v2983_v37  ;;  %3289 = vmatmul.f32.gmra.mxu3 %v6381_v1  ;;  %v2584_v63 = vadd.f32 %v2552_v24, %v2486_v59  ;;  %vm1652_vm1 = vcmp.gt.f32.partialorder %v1583_v17, 0.0  ;;  %v1684_v41 = vmul.f32 0.01, %v1583_v17  ;;  %v2990_v26 = vsub.f32 %v6394_v38, %v7617_v19  ;;  %v7879_v24 = vld [vmem:[#allocation42_spill] sm:$0xff] }
 0x252   : > { %3435 = vmatmul.f32.gmra.mxu0 %v6046_v6  ;;  %v2553_v62 = vmul.f32 %v6297_v43, %v6388_v40  ;;  %vm2749_vm2 = vcmp.gt.f32.partialorder %v2717_v23, 0.0  ;;  %v2781_v27 = vmul.f32 0.01, %v2717_v23  ;;  %v2193_v25 = vadd.f32 %v2161_v55, %v2095_v22 }
 0x253   : > { %3627 = vmatmul.f32.gmra.mxu1 %v7878_v53  ;;  %v2682_v11 = vadd.f32 %v2650_v15, %v2584_v63  ;;  %v1426_v31 = vadd.f32 %v1425_v57, %v7879_v24  ;;  %v6428_v37 = vsel %vm1652_vm1, %v1583_v17, %v1684_v41  ;;  %v2388_v51 = vadd.f32 %v2356_v45, %v2290_v56 }
 0x254   : > { %v2422_v0 = vld [vmem:[#allocation2 + $0xf0] sm:$0xff]  ;;  %v2064_v28 = vmul.f32 %v6180_v12, %v2616_v52  ;;  %1803 = vst [vmem:[#allocation2 + $0xf9] sm:$0xff] %v6428_v37  ;;  %v2813_v36 = vsel %vm2749_vm2, %v2717_v23, %v2781_v27  ;;  %v1998_v19 = vadd.f32 %v1966_v16, %v1868_v48  ;;  %v2991_v20 = vand.u32 4294901760, %v2990_v26 }
 0x255   : > { %v2718_v59 = vadd.f32 %v6346_v3, %v2682_v11  ;;  %v2455_v53 = vmul.f32 %v6323_v34, %v2422_v0  ;;  %v6434_v1 = vand.u32 4294901760, %v2813_v36  ;;  %v2357_v57 = vmul.f32 %v6269_v4, %v6402_v32  ;;  %v1429_v56 = vpop.f32.mrf.mxu0  ;;  %v1586_v17 = vpop.f32.mrf.mxu1 }
 0x256   : > { %v2162_v55 = vmul.f32 %v6238_v33, %v2422_v0  ;;  %v2291_v15 = vadd.f32 %v2259_v39, %v2193_v25  ;;  %v2096_v45 = vadd.f32 %v2064_v28, %v1998_v19  ;;  %v1587_v23 = vadd.f32 %v1586_v17, %v1426_v31  ;;  %v7883_v25 = vld [vmem:[#allocation57_spill] sm:$0xff] }
 0x257   : > { %7880 = vst [vmem:[#allocation8_spill] sm:$0xff] %v6434_v1  ;;  %vm2750_vm3 = vcmp.gt.f32.partialorder %v2718_v59, 0.0  ;;  %v2782_v52 = vmul.f32 0.01, %v2718_v59  ;;  %v6440_v63 = vsub.f32 %v2813_v36, %v6434_v1  ;;  %v2487_v22 = vadd.f32 %v2455_v53, %v2388_v51 }
 0x258   : > { %v2260_v48 = vmul.f32 %v6280_v21, %v6388_v40  ;;  %v2194_v41 = vadd.f32 %v2162_v55, %v2096_v45  ;;  %v1869_v26 = vmul.f32 %v6157_v58, %v6396_v14  ;;  %vm1653_vm4 = vcmp.gt.f32.partialorder %v1587_v23, 0.0 }
 0x259   : > { %2992 = vmatmul.f32.gmra.mxu2 %v2991_v20  ;;  %3293 = vmatmul.f32.gmra.mxu3 %v6434_v1  ;;  %v2814_v16 = vsel %vm2750_vm3, %v2718_v59, %v2782_v52  ;;  %v1685_v27 = vmul.f32 0.01, %v1587_v23  ;;  %v7881_v19 = vand.u32 4294901760, %v6046_v6  ;;  %v7621_v39 = vand.u32 4294901760, %v6440_v63 }
 0x25a   : > { %3440 = vmatmul.f32.gmra.mxu0 %v6069_v30  ;;  %v6451_v11 = vand.u32 4294901760, %v2814_v16  ;;  %v1430_v20 = vadd.f32 %v1429_v56, %v7883_v25  ;;  %v2389_v24 = vadd.f32 %v2357_v57, %v2291_v15  ;;  %v2554_v31 = vmul.f32 %v6297_v43, %v6428_v37 }
 0x25b   : > { %3633 = vmatmul.f32.gmra.mxu1 %v7881_v19  ;;  %v1967_v14 = vmul.f32 %v6210_v44, %v6358_v7  ;;  %v6458_v51 = vsel %vm1653_vm4, %v1587_v23, %v1685_v27  ;;  %v2998_v6 = vsub.f32 %v6440_v63, %v7621_v39  ;;  %v2585_v36 = vadd.f32 %v2553_v62, %v2487_v22  ;;  %v2618_v59 = vld [vmem:[#allocation2 + $0xf2] sm:$0xff]  ;;  %v6469_v56 = vld [vmem:[#allocation2 + $0xfa] sm:$0xff] }
 0x25c   : > { %7882 = vst [vmem:[#allocation66_spill] sm:$0xff] %v6451_v11  ;;  %v6464_v28 = vsub.f32 %v2814_v16, %v6451_v11  ;;  %v2423_v53 = vld [vmem:[#allocation2 + $0xf8] sm:$0xff]  ;;  %v2651_v57 = vmul.f32 %v6317_v9, %v2618_v59  ;;  %v2292_v7 = vadd.f32 %v2260_v48, %v2194_v41  ;;  %v2065_v45 = vmul.f32 %v6180_v12, %v6402_v32 }
 0x25d   : > { %1804 = vst [vmem:[#allocation2 + $0x109] sm:$0xff] %v6458_v51  ;;  %v2456_v55 = vmul.f32 %v6323_v34, %v2423_v53  ;;  %v1999_v17 = vadd.f32 %v1967_v14, %v1869_v26  ;;  %v2999_v52 = vand.u32 4294901760, %v2998_v6  ;;  %v2261_v62 = vmul.f32 %v6280_v21, %v6428_v37  ;;  %v1590_v22 = vpop.f32.mrf.mxu1 }
 0x25e   : > { %v7622_v15 = vand.u32 4294901760, %v6464_v28  ;;  %v1433_v23 = vpop.f32.mrf.mxu0  ;;  %v2683_v16 = vadd.f32 %v2651_v57, %v2585_v36  ;;  %v2163_v19 = vmul.f32 %v6238_v33, %v2423_v53  ;;  %v1870_v25 = vmul.f32 %v6157_v58, %v2422_v0 }
 0x25f   : > { %v2488_v27 = vadd.f32 %v2456_v55, %v2389_v24  ;;  %v1591_v39 = vadd.f32 %v1590_v22, %v1430_v20  ;;  %v2652_v48 = vmul.f32 %v6317_v9, %v6469_v56  ;;  %v2358_v41 = vmul.f32 %v6269_v4, %v2618_v59 }
 0x260   : > { %v1968_v32 = vmul.f32 %v6210_v44, %v6388_v40  ;;  %v2719_v26 = vadd.f32 %v6346_v3, %v2683_v16  ;;  %v2097_v24 = vadd.f32 %v2065_v45, %v1999_v17  ;;  %v7884_v0 = vand.u32 4294901760, %v6069_v30 }
 0x261   : > { %3000 = vmatmul.f32.gmra.mxu2 %v2999_v52  ;;  %3297 = vmatmul.f32.gmra.mxu3 %v6451_v11  ;;  %v2586_v14 = vadd.f32 %v2554_v31, %v2488_v27  ;;  %vm1654_vm5 = vcmp.gt.f32.partialorder %v1591_v39, 0.0  ;;  %v1686_v6 = vmul.f32 0.01, %v1591_v39  ;;  %v3006_v20 = vsub.f32 %v6464_v28, %v7622_v15  ;;  %v7885_v31 = vld [vmem:[#allocation34_spill] sm:$0xff] }
 0x262   : > { %3445 = vmatmul.f32.gmra.mxu0 %v6114_v2  ;;  %v2555_v40 = vmul.f32 %v6297_v43, %v6458_v51  ;;  %vm2751_vm6 = vcmp.gt.f32.partialorder %v2719_v26, 0.0  ;;  %v2783_v36 = vmul.f32 0.01, %v2719_v26  ;;  %v2195_v55 = vadd.f32 %v2163_v19, %v2097_v24 }
 0x263   : > { %3639 = vmatmul.f32.gmra.mxu1 %v7884_v0  ;;  %v2684_v57 = vadd.f32 %v2652_v48, %v2586_v14  ;;  %v1434_v17 = vadd.f32 %v1433_v23, %v7885_v31  ;;  %v6494_v52 = vsel %vm1654_vm5, %v1591_v39, %v1686_v6  ;;  %v2390_v45 = vadd.f32 %v2358_v41, %v2292_v7 }
 0x264   : > { %v2424_v22 = vld [vmem:[#allocation2 + $0x108] sm:$0xff]  ;;  %v2066_v30 = vmul.f32 %v6180_v12, %v2618_v59  ;;  %1805 = vst [vmem:[#allocation2 + $0x111] sm:$0xff] %v6494_v52  ;;  %v2815_v16 = vsel %vm2751_vm6, %v2719_v26, %v2783_v36  ;;  %v2000_v15 = vadd.f32 %v1968_v32, %v1870_v25  ;;  %v3007_v11 = vand.u32 4294901760, %v3006_v20 }
 0x265   : > { %v2720_v27 = vadd.f32 %v6346_v3, %v2684_v57  ;;  %v2457_v0 = vmul.f32 %v6323_v34, %v2424_v22  ;;  %v6500_v1 = vand.u32 4294901760, %v2815_v16  ;;  %v2359_v23 = vmul.f32 %v6269_v4, %v6469_v56  ;;  %v1594_v19 = vpop.f32.mrf.mxu1 }
 0x266   : > { %v2164_v39 = vmul.f32 %v6238_v33, %v2424_v22  ;;  %v1437_v7 = vpop.f32.mrf.mxu0  ;;  %v2293_v48 = vadd.f32 %v2261_v62, %v2195_v55  ;;  %v2098_v41 = vadd.f32 %v2066_v30, %v2000_v15  ;;  %v1595_v26 = vadd.f32 %v1594_v19, %v1434_v17 }
 0x267   : > { %7886 = vst [vmem:[#allocation72_spill] sm:$0xff] %v6500_v1  ;;  %vm2752_vm7 = vcmp.gt.f32.partialorder %v2720_v27, 0.0  ;;  %v2784_v59 = vmul.f32 0.01, %v2720_v27  ;;  %v6506_v14 = vsub.f32 %v2815_v16, %v6500_v1  ;;  %v2489_v24 = vadd.f32 %v2457_v0, %v2390_v45 }
 0x268   : > { %v1871_v25 = vmul.f32 %v6157_v58, %v2423_v53  ;;  %v2196_v6 = vadd.f32 %v2164_v39, %v2098_v41  ;;  %v1969_v20 = vmul.f32 %v6210_v44, %v6428_v37  ;;  %vm1655_vm8 = vcmp.gt.f32.partialorder %v1595_v26, 0.0  ;;  %v7889_v53 = vld [vmem:[#allocation46_spill] sm:$0xff] }
 0x269   : > { %3008 = vmatmul.f32.gmra.mxu2 %v3007_v11  ;;  %3301 = vmatmul.f32.gmra.mxu3 %v6500_v1  ;;  %v2816_v32 = vsel %vm2752_vm7, %v2720_v27, %v2784_v59  ;;  %v1687_v36 = vmul.f32 0.01, %v1595_v26  ;;  %v7887_v15 = vand.u32 4294901760, %v6114_v2  ;;  %v7627_v62 = vand.u32 4294901760, %v6506_v14 }
 0x26a   : > { %3450 = vmatmul.f32.gmra.mxu0 %v6137_v42  ;;  %v6516_v57 = vand.u32 4294901760, %v2816_v32  ;;  %v1438_v11 = vadd.f32 %v1437_v7, %v7889_v53  ;;  %v2391_v55 = vadd.f32 %v2359_v23, %v2293_v48  ;;  %v2556_v31 = vmul.f32 %v6297_v43, %v6494_v52 }
 0x26b   : > { %3645 = vmatmul.f32.gmra.mxu1 %v7887_v15  ;;  %v2262_v37 = vmul.f32 %v6280_v21, %v6458_v51  ;;  %v6523_v17 = vsel %vm1655_vm8, %v1595_v26, %v1687_v36  ;;  %v3014_v2 = vsub.f32 %v6506_v14, %v7627_v62  ;;  %v2620_v16 = vld [vmem:[#allocation2 + $0x10a] sm:$0xff]  ;;  %v2001_v0 = vadd.f32 %v1969_v20, %v1871_v25  ;;  %v6540_v41 = vld [vmem:[#allocation2 + $0x112] sm:$0xff] }
 0x26c   : > { %7888 = vst [vmem:[#allocation71_spill] sm:$0xff] %v6516_v57  ;;  %v6525_v45 = vpop.f32.mrf.mxu3  ;;  %v6531_v30 = vsub.f32 %v2816_v32, %v6516_v57  ;;  %v6533_v27 = vld [vmem:[#allocation2 + $0x110] sm:$0xff]  ;;  %v2587_v23 = vadd.f32 %v2555_v40, %v2489_v24  ;;  %v2653_v39 = vmul.f32 %v6317_v9, %v2620_v16  ;;  %v2067_v26 = vmul.f32 %v6180_v12, %v6469_v56 }
 0x26d   : > { %1806 = vst [vmem:[#allocation2 + $0x121] sm:$0xff] %v6523_v17  ;;  %v2458_v7 = vmul.f32 %v6323_v34, %v6533_v27  ;;  %v2294_v19 = vadd.f32 %v2262_v37, %v2196_v6  ;;  %v3015_v59 = vand.u32 4294901760, %v3014_v2  ;;  %v2263_v25 = vmul.f32 %v6280_v21, %v6494_v52  ;;  %v1598_v20 = vpop.f32.mrf.mxu1 }
 0x26e   : > { %v7628_v48 = vand.u32 4294901760, %v6531_v30  ;;  %v2685_v40 = vadd.f32 %v2653_v39, %v2587_v23  ;;  %v2165_v36 = vmul.f32 %v6238_v33, %v6533_v27  ;;  %v1872_v6 = vmul.f32 %v6157_v58, %v2424_v22 }
 0x26f   : > { %v1441_v32 = vpop.f32.mrf.mxu0  ;;  %v2490_v24 = vadd.f32 %v2458_v7, %v2391_v55  ;;  %v1599_v15 = vadd.f32 %v1598_v20, %v1438_v11  ;;  %v2360_v53 = vmul.f32 %v6269_v4, %v2620_v16  ;;  %v2099_v37 = vadd.f32 %v2067_v26, %v2001_v0  ;;  %v7891_v7 = vld [vmem:[#allocation48_spill] sm:$0xff] }
 0x270   : > { %v1970_v2 = vmul.f32 %v6210_v44, %v6458_v51  ;;  %v2721_v56 = vadd.f32 %v6346_v3, %v2685_v40  ;;  %v2654_v55 = vmul.f32 %v6317_v9, %v6540_v41  ;;  %v7890_v22 = vand.u32 4294901760, %v6137_v42 }
 0x271   : > { %3016 = vmatmul.f32.gmra.mxu2 %v3015_v59  ;;  %3305 = vmatmul.f32.gmra.mxu3 %v6516_v57  ;;  %v2588_v62 = vadd.f32 %v2556_v31, %v2490_v24  ;;  %vm1656_vm9 = vcmp.gt.f32.partialorder %v1599_v15, 0.0  ;;  %v1688_v23 = vmul.f32 0.01, %v1599_v15  ;;  %v3022_v51 = vsub.f32 %v6531_v30, %v7628_v48 }
 0x272   : > { %3455 = vmatmul.f32.gmra.mxu0 %v6192_v60  ;;  %v2197_v11 = vadd.f32 %v2165_v36, %v2099_v37  ;;  %vm2753_vm10 = vcmp.gt.f32.partialorder %v2721_v56, 0.0  ;;  %v2785_v0 = vmul.f32 0.01, %v2721_v56  ;;  %v2557_v31 = vmul.f32 %v6297_v43, %v6523_v17 }
 0x273   : > { %3651 = vmatmul.f32.gmra.mxu1 %v7890_v22  ;;  %v2686_v39 = vadd.f32 %v2654_v55, %v2588_v62  ;;  %v1442_v59 = vadd.f32 %v1441_v32, %v7891_v7  ;;  %v6565_v26 = vsel %vm1656_vm9, %v1599_v15, %v1688_v23  ;;  %v2392_v42 = vadd.f32 %v2360_v53, %v2294_v19 }
 0x274   : > { %v2889_v20 = vpop.f32.mrf.mxu2  ;;  %v6567_v40 = vpop.f32.mrf.mxu3  ;;  %v6569_v24 = vld [vmem:[#allocation2 + $0x120] sm:$0xff]  ;;  %v2068_v22 = vmul.f32 %v6180_v12, %v2620_v16  ;;  %1807 = vst [vmem:[#allocation2 + $0x129] sm:$0xff] %v6565_v26  ;;  %v2817_v36 = vsel %vm2753_vm10, %v2721_v56, %v2785_v0  ;;  %v2002_v55 = vadd.f32 %v1970_v2, %v1872_v6  ;;  %v3023_v32 = vand.u32 4294901760, %v3022_v51 }
 0x275   : > { %v2722_v62 = vadd.f32 %v6346_v3, %v2686_v39  ;;  %v2459_v37 = vmul.f32 %v6323_v34, %v6569_v24  ;;  %v6576_v15 = vand.u32 4294901760, %v2817_v36  ;;  %v2295_v23 = vadd.f32 %v2263_v25, %v2197_v11  ;;  %v6583_v16 = vld [vmem:[%s7518_s6] ss:$0 sm:$0xff] }
 0x276   : > { %v2361_v19 = vmul.f32 %v6269_v4, %v6540_v41  ;;  %v2100_v39 = vadd.f32 %v2068_v22, %v2002_v55  ;;  %v2166_v6 = vmul.f32 %v6238_v33, %v6569_v24  ;;  %v1873_v11 = vmul.f32 %v6157_v58, %v6533_v27 }
 0x277   : > { %7892 = vst [vmem:[#allocation11_spill] sm:$0xff] %v6576_v15  ;;  %v1445_v53 = vpop.f32.mrf.mxu0  ;;  %v1602_v56 = vpop.f32.mrf.mxu1  ;;  %vm2754_vm11 = vcmp.gt.f32.partialorder %v2722_v62, 0.0  ;;  %v2786_v0 = vmul.f32 0.01, %v2722_v62  ;;  %v6588_v51 = vsub.f32 %v2817_v36, %v6576_v15  ;;  %v2491_v25 = vadd.f32 %v2459_v37, %v2392_v42 }
 0x278   : > { %v1603_v2 = vadd.f32 %v1602_v56, %v1442_v59  ;;  %v2198_v48 = vadd.f32 %v2166_v6, %v2100_v39  ;;  %v1971_v57 = vmul.f32 %v6210_v44, %v6494_v52  ;;  %v7893_v59 = vand.u32 4294901760, %v6192_v60  ;;  %v7895_v39 = vld [vmem:[#allocation52_spill] sm:$0xff] }
 0x279   : > { %3024 = vmatmul.f32.gmra.mxu2 %v3023_v32  ;;  %3309 = vmatmul.f32.gmra.mxu3 %v6576_v15  ;;  %v2818_v7 = vsel %vm2754_vm11, %v2722_v62, %v2786_v0  ;;  %v7633_v42 = vand.u32 4294901760, %v6588_v51  ;;  %v6602_v27 = vadd.f32 %v6583_v16, %v2889_v20  ;;  %v2393_v37 = vadd.f32 %v2361_v19, %v2295_v23 }
 0x27a   : > { %vm1657_vm12 = vcmp.gt.f32.partialorder %v1603_v2, 0.0  ;;  %v1689_v22 = vmul.f32 0.01, %v1603_v2  ;;  %3460 = vmatmul.f32.gmra.mxu0 %v6220_v46  ;;  %v6599_v36 = vand.u32 4294901760, %v2818_v7  ;;  %v2558_v62 = vmul.f32 %v6297_v43, %v6565_v26 }
 0x27b   : > { %3657 = vmatmul.f32.gmra.mxu1 %v7893_v59  ;;  %v2264_v52 = vmul.f32 %v6280_v21, %v6523_v17  ;;  %v3030_v60 = vsub.f32 %v6588_v51, %v7633_v42  ;;  %v2622_v20 = vld [vmem:[#allocation2 + $0x122] sm:$0xff]  ;;  %v2003_v19 = vadd.f32 %v1971_v57, %v1873_v11  ;;  %v1446_v6 = vadd.f32 %v1445_v53, %v7895_v39  ;;  %v6625_v15 = vld [vmem:[#allocation2 + $0x12a] sm:$0xff] }
 0x27c   : > { %7894 = vst [vmem:[#allocation73_spill] sm:$0xff] %v6599_v36  ;;  %v6608_v55 = vsel %vm1657_vm12, %v1603_v2, %v1689_v22  ;;  %v2897_v32 = vpop.f32.mrf.mxu2  ;;  %v6610_v56 = vpop.f32.mrf.mxu3  ;;  %v6616_v0 = vsub.f32 %v2818_v7, %v6599_v36  ;;  %v6618_v23 = vld [vmem:[#allocation2 + $0x128] sm:$0xff]  ;;  %v2589_v2 = vadd.f32 %v2557_v31, %v2491_v25  ;;  %v2655_v22 = vmul.f32 %v6317_v9, %v2622_v20 }
 0x27d   : > { %1808 = vst [vmem:[#allocation2 + $0x139] sm:$0xff] %v6608_v55  ;;  %v2460_v59 = vmul.f32 %v6323_v34, %v6618_v23  ;;  %v3031_v42 = vand.u32 4294901760, %v3030_v60  ;;  %v2296_v1 = vadd.f32 %v2264_v52, %v2198_v48  ;;  %v2069_v61 = vmul.f32 %v6180_v12, %v6540_v41 }
 0x27e   : > { %v2687_v53 = vadd.f32 %v2655_v22, %v2589_v2  ;;  %v2167_v31 = vmul.f32 %v6238_v33, %v6618_v23  ;;  %v2265_v25 = vmul.f32 %v6280_v21, %v6565_v26  ;;  %v2656_v60 = vmul.f32 %v6317_v9, %v6625_v15 }
 0x27f   : > { %v1449_v57 = vpop.f32.mrf.mxu0  ;;  %v1606_v11 = vpop.f32.mrf.mxu1  ;;  %v2492_v39 = vadd.f32 %v2460_v59, %v2393_v37  ;;  %v2362_v7 = vmul.f32 %v6269_v4, %v2622_v20  ;;  %v2101_v48 = vadd.f32 %v2069_v61, %v2003_v19  ;;  %v7896_v41 = vand.u32 4294901760, %v6616_v0 }
 0x280   : > { %v1607_v18 = vadd.f32 %v1606_v11, %v1446_v6  ;;  %v2723_v52 = vadd.f32 %v6346_v3, %v2687_v53  ;;  %v7897_v6 = vand.u32 4294901760, %v6220_v46  ;;  %v1874_v61 = vmul.f32 %v6157_v58, %v6569_v24 }
 0x281   : > { %3032 = vmatmul.f32.gmra.mxu2 %v3031_v42  ;;  %3313 = vmatmul.f32.gmra.mxu3 %v6599_v36  ;;  %v3038_v37 = vsub.f32 %v6616_v0, %v7896_v41  ;;  %v2590_v2 = vadd.f32 %v2558_v62, %v2492_v39  ;;  %v2199_v59 = vadd.f32 %v2167_v31, %v2101_v48  ;;  %v7898_v41 = vld [vmem:[#allocation56_spill] sm:$0xff] }
 0x282   : > { %vm1658_vm13 = vcmp.gt.f32.partialorder %v1607_v18, 0.0  ;;  %v1690_v22 = vmul.f32 0.01, %v1607_v18  ;;  %3465 = vmatmul.f32.gmra.mxu0 %v6275_v47  ;;  %v6648_v42 = vadd.f32 %v6583_v16, %v2897_v32  ;;  %vm2755_vm14 = vcmp.gt.f32.partialorder %v2723_v52, 0.0 }
 0x283   : > { %3663 = vmatmul.f32.gmra.mxu1 %v7897_v6  ;;  %v2787_v19 = vmul.f32 0.01, %v2723_v52  ;;  %v2688_v11 = vadd.f32 %v2656_v60, %v2590_v2  ;;  %v1450_v53 = vadd.f32 %v1449_v57, %v7898_v41  ;;  %v2394_v8 = vadd.f32 %v2362_v7, %v2296_v1 }
 0x284   : > { %v6651_v62 = vsel %vm1658_vm13, %v1607_v18, %v1690_v22  ;;  %v2905_v39 = vpop.f32.mrf.mxu2  ;;  %v6653_v36 = vpop.f32.mrf.mxu3  ;;  %v6655_v46 = vld [vmem:[#allocation2 + $0x138] sm:$0xff]  ;;  %v2559_v31 = vmul.f32 %v6297_v43, %v6608_v55  ;;  %v3039_v58 = vand.u32 4294901760, %v3038_v37  ;;  %v2297_v60 = vadd.f32 %v2265_v25, %v2199_v59 }
 0x285   : > { %1809 = vst [vmem:[#allocation2 + $0x141] sm:$0xff] %v6651_v62  ;;  %v2819_v24 = vsel %vm2755_vm14, %v2723_v52, %v2787_v19  ;;  %v2724_v32 = vadd.f32 %v6346_v3, %v2688_v11  ;;  %v2461_v57 = vmul.f32 %v6323_v34, %v6655_v46  ;;  %v2363_v1 = vmul.f32 %v6269_v4, %v6625_v15 }
 0x286   : > { %v6663_v18 = vand.u32 4294901760, %v2819_v24  ;;  %v1972_v7 = vmul.f32 %v6210_v44, %v6523_v17  ;;  %v2070_v37 = vmul.f32 %v6180_v12, %v2622_v20  ;;  %v6672_v52 = vmul.f32 %v6280_v21, %v6608_v55 }
 0x287   : > { %v1453_v48 = vpop.f32.mrf.mxu0  ;;  %v1610_v2 = vpop.f32.mrf.mxu1  ;;  %vm2756_vm15 = vcmp.gt.f32.partialorder %v2724_v32, 0.0  ;;  %v2788_v22 = vmul.f32 0.01, %v2724_v32  ;;  %v2493_v25 = vadd.f32 %v2461_v57, %v2394_v8  ;;  %v2168_v11 = vmul.f32 %v6238_v33, %v6655_v46 }
 0x288   : > { %7899 = vst [vmem:[#allocation4_spill] sm:$0xff] %v6663_v18  ;;  %v1611_v6 = vadd.f32 %v1610_v2, %v1450_v53  ;;  %v6675_v19 = vsub.f32 %v2819_v24, %v6663_v18  ;;  %v2004_v59 = vadd.f32 %v1972_v7, %v1874_v61  ;;  %v6682_v12 = vadd.f32 %v6525_v45, %v6602_v27  ;;  %v6698_v45 = vld [vmem:[%s7515_s3] ss:$0 sm:$0xff] }
 0x289   : > { %3040 = vmatmul.f32.gmra.mxu2 %v3039_v58  ;;  %3317 = vmatmul.f32.gmra.mxu3 %v6663_v18  ;;  %v2820_v17 = vsel %vm2756_vm15, %v2724_v32, %v2788_v22  ;;  %v7901_v41 = vand.u32 4294901760, %v6275_v47  ;;  %v6691_v53 = vadd.f32 %v6583_v16, %v2905_v39  ;;  %v2395_v58 = vadd.f32 %v2363_v1, %v2297_v60 }
 0x28a   : > { %7900 = vst [vmem:[#allocation17_spill] sm:$0xff] %v6682_v12  ;;  %vm1659_vm0 = vcmp.gt.f32.partialorder %v1611_v6, 0.0  ;;  %v1691_v20 = vmul.f32 0.01, %v1611_v6  ;;  %3470 = vmatmul.f32.gmra.mxu0 %v6309_v13  ;;  %v7644_v8 = vand.u32 4294901760, %v6675_v19  ;;  %v6688_v61 = vand.u32 4294901760, %v2820_v17 }
 0x28b   : > { %3669 = vmatmul.f32.gmra.mxu1 %v7901_v41  ;;  %v2560_v24 = vmul.f32 %v6297_v43, %v6651_v62  ;;  %v1875_v47 = vmul.f32 %v6698_v45, %v6618_v23  ;;  %v2102_v2 = vadd.f32 %v2070_v37, %v2004_v59  ;;  %v2591_v23 = vadd.f32 %v2559_v31, %v2493_v25  ;;  %v7903_v41 = vld [vmem:[#allocation37_spill] sm:$0xff] }
 0x28c   : > { %7902 = vst [vmem:[#allocation79_spill] sm:$0xff] %v6688_v61  ;;  %v6702_v27 = vsel %vm1659_vm0, %v1611_v6, %v1691_v20  ;;  %v2913_v32 = vpop.f32.mrf.mxu2  ;;  %v6704_v57 = vpop.f32.mrf.mxu3  ;;  %v3046_v39 = vsub.f32 %v6675_v19, %v7644_v8  ;;  %v6710_v60 = vsub.f32 %v2820_v17, %v6688_v61  ;;  %v6712_v1 = vld [vmem:[#allocation2 + $0x13a] sm:$0xff]  ;;  %v6721_v20 = vld [vmem:[#allocation2 + $0x142] sm:$0xff]  ;;  %v1973_v17 = vmul.f32 %v6210_v44, %v6565_v26 }
 0x28d   : > { %v6714_v7 = vld [vmem:[#allocation2 + $0x140] sm:$0xff]  ;;  %1810 = vst [vmem:[#allocation2 + $0x151] sm:$0xff] %v6702_v27  ;;  %v2657_v22 = vmul.f32 %v6317_v9, %v6712_v1  ;;  %v1454_v8 = vadd.f32 %v1453_v48, %v7903_v41  ;;  %v2200_v37 = vadd.f32 %v2168_v11, %v2102_v2  ;;  %v2071_v29 = vmul.f32 %v6730_v35, %v6625_v15 }
 0x28e   : > { %v2462_v6 = vmul.f32 %v6323_v34, %v6714_v7  ;;  %v3047_v18 = vand.u32 4294901760, %v3046_v39  ;;  %v7657_v12 = vand.u32 4294901760, %v6710_v60  ;;  %v2005_v54 = vadd.f32 %v1973_v17, %v1875_v47 }
 0x28f   : > { %v1457_v59 = vpop.f32.mrf.mxu0  ;;  %v1614_v5 = vpop.f32.mrf.mxu1  ;;  %v2689_v31 = vadd.f32 %v2657_v22, %v2591_v23  ;;  %v2658_v26 = vmul.f32 %v6317_v9, %v6721_v20  ;;  %v2364_v48 = vmul.f32 %v6269_v4, %v6712_v1  ;;  %v2267_v11 = vmul.f32 %v6280_v21, %v6651_v62 }
 0x290   : > { %v2494_v25 = vadd.f32 %v2462_v6, %v2395_v58  ;;  %v1615_v44 = vadd.f32 %v1614_v5, %v1454_v8  ;;  %v3054_v58 = vsub.f32 %v6710_v60, %v7657_v12  ;;  %v7904_v8 = vand.u32 4294901760, %v6309_v13 }
 0x291   : > { %3048 = vmatmul.f32.gmra.mxu2 %v3047_v18  ;;  %3321 = vmatmul.f32.gmra.mxu3 %v6688_v61  ;;  %v2725_v47 = vadd.f32 %v6346_v3, %v2689_v31  ;;  %v2103_v39 = vadd.f32 %v2071_v29, %v2005_v54  ;;  %v2169_v21 = vmul.f32 %v6238_v33, %v6714_v7 }
 0x292   : > { %v2592_v15 = vadd.f32 %v2560_v24, %v2494_v25  ;;  %vm1660_vm1 = vcmp.gt.f32.partialorder %v1615_v44, 0.0  ;;  %v1692_v5 = vmul.f32 0.01, %v1615_v44  ;;  %3475 = vmatmul.f32.gmra.mxu0 %v6370_v49  ;;  %v6751_v18 = vadd.f32 %v6583_v16, %v2913_v32  ;;  %v7906_v25 = vld [vmem:[#allocation38_spill] sm:$0xff] }
 0x293   : > { %3675 = vmatmul.f32.gmra.mxu1 %v7904_v8  ;;  %vm2757_vm2 = vcmp.gt.f32.partialorder %v2725_v47, 0.0  ;;  %v2789_v2 = vmul.f32 0.01, %v2725_v47  ;;  %v2298_v17 = vadd.f32 %v6672_v52, %v2200_v37  ;;  %v2201_v13 = vadd.f32 %v2169_v21, %v2103_v39 }
 0x294   : > { %v2690_v23 = vadd.f32 %v2658_v26, %v2592_v15  ;;  %v6753_v22 = vsel %vm1660_vm1, %v1615_v44, %v1692_v5  ;;  %v2921_v24 = vpop.f32.mrf.mxu2  ;;  %v6755_v6 = vpop.f32.mrf.mxu3  ;;  %v6758_v41 = vld [vmem:[#allocation2 + $0x150] sm:$0xff]  ;;  %v6762_v29 = vadd.f32 %v6567_v40, %v6648_v42  ;;  %v2561_v31 = vmul.f32 %v6297_v43, %v6702_v27 }
 0x295   : > { %1811 = vst [vmem:[#allocation2 + $0x159] sm:$0xff] %v6753_v22  ;;  %v2821_v54 = vsel %vm2757_vm2, %v2725_v47, %v2789_v2  ;;  %v2463_v32 = vmul.f32 %v6323_v34, %v6758_v41  ;;  %v1458_v52 = vadd.f32 %v1457_v59, %v7906_v25  ;;  %v3055_v37 = vand.u32 4294901760, %v3054_v58  ;;  %v6783_v59 = vld [vmem:[%s7515_s3 + $0x1] ss:$0 sm:$0xff] }
 0x296   : > { %7905 = vst [vmem:[#allocation76_spill] sm:$0xff] %v6762_v29  ;;  %v2726_v33 = vadd.f32 %v6346_v3, %v2690_v23  ;;  %v6771_v44 = vand.u32 4294901760, %v2821_v54  ;;  %v2396_v26 = vadd.f32 %v2364_v48, %v2298_v17  ;;  %v2365_v47 = vmul.f32 %v6269_v4, %v6721_v20  ;;  %v7910_v17 = vld [vmem:[#allocation59_spill] sm:$0xff] }
 0x297   : > { %v1461_v15 = vpop.f32.mrf.mxu0  ;;  %v1618_v40 = vpop.f32.mrf.mxu1  ;;  %v1876_v5 = vmul.f32 %v6698_v45, %v6655_v46  ;;  %v2299_v43 = vadd.f32 %v2267_v11, %v2201_v13  ;;  %v1974_v48 = vmul.f32 %v6783_v59, %v6608_v55  ;;  %v2072_v46 = vmul.f32 %v6730_v35, %v6712_v1 }
 0x298   : > { %7907 = vst [vmem:[#allocation78_spill] sm:$0xff] %v6771_v44  ;;  %vm2758_vm3 = vcmp.gt.f32.partialorder %v2726_v33, 0.0  ;;  %v2790_v42 = vmul.f32 0.01, %v2726_v33  ;;  %v1619_v8 = vadd.f32 %v1618_v40, %v1458_v52  ;;  %v6778_v39 = vsub.f32 %v2821_v54, %v6771_v44 }
 0x299   : > { %3056 = vmatmul.f32.gmra.mxu2 %v3055_v37  ;;  %3325 = vmatmul.f32.gmra.mxu3 %v6771_v44  ;;  %v2495_v58 = vadd.f32 %v2463_v32, %v2396_v26  ;;  %v7908_v11 = vand.u32 4294901760, %v6370_v49  ;;  %v6797_v55 = vadd.f32 %v6583_v16, %v2921_v24  ;;  %v1462_v13 = vadd.f32 %v1461_v15, %v7910_v17 }
 0x29a   : > { %v2822_v4 = vsel %vm2758_vm3, %v2726_v33, %v2790_v42  ;;  %vm1661_vm4 = vcmp.gt.f32.partialorder %v1619_v8, 0.0  ;;  %v1693_v21 = vmul.f32 0.01, %v1619_v8  ;;  %3480 = vmatmul.f32.gmra.mxu0 %v6394_v38  ;;  %v7655_v2 = vand.u32 4294901760, %v6778_v39 }
 0x29b   : > { %3681 = vmatmul.f32.gmra.mxu1 %v7908_v11  ;;  %v6794_v23 = vand.u32 4294901760, %v2822_v4  ;;  %v2006_v54 = vadd.f32 %v1974_v48, %v1876_v5  ;;  %v6802_v1 = vadd.f32 %v6610_v56, %v6691_v53  ;;  %v6823_v56 = vld [vmem:[%s7515_s3 + $0x3] ss:$0 sm:$0xff]  ;;  %v2593_v26 = vadd.f32 %v2561_v31, %v2495_v58  ;;  %v6840_v31 = vld [vmem:[%s7515_s3 + $0x7] ss:$0 sm:$0xff] }
 0x29c   : > { %v6804_v33 = vsel %vm1661_vm4, %v1619_v8, %v1693_v21  ;;  %v6806_v32 = vpop.f32.mrf.mxu2  ;;  %v6808_v49 = vpop.f32.mrf.mxu3  ;;  %v3062_v25 = vsub.f32 %v6778_v39, %v7655_v2  ;;  %v6816_v52 = vld [vmem:[#allocation2 + $0x152] sm:$0xff]  ;;  %v2170_v53 = vmul.f32 %v6823_v56, %v6758_v41  ;;  %v2397_v40 = vadd.f32 %v2365_v47, %v2299_v43  ;;  %v6832_v5 = vld [vmem:[#allocation2 + $0x15a] sm:$0xff]  ;;  %v6847_v47 = vld [vmem:[%s7515_s3 + $0x4] ss:$0 sm:$0xff] }
 0x29d   : > { %7909 = vst [vmem:[#allocation77_spill] sm:$0xff] %v6794_v23  ;;  %v6814_v24 = vsub.f32 %v2822_v4, %v6794_v23  ;;  %v6818_v37 = vld [vmem:[#allocation2 + $0x158] sm:$0xff]  ;;  %v2659_v15 = vmul.f32 %v6317_v9, %v6816_v52  ;;  %v2104_v4 = vadd.f32 %v2072_v46, %v2006_v54  ;;  %v1877_v21 = vmul.f32 %v6698_v45, %v6714_v7 }
 0x29e   : > { %7911 = vst [vmem:[#allocation23_spill] sm:$0xff] %v6802_v1  ;;  %v2464_v42 = vmul.f32 %v6323_v34, %v6818_v37  ;;  %v3063_v8 = vand.u32 4294901760, %v3062_v25  ;;  %v2562_v34 = vmul.f32 %v6840_v31, %v6753_v22  ;;  %v2268_v43 = vmul.f32 %v6847_v47, %v6702_v27 }
 0x29f   : > { %1812 = vst [vmem:[#allocation2 + $0x169] sm:$0xff] %v6804_v33  ;;  %v7656_v48 = vand.u32 4294901760, %v6814_v24  ;;  %v1622_v11 = vpop.f32.mrf.mxu1  ;;  %v2691_v17 = vadd.f32 %v2659_v15, %v2593_v26  ;;  %v2660_v58 = vmul.f32 %v6317_v9, %v6832_v5  ;;  %v2202_v46 = vadd.f32 %v2170_v53, %v2104_v4  ;;  %v1465_v25 = vpop.f32.mrf.mxu0 }
 0x2a0   : > { %v2496_v2 = vadd.f32 %v2464_v42, %v2397_v40  ;;  %v1623_v7 = vadd.f32 %v1622_v11, %v1462_v13  ;;  %v1975_v54 = vmul.f32 %v6783_v59, %v6651_v62  ;;  %v6860_v40 = vld [vmem:[%s7515_s3 + $0x5] ss:$0 sm:$0xff]  ;;  %v7912_v62 = vand.u32 4294901760, %v6394_v38 }
 0x2a1   : > { %3064 = vmatmul.f32.gmra.mxu2 %v3063_v8  ;;  %3329 = vmatmul.f32.gmra.mxu3 %v6794_v23  ;;  %v2727_v26 = vadd.f32 %v6346_v3, %v2691_v17  ;;  %v2366_v13 = vmul.f32 %v6860_v40, %v6816_v52  ;;  %v3070_v3 = vsub.f32 %v6814_v24, %v7656_v48 }
 0x2a2   : > { %v2594_v15 = vadd.f32 %v2562_v34, %v2496_v2  ;;  %vm1662_vm5 = vcmp.gt.f32.partialorder %v1623_v7, 0.0  ;;  %v1694_v9 = vmul.f32 0.01, %v1623_v7  ;;  %3485 = vmatmul.f32.gmra.mxu0 %v6440_v63  ;;  %v2007_v2 = vadd.f32 %v1975_v54, %v1877_v21 }
 0x2a3   : > { %3687 = vmatmul.f32.gmra.mxu1 %v7912_v62  ;;  %vm2759_vm6 = vcmp.gt.f32.partialorder %v2727_v26, 0.0  ;;  %v2791_v53 = vmul.f32 0.01, %v2727_v26  ;;  %v2563_v8 = vmul.f32 %v6840_v31, %v6804_v33  ;;  %v1466_v4 = vadd.f32 %v1465_v25, %v5986_v50  ;;  %v6889_v50 = vld [vmem:[%s7516_s4] ss:$0 sm:$0xff] }
 0x2a4   : > { %v2692_v42 = vadd.f32 %v2660_v58, %v2594_v15  ;;  %v6873_v11 = vsel %vm1662_vm5, %v1623_v7, %v1694_v9  ;;  %v6875_v17 = vpop.f32.mrf.mxu2  ;;  %v6877_v34 = vpop.f32.mrf.mxu3  ;;  %v2073_v62 = vmul.f32 %v6730_v35, %v6721_v20  ;;  %v2171_v21 = vmul.f32 %v6823_v56, %v6818_v37  ;;  %v6895_v25 = vld [vmem:[%s7515_s3 + $0x6] ss:$0 sm:$0xff] }
 0x2a5   : > { %1813 = vst [vmem:[#allocation2 + $0x171] sm:$0xff] %v6873_v11  ;;  %v2823_v58 = vsel %vm2759_vm6, %v2727_v26, %v2791_v53  ;;  %v2300_v54 = vadd.f32 %v2268_v43, %v2202_v46  ;;  %v3071_v15 = vand.u32 4294901760, %v3070_v3  ;;  %v6903_v53 = vadd.f32 %v6653_v36, %v6751_v18 }
 0x2a6   : > { %v6879_v38 = vld [vmem:[#allocation2 + $0x168] sm:$0xff]  ;;  %v2728_v7 = vadd.f32 %v6889_v50, %v2692_v42  ;;  %v6899_v9 = vand.u32 4294901760, %v2823_v58  ;;  %v2105_v26 = vadd.f32 %v2073_v62, %v2007_v2  ;;  %v1878_v46 = vmul.f32 %v6698_v45, %v6758_v41 }
 0x2a7   : > { %v2465_v20 = vmul.f32 %v6895_v25, %v6879_v38  ;;  %7914 = vst [vmem:[#allocation28_spill] sm:$0xff] %v6903_v53  ;;  %v1626_v48 = vpop.f32.mrf.mxu1  ;;  %v2398_v43 = vadd.f32 %v2366_v13, %v2300_v54  ;;  %v2269_v3 = vmul.f32 %v6847_v47, %v6753_v22  ;;  %v1976_v2 = vmul.f32 %v6783_v59, %v6702_v27  ;;  %v1469_v62 = vpop.f32.mrf.mxu0 }
 0x2a8   : > { %7913 = vst [vmem:[#allocation12_spill] sm:$0xff] %v6899_v9  ;;  %vm2760_vm7 = vcmp.gt.f32.partialorder %v2728_v7, 0.0  ;;  %v2792_v42 = vmul.f32 0.01, %v2728_v7  ;;  %v1627_v12 = vadd.f32 %v1626_v48, %v1466_v4  ;;  %v6908_v23 = vsub.f32 %v2823_v58, %v6899_v9 }
 0x2a9   : > { %v2203_v44 = vadd.f32 %v2171_v21, %v2105_v26  ;;  %3072 = vmatmul.f32.gmra.mxu2 %v3071_v15  ;;  %3333 = vmatmul.f32.gmra.mxu3 %v6899_v9  ;;  %v2497_v18 = vadd.f32 %v2465_v20, %v2398_v43  ;;  %v7915_v41 = vand.u32 4294901760, %v6440_v63  ;;  %v2367_v58 = vmul.f32 %v6860_v40, %v6832_v5  ;;  %v6947_v43 = vld [vmem:[%s7515_s3 + $0x8] ss:$0 sm:$0xff] }
 0x2aa   : > { %v2824_v36 = vsel %vm2760_vm7, %v2728_v7, %v2792_v42  ;;  %vm1663_vm8 = vcmp.gt.f32.partialorder %v1627_v12, 0.0  ;;  %v1695_v13 = vmul.f32 0.01, %v1627_v12  ;;  %3490 = vmatmul.f32.gmra.mxu0 %v6464_v28  ;;  %v7662_v48 = vand.u32 4294901760, %v6908_v23 }
 0x2ab   : > { %3693 = vmatmul.f32.gmra.mxu1 %v7915_v41  ;;  %v6919_v4 = vand.u32 4294901760, %v2824_v36  ;;  %v2301_v21 = vadd.f32 %v2269_v3, %v2203_v44  ;;  %v2008_v7 = vadd.f32 %v1976_v2, %v1878_v46  ;;  %v2074_v27 = vmul.f32 %v6730_v35, %v6816_v52 }
 0x2ac   : > { %v6925_v54 = vsel %vm1663_vm8, %v1627_v12, %v1695_v13  ;;  %v6927_v20 = vpop.f32.mrf.mxu2  ;;  %v6929_v15 = vpop.f32.mrf.mxu3  ;;  %v3078_v63 = vsub.f32 %v6908_v23, %v7662_v48  ;;  %v6937_v44 = vld [vmem:[#allocation2 + $0x16a] sm:$0xff]  ;;  %v2172_v52 = vmul.f32 %v6823_v56, %v6879_v38  ;;  %v2595_v12 = vadd.f32 %v2563_v8, %v2497_v18  ;;  %v6953_v2 = vld [vmem:[#allocation2 + $0x172] sm:$0xff] }
 0x2ad   : > { %v6935_v26 = vsub.f32 %v2824_v36, %v6919_v4  ;;  %v6939_v42 = vld [vmem:[#allocation2 + $0x170] sm:$0xff]  ;;  %1814 = vst [vmem:[#allocation2 + $0x181] sm:$0xff] %v6925_v54  ;;  %v2661_v46 = vmul.f32 %v6947_v43, %v6937_v44  ;;  %v2399_v3 = vadd.f32 %v2367_v58, %v2301_v21  ;;  %v1470_v13 = vadd.f32 %v1469_v62, %v5989_v10 }
 0x2ae   : > { %v2466_v36 = vmul.f32 %v6895_v25, %v6939_v42  ;;  %v3079_v41 = vand.u32 4294901760, %v3078_v63  ;;  %v2106_v8 = vadd.f32 %v2074_v27, %v2008_v7  ;;  %v2564_v53 = vmul.f32 %v6840_v31, %v6873_v11 }
 0x2af   : > { %v7668_v48 = vand.u32 4294901760, %v6935_v26  ;;  %v1630_v18 = vpop.f32.mrf.mxu1  ;;  %v2693_v9 = vadd.f32 %v2661_v46, %v2595_v12  ;;  %v2270_v21 = vmul.f32 %v6847_v47, %v6804_v33  ;;  %v2662_v1 = vmul.f32 %v6947_v43, %v6953_v2 }
 0x2b0   : > { %v2498_v61 = vadd.f32 %v2466_v36, %v2399_v3  ;;  %v1631_v58 = vadd.f32 %v1630_v18, %v1470_v13  ;;  %v2204_v29 = vadd.f32 %v2172_v52, %v2106_v8  ;;  %v2368_v10 = vmul.f32 %v6860_v40, %v6937_v44 }
 0x2b1   : > { %3080 = vmatmul.f32.gmra.mxu2 %v3079_v41  ;;  %3337 = vmatmul.f32.gmra.mxu3 %v6919_v4  ;;  %v2729_v62 = vadd.f32 %v6889_v50, %v2693_v9  ;;  %v6969_v27 = vadd.f32 %v6704_v57, %v6797_v55  ;;  %v7916_v12 = vand.u32 4294901760, %v6464_v28  ;;  %v3086_v52 = vsub.f32 %v6935_v26, %v7668_v48 }
 0x2b2   : > { %v2596_v7 = vadd.f32 %v2564_v53, %v2498_v61  ;;  %vm1664_vm9 = vcmp.gt.f32.partialorder %v1631_v58, 0.0  ;;  %v1696_v63 = vmul.f32 0.01, %v1631_v58  ;;  %3495 = vmatmul.f32.gmra.mxu0 %v6506_v14  ;;  %v2302_v46 = vadd.f32 %v2270_v21, %v2204_v29 }
 0x2b3   : > { %3699 = vmatmul.f32.gmra.mxu1 %v7916_v12  ;;  %vm2761_vm10 = vcmp.gt.f32.partialorder %v2729_v62, 0.0  ;;  %v2793_v3 = vmul.f32 0.01, %v2729_v62  ;;  %v1879_v61 = vmul.f32 %v6698_v45, %v6818_v37  ;;  %v2930_v57 = vadd.f32 %v6583_v16, %v6806_v32 }
 0x2b4   : > { %v2694_v9 = vadd.f32 %v2662_v1, %v2596_v7  ;;  %v6981_v55 = vsel %vm1664_vm9, %v1631_v58, %v1696_v63  ;;  %v2953_v53 = vpop.f32.mrf.mxu2  ;;  %v6983_v36 = vpop.f32.mrf.mxu3  ;;  %v2434_v28 = vld [vmem:[#allocation2 + $0x180] sm:$0xff]  ;;  %v1977_v13 = vmul.f32 %v6783_v59, %v6753_v22  ;;  %v2400_v41 = vadd.f32 %v2368_v10, %v2302_v46 }
 0x2b5   : > { %1815 = vst [vmem:[#allocation2 + $0x189] sm:$0xff] %v6981_v55  ;;  %v2825_v29 = vsel %vm2761_vm10, %v2729_v62, %v2793_v3  ;;  %v2467_v37 = vmul.f32 %v6895_v25, %v2434_v28  ;;  %v2075_v18 = vmul.f32 %v6730_v35, %v6832_v5  ;;  %v2173_v21 = vmul.f32 %v6823_v56, %v6939_v42 }
 0x2b6   : > { %v2730_v1 = vadd.f32 %v6889_v50, %v2694_v9  ;;  %v6990_v8 = vand.u32 4294901760, %v2825_v29  ;;  %v2009_v32 = vadd.f32 %v1977_v13, %v1879_v61  ;;  %v3087_v58 = vand.u32 4294901760, %v3086_v52 }
 0x2b7   : > { %v2499_v62 = vadd.f32 %v2467_v37, %v2400_v41  ;;  %v2565_v12 = vmul.f32 %v6840_v31, %v6925_v54  ;;  %v2271_v5 = vmul.f32 %v6847_v47, %v6873_v11  ;;  %v7918_v52 = vand.u32 4294901760, %v6506_v14 }
 0x2b8   : > { %7917 = vst [vmem:[#allocation80_spill] sm:$0xff] %v6990_v8  ;;  %vm2762_vm11 = vcmp.gt.f32.partialorder %v2730_v1, 0.0  ;;  %v2794_v22 = vmul.f32 0.01, %v2730_v1  ;;  %v6997_v7 = vsub.f32 %v2825_v29, %v6990_v8  ;;  %v2107_v63 = vadd.f32 %v2075_v18, %v2009_v32 }
 0x2b9   : > { %3088 = vmatmul.f32.gmra.mxu2 %v3087_v58  ;;  %3341 = vmatmul.f32.gmra.mxu3 %v6990_v8  ;;  %v7011_v61 = vadd.f32 %v6755_v6, %v2930_v57  ;;  %v2938_v13 = vadd.f32 %v6583_v16, %v6875_v17  ;;  %v2946_v29 = vadd.f32 %v6583_v16, %v6927_v20 }
 0x2ba   : > { %v2826_v10 = vsel %vm2762_vm11, %v2730_v1, %v2794_v22  ;;  %3500 = vmatmul.f32.gmra.mxu0 %v6531_v30  ;;  %v7667_v46 = vand.u32 4294901760, %v6997_v7  ;;  %v2205_v9 = vadd.f32 %v2173_v21, %v2107_v63  ;;  %v2369_v1 = vmul.f32 %v6860_v40, %v6953_v2 }
 0x2bb   : > { %3705 = vmatmul.f32.gmra.mxu1 %v7918_v52  ;;  %v7008_v3 = vand.u32 4294901760, %v2826_v10  ;;  %v1880_v14 = vmul.f32 %v6698_v45, %v6879_v38  ;;  %v2597_v17 = vadd.f32 %v2565_v12, %v2499_v62  ;;  %v1978_v38 = vmul.f32 %v6783_v59, %v6804_v33 }
 0x2bc   : > { %v2961_v41 = vpop.f32.mrf.mxu2  ;;  %v7021_v37 = vpop.f32.mrf.mxu3  ;;  %v3094_v6 = vsub.f32 %v6997_v7, %v7667_v46  ;;  %v2630_v32 = vld [vmem:[#allocation2 + $0x182] sm:$0xff]  ;;  %v2303_v18 = vadd.f32 %v2271_v5, %v2205_v9  ;;  %v7031_v22 = vld [vmem:[#allocation2 + $0x18a] sm:$0xff]  ;;  %v2076_v63 = vmul.f32 %v6730_v35, %v6937_v44  ;;  %v2954_v52 = vadd.f32 %v6583_v16, %v2953_v53 }
 0x2bd   : > { %v7027_v57 = vsub.f32 %v2826_v10, %v7008_v3  ;;  %v2435_v20 = vld [vmem:[#allocation2 + $0x188] sm:$0xff]  ;;  %v2663_v21 = vmul.f32 %v6947_v43, %v2630_v32  ;;  %v2566_v9 = vmul.f32 %v6840_v31, %v6981_v55  ;;  %v2010_v46 = vadd.f32 %v1978_v38, %v1880_v14 }
 0x2be   : > { %v2468_v58 = vmul.f32 %v6895_v25, %v2435_v20  ;;  %v3095_v10 = vand.u32 4294901760, %v3094_v6  ;;  %v2401_v12 = vadd.f32 %v2369_v1, %v2303_v18  ;;  %v2174_v48 = vmul.f32 %v6823_v56, %v2434_v28 }
 0x2bf   : > { %v3101_v62 = vand.u32 4294901760, %v7027_v57  ;;  %v2695_v5 = vadd.f32 %v2663_v21, %v2597_v17  ;;  %v2664_v33 = vmul.f32 %v6947_v43, %v7031_v22  ;;  %v2272_v44 = vmul.f32 %v6847_v47, %v6925_v54 }
 0x2c0   : > { %v2500_v8 = vadd.f32 %v2468_v58, %v2401_v12  ;;  %v2370_v53 = vmul.f32 %v6860_v40, %v2630_v32  ;;  %v2108_v6 = vadd.f32 %v2076_v63, %v2010_v46  ;;  %v7919_v28 = vand.u32 4294901760, %v6531_v30  ;;  %v2534_v58 = vld [vmem:[#allocation2 + $0x199] sm:$0xff] }
 0x2c1   : > { %3096 = vmatmul.f32.gmra.mxu2 %v3095_v10  ;;  %3345 = vmatmul.f32.gmra.mxu3 %v7008_v3  ;;  %v3102_v1 = vsub.f32 %v7027_v57, %v3101_v62  ;;  %v2731_v14 = vadd.f32 %v6889_v50, %v2695_v5  ;;  %v7056_v54 = vadd.f32 %v6808_v49, %v2938_v13  ;;  %v4423_v12 = vld [vmem:[#allocation2] sm:$0xff] }
 0x2c2   : > { %3505 = vmatmul.f32.gmra.mxu0 %v6588_v51  ;;  %v2598_v17 = vadd.f32 %v2566_v9, %v2500_v8  ;;  %v1881_v32 = vmul.f32 %v6698_v45, %v6939_v42  ;;  %v2206_v21 = vadd.f32 %v2174_v48, %v2108_v6  ;;  %v1979_v38 = vmul.f32 %v6783_v59, %v6873_v11  ;;  %v2632_v42 = vld [vmem:[#allocation2 + $0x19a] sm:$0xff] }
 0x2c3   : > { %3711 = vmatmul.f32.gmra.mxu1 %v7919_v28  ;;  %vm2763_vm12 = vcmp.gt.f32.partialorder %v2731_v14, 0.0  ;;  %v2795_v18 = vmul.f32 0.01, %v2731_v14  ;;  %v2962_v46 = vadd.f32 %v6583_v16, %v2961_v41  ;;  %v2469_v8 = vmul.f32 %v4423_v12, %v6895_v25 }
 0x2c4   : > { %v2969_v63 = vpop.f32.mrf.mxu2  ;;  %v3282_v10 = vpop.f32.mrf.mxu3  ;;  %v2696_v30 = vadd.f32 %v2664_v33, %v2598_v17  ;;  %v2077_v49 = vmul.f32 %v6730_v35, %v6953_v2  ;;  %v2304_v45 = vadd.f32 %v2272_v44, %v2206_v21  ;;  %v2011_v5 = vadd.f32 %v1979_v38, %v1881_v32  ;;  %v2633_v38 = vld [vmem:[#allocation2 + $0x1a2] sm:$0xff] }
 0x2c5   : > { %v2827_v13 = vsel %vm2763_vm12, %v2731_v14, %v2795_v18  ;;  %v2175_v48 = vmul.f32 %v6823_v56, %v2435_v20  ;;  %v2970_v9 = vadd.f32 %v6583_v16, %v2969_v63  ;;  %v2567_v41 = vmul.f32 %v6840_v31, %v2534_v58  ;;  %v2535_v14 = vld [vmem:[#allocation2 + $0x1a1] sm:$0xff] }
 0x2c6   : > { %v7068_v59 = vand.u32 4294901760, %v2827_v13  ;;  %v2732_v11 = vadd.f32 %v6889_v50, %v2696_v30  ;;  %v3103_v33 = vand.u32 4294901760, %v3102_v1  ;;  %v2402_v6 = vadd.f32 %v2370_v53, %v2304_v45 }
 0x2c7   : > { %v2109_v25 = vadd.f32 %v2077_v49, %v2011_v5  ;;  %v7073_v28 = vadd.f32 %v6877_v34, %v2946_v29  ;;  %v2665_v56 = vmul.f32 %v6947_v43, %v2632_v42  ;;  %v2273_v2 = vmul.f32 %v6847_v47, %v6981_v55 }
 0x2c8   : > { %v7076_v35 = vsub.f32 %v2827_v13, %v7068_v59  ;;  %vm2764_vm13 = vcmp.gt.f32.partialorder %v2732_v11, 0.0  ;;  %v2796_v20 = vmul.f32 0.01, %v2732_v11  ;;  %v2501_v44 = vadd.f32 %v2469_v8, %v2402_v6 }
 0x2c9   : > { %3104 = vmatmul.f32.gmra.mxu2 %v3103_v33  ;;  %3349 = vmatmul.f32.gmra.mxu3 %v7068_v59  ;;  %v2207_v1 = vadd.f32 %v2175_v48, %v2109_v25  ;;  %v7083_v53 = vadd.f32 %v6929_v15, %v2954_v52  ;;  %v7920_v34 = vand.u32 4294901760, %v6588_v51  ;;  %v7090_v17 = vadd.f32 %v6983_v36, %v2962_v46 }
 0x2ca   : > { %3510 = vmatmul.f32.gmra.mxu0 %v6616_v0  ;;  %v3109_v29 = vand.u32 4294901760, %v7076_v35  ;;  %v7093_v47 = vadd.f32 %v7021_v37, %v2970_v9  ;;  %v2828_v55 = vsel %vm2764_vm13, %v2732_v11, %v2796_v20  ;;  %v2599_v32 = vadd.f32 %v2567_v41, %v2501_v44 }
 0x2cb   : > { %3717 = vmatmul.f32.gmra.mxu1 %v7920_v34  ;;  %v2305_v18 = vadd.f32 %v2273_v2, %v2207_v1  ;;  %v2371_v15 = vmul.f32 %v6860_v40, %v7031_v22  ;;  %v7100_v58 = vand.u32 4294901760, %v2828_v55  ;;  %v2568_v63 = vmul.f32 %v6840_v31, %v2535_v14 }
 0x2cc   : > { %v2977_v52 = vpop.f32.mrf.mxu2  ;;  %v3286_v21 = vpop.f32.mrf.mxu3  ;;  %v3110_v51 = vsub.f32 %v7076_v35, %v3109_v29  ;;  %v2697_v46 = vadd.f32 %v2665_v56, %v2599_v32  ;;  %v2666_v49 = vmul.f32 %v6947_v43, %v2633_v38  ;;  %v7921_v31 = vand.u32 4294901760, %v6616_v0 }
 0x2cd   : > { %v2978_v36 = vadd.f32 %v6583_v16, %v2977_v52  ;;  %v2403_v37 = vadd.f32 %v2371_v15, %v2305_v18  ;;  %v7105_v12 = vsub.f32 %v2828_v55, %v7100_v58  ;;  %v7922_v44 = vand.u32 4294901760, %v6675_v19 }
 0x2ce   : > { %v3111_v30 = vand.u32 4294901760, %v3110_v51  ;;  %v2733_v40 = vadd.f32 %v6889_v50, %v2697_v46 }
 0x2cf   : > { %v2502_v22 = vadd.f32 %v2469_v8, %v2403_v37  ;;  %v7109_v13 = vadd.f32 %v3282_v10, %v2978_v36  ;;  %v3117_v45 = vand.u32 4294901760, %v7105_v12 }
 0x2d0   : > { %vm2765_vm14 = vcmp.gt.f32.partialorder %v2733_v40, 0.0  ;;  %v2797_v42 = vmul.f32 0.01, %v2733_v40 }
 0x2d1   : > { %3112 = vmatmul.f32.gmra.mxu2 %v3111_v30  ;;  %3353 = vmatmul.f32.gmra.mxu3 %v7100_v58  ;;  %v2600_v5 = vadd.f32 %v2568_v63, %v2502_v22  ;;  %v3118_v8 = vsub.f32 %v7105_v12, %v3117_v45  ;;  %v7924_v30 = vld [vmem:[#allocation64_spill] sm:$0xff] }
 0x2d2   : > { %3515 = vmatmul.f32.gmra.mxu0 %v6675_v19  ;;  %v2829_v43 = vsel %vm2765_vm14, %v2733_v40, %v2797_v42  ;;  %v7923_v19 = vand.u32 4294901760, %v6710_v60  ;;  %v7161_v40 = vpop.f32.mrf.mxu1 }
 0x2d3   : > { %3723 = vmatmul.f32.gmra.mxu1 %v7921_v31  ;;  %v2698_v10 = vadd.f32 %v2666_v49, %v2600_v5  ;;  %v7119_v11 = vand.u32 4294901760, %v2829_v43  ;;  %v3119_v25 = vand.u32 4294901760, %v3118_v8  ;;  %v7926_v8 = vld [vmem:[#allocation41_spill] sm:$0xff] }
 0x2d4   : > { %v2985_v48 = vpop.f32.mrf.mxu2  ;;  %v3290_v9 = vpop.f32.mrf.mxu3 }
 0x2d5   : > { %v2986_v41 = vadd.f32 %v6583_v16, %v2985_v48  ;;  %v2734_v33 = vadd.f32 %v6889_v50, %v2698_v10  ;;  %v7124_v6 = vsub.f32 %v2829_v43, %v7119_v11  ;;  %v7927_v43 = vand.u32 4294901760, %v6814_v24 }
 0x2d7   : > { %vm2766_vm15 = vcmp.gt.f32.partialorder %v2734_v33, 0.0  ;;  %v2798_v0 = vmul.f32 0.01, %v2734_v33  ;;  %v7126_v56 = vadd.f32 %v3286_v21, %v2986_v41  ;;  %v3125_v2 = vand.u32 4294901760, %v7124_v6  ;;  %v7149_v21 = vpop.f32.mrf.mxu0 }
 0x2d9   : > { %3120 = vmatmul.f32.gmra.mxu2 %v3119_v25  ;;  %3357 = vmatmul.f32.gmra.mxu3 %v7119_v11  ;;  %v2830_v20 = vsel %vm2766_vm15, %v2734_v33, %v2798_v0  ;;  %v3126_v1 = vsub.f32 %v7124_v6, %v3125_v2  ;;  %v7928_v25 = vld [vmem:[#allocation45_spill] sm:$0xff] }
 0x2da   : > { %3520 = vmatmul.f32.gmra.mxu0 %v6710_v60  ;;  %v7133_v50 = vand.u32 4294901760, %v2830_v20  ;;  %v7925_v60 = vand.u32 4294901760, %v6778_v39  ;;  %v7173_v48 = vpop.f32.mrf.mxu1 }
 0x2db   : > { %3729 = vmatmul.f32.gmra.mxu1 %v7922_v44  ;;  %v3127_v18 = vand.u32 4294901760, %v3126_v1 }
 0x2dc   : > { %v2993_v34 = vpop.f32.mrf.mxu2  ;;  %v3294_v14 = vpop.f32.mrf.mxu3  ;;  %v7139_v55 = vsub.f32 %v2830_v20, %v7133_v50 }
 0x2dd   : > { %v2994_v32 = vadd.f32 %v6583_v16, %v2993_v34 }
 0x2de   : > { %v3133_v15 = vand.u32 4294901760, %v7139_v55 }
 0x2df   : > { %v7143_v52 = vadd.f32 %v3290_v9, %v2994_v32  ;;  %v7163_v42 = vpop.f32.mrf.mxu0  ;;  %v7178_v9 = vld [vmem:[%s7518_s6] ss:$0 sm:$0xff]  ;;  %v7930_v32 = vld [vmem:[#allocation3_spill] sm:$0xff] }
 0x2e0   : > { %v3134_v51 = vsub.f32 %v7139_v55, %v3133_v15 }
 0x2e1   : > { %3128 = vmatmul.f32.gmra.mxu2 %v3127_v18  ;;  %3361 = vmatmul.f32.gmra.mxu3 %v7133_v50  ;;  %v7931_v18 = vand.u32 4294901760, %v6935_v26 }
 0x2e2   : > { %3525 = vmatmul.f32.gmra.mxu0 %v6778_v39  ;;  %v3135_v37 = vand.u32 4294901760, %v3134_v51  ;;  %v7191_v1 = vpop.f32.mrf.mxu1 }
 0x2e3   : > { %3735 = vmatmul.f32.gmra.mxu1 %v7923_v19 }
 0x2e4   : > { %v3001_v38 = vpop.f32.mrf.mxu2  ;;  %v3298_v36 = vpop.f32.mrf.mxu3 }
 0x2e5   : > { %v3002_v46 = vadd.f32 %v6583_v16, %v3001_v38 }
 0x2e7   : > { %v7155_v63 = vadd.f32 %v3294_v14, %v3002_v46  ;;  %v7181_v41 = vpop.f32.mrf.mxu0  ;;  %v7932_v46 = vld [vmem:[#allocation47_spill] sm:$0xff] }
 0x2e9   : > { %3136 = vmatmul.f32.gmra.mxu2 %v3135_v37  ;;  %4025 = vmatmul.f32.vlgmr.msra.gmra.mxu3 %v7924_v30  ;;  %v7933_v37 = vand.u32 4294901760, %v6997_v7 }
 0x2ea   : > { %3530 = vmatmul.f32.gmra.mxu0 %v6814_v24  ;;  %v7929_v24 = vand.u32 4294901760, %v6908_v23 }
 0x2eb   : > { %3741 = vmatmul.f32.gmra.mxu1 %v7925_v60 }
 0x2ec   : > { %v3009_v22 = vpop.f32.mrf.mxu2  ;;  %v3302_v49 = vpop.f32.mrf.mxu3 }
 0x2ed   : > { %v3010_v5 = vadd.f32 %v6583_v16, %v3009_v22 }
 0x2ef   : > { %v7166_v31 = vadd.f32 %v3298_v36, %v3010_v5  ;;  %v7195_v14 = vpop.f32.mrf.mxu0  ;;  %v7205_v36 = vpop.f32.mrf.mxu1  ;;  %v7934_v5 = vld [vmem:[#allocation51_spill] sm:$0xff] }
 0x2f1   : > { %3864 = vmatmul.f32.vlgmr.msra.gmra.mxu2 %v7924_v30  ;;  %4029 = vmatmul.f32.gmra.mxu3 %v7926_v8 }
 0x2f2   : > { %3535 = vmatmul.f32.gmra.mxu0 %v6908_v23 }
 0x2f3   : > { %3747 = vmatmul.f32.gmra.mxu1 %v7927_v43 }
 0x2f4   : > { %v3017_v39 = vpop.f32.mrf.mxu2  ;;  %v3306_v10 = vpop.f32.mrf.mxu3 }
 0x2f5   : > { %v3018_v16 = vadd.f32 %v7178_v9, %v3017_v39 }
 0x2f7   : > { %v7183_v33 = vadd.f32 %v3302_v49, %v3018_v16  ;;  %v7212_v30 = vpop.f32.mrf.mxu0 }
 0x2f9   : > { %3868 = vmatmul.f32.gmra.mxu2 %v7926_v8  ;;  %4033 = vmatmul.f32.gmra.mxu3 %v7928_v25  ;;  %v7222_v8 = vpop.f32.mrf.mxu1 }
 0x2fa   : > { %3540 = vmatmul.f32.gmra.mxu0 %v6935_v26 }
 0x2fb   : > { %3753 = vmatmul.f32.gmra.mxu1 %v7929_v24 }
 0x2fc   : > { %v3025_v0 = vpop.f32.mrf.mxu2  ;;  %v3310_v20 = vpop.f32.mrf.mxu3 }
 0x2fd   : > { %v3026_v44 = vadd.f32 %v7178_v9, %v3025_v0 }
 0x2ff   : > { %v7193_v34 = vadd.f32 %v3306_v10, %v3026_v44  ;;  %v7225_v10 = vpop.f32.mrf.mxu0 }
 0x301   : > { %3872 = vmatmul.f32.gmra.mxu2 %v7928_v25  ;;  %4037 = vmatmul.f32.gmra.mxu3 %v7930_v32  ;;  %v7935_v25 = vld [vmem:[#allocation63_spill] sm:$0xff]  ;;  %v7235_v0 = vpop.f32.mrf.mxu1 }
 0x302   : > { %3545 = vmatmul.f32.gmra.mxu0 %v6997_v7 }
 0x303   : > { %3759 = vmatmul.f32.gmra.mxu1 %v7931_v18 }
 0x304   : > { %v3033_v23 = vpop.f32.mrf.mxu2  ;;  %v3314_v19 = vpop.f32.mrf.mxu3 }
 0x305   : > { %v3034_v51 = vadd.f32 %v7178_v9, %v3033_v23 }
 0x307   : > { %v7203_v38 = vadd.f32 %v3310_v20, %v3034_v51  ;;  %v7239_v44 = vpop.f32.mrf.mxu0  ;;  %v7937_v51 = vld [vmem:[#allocation54_spill] sm:$0xff] }
 0x309   : > { %3876 = vmatmul.f32.gmra.mxu2 %v7930_v32  ;;  %4041 = vmatmul.f32.gmra.mxu3 %v7932_v46  ;;  %v7936_v32 = vld [vmem:[#allocation6_spill] sm:$0xff] }
 0x30a   : > { %3550 = vmatmul.f32.gmra.mxu0 %v7027_v57 }
 0x30b   : > { %3765 = vmatmul.f32.gmra.mxu1 %v7933_v37 }
 0x30c   : > { %v3041_v26 = vpop.f32.mrf.mxu2  ;;  %v3318_v60 = vpop.f32.mrf.mxu3 }
 0x30d   : > { %v3042_v22 = vadd.f32 %v7178_v9, %v3041_v26 }
 0x30f   : > { %v7215_v49 = vadd.f32 %v3314_v19, %v3042_v22  ;;  %v7249_v19 = vpop.f32.mrf.mxu1 }
 0x311   : > { %3880 = vmatmul.f32.gmra.mxu2 %v7932_v46  ;;  %4045 = vmatmul.f32.gmra.mxu3 %v7934_v5  ;;  %v7253_v46 = vpop.f32.mrf.mxu0 }
 0x312   : > { %3555 = vmatmul.f32.gmra.mxu0 %v7076_v35 }
 0x313   : > { %3771 = vmatmul.f32.gmra.mxu1 %v3101_v62 }
 0x314   : > { %v3049_v7 = vpop.f32.mrf.mxu2  ;;  %v3322_v43 = vpop.f32.mrf.mxu3 }
 0x315   : > { %v3050_v39 = vadd.f32 %v7178_v9, %v3049_v7 }
 0x317   : > { %v7227_v16 = vadd.f32 %v3318_v60, %v3050_v39  ;;  %v7938_v60 = vld [vmem:[#allocation58_spill] sm:$0xff]  ;;  %v7263_v22 = vpop.f32.mrf.mxu1 }
 0x319   : > { %3884 = vmatmul.f32.gmra.mxu2 %v7934_v5  ;;  %4049 = vmatmul.f32.gmra.mxu3 %v7935_v25 }
 0x31a   : > { %3560 = vmatmul.f32.gmra.mxu0 %v7105_v12 }
 0x31b   : > { %3777 = vmatmul.f32.gmra.mxu1 %v3109_v29 }
 0x31c   : > { %v3057_v57 = vpop.f32.mrf.mxu2  ;;  %v3326_v62 = vpop.f32.mrf.mxu3 }
 0x31d   : > { %v3058_v24 = vadd.f32 %v7178_v9, %v3057_v57 }
 0x31f   : > { %v7237_v20 = vadd.f32 %v3322_v43, %v3058_v24  ;;  %v7939_v43 = vld [vmem:[#allocation62_spill] sm:$0xff] }
 0x321   : > { %3888 = vmatmul.f32.gmra.mxu2 %v7935_v25  ;;  %4053 = vmatmul.f32.gmra.mxu3 %v7936_v32 }
 0x322   : > { %3565 = vmatmul.f32.gmra.mxu0 %v7124_v6 }
 0x323   : > { %3783 = vmatmul.f32.gmra.mxu1 %v3117_v45 }
 0x324   : > { %v3065_v35 = vpop.f32.mrf.mxu2  ;;  %v3330_v29 = vpop.f32.mrf.mxu3 }
 0x325   : > { %v3066_v18 = vadd.f32 %v7178_v9, %v3065_v35 }
 0x327   : > { %v7247_v23 = vadd.f32 %v3326_v62, %v3066_v18 }
 0x329   : > { %3892 = vmatmul.f32.gmra.mxu2 %v7936_v32  ;;  %4057 = vmatmul.f32.gmra.mxu3 %v7937_v51 }
 0x32a   : > { %3570 = vmatmul.f32.gmra.mxu0 %v7139_v55  ;;  %v7940_v55 = vld [vmem:[#allocation67_spill] sm:$0xff] }
 0x32b   : > { %3789 = vmatmul.f32.gmra.mxu1 %v3125_v2 }
 0x32c   : > { %v3073_v12 = vpop.f32.mrf.mxu2  ;;  %v3334_v45 = vpop.f32.mrf.mxu3 }
 0x32d   : > { %v3074_v37 = vadd.f32 %v7178_v9, %v3073_v12 }
 0x32f   : > { %v7259_v26 = vadd.f32 %v3330_v29, %v3074_v37  ;;  %v7941_v29 = vld [vmem:[#allocation65_spill] sm:$0xff]  ;;  %v7942_v37 = vld [vmem:[#allocation70_spill] sm:$0xff] }
 0x331   : > { %3896 = vmatmul.f32.gmra.mxu2 %v7937_v51  ;;  %4061 = vmatmul.f32.gmra.mxu3 %v7938_v60 }
 0x333   : > { %3795 = vmatmul.f32.gmra.mxu1 %v3133_v15 }
 0x334   : > { %v3081_v5 = vpop.f32.mrf.mxu2  ;;  %v3338_v7 = vpop.f32.mrf.mxu3 }
 0x335   : > { %v3082_v6 = vadd.f32 %v7178_v9, %v3081_v5 }
 0x337   : > { %v7268_v2 = vadd.f32 %v3334_v45, %v3082_v6 }
 0x339   : > { %3900 = vmatmul.f32.gmra.mxu2 %v7938_v60  ;;  %4065 = vmatmul.f32.gmra.mxu3 %v7939_v43 }
 0x33c   : > { %v3089_v39 = vpop.f32.mrf.mxu2  ;;  %v3342_v25 = vpop.f32.mrf.mxu3 }
 0x33d   : > { %v3090_v57 = vadd.f32 %v7178_v9, %v3089_v39 }
 0x33f   : > { %v7273_v62 = vadd.f32 %v3338_v7, %v3090_v57 }
 0x341   : > { %3904 = vmatmul.f32.gmra.mxu2 %v7939_v43  ;;  %4069 = vmatmul.f32.gmra.mxu3 %v7940_v55  ;;  %v7943_v43 = vld [vmem:[#allocation8_spill] sm:$0xff] }
 0x344   : > { %v3097_v15 = vpop.f32.mrf.mxu2  ;;  %v3346_v24 = vpop.f32.mrf.mxu3 }
 0x345   : > { %v3098_v32 = vadd.f32 %v7178_v9, %v3097_v15  ;;  %v7945_v15 = vld [vmem:[#allocation66_spill] sm:$0xff] }
 0x347   : > { %v7278_v35 = vadd.f32 %v3342_v25, %v3098_v32 }
 0x349   : > { %3908 = vmatmul.f32.gmra.mxu2 %v7940_v55  ;;  %4073 = vmatmul.f32.gmra.mxu3 %v7941_v29 }
 0x34c   : > { %v3105_v18 = vpop.f32.mrf.mxu2  ;;  %v3350_v51 = vpop.f32.mrf.mxu3 }
 0x34d   : > { %v3106_v12 = vadd.f32 %v7178_v9, %v3105_v18 }
 0x34f   : > { %v7283_v45 = vadd.f32 %v3346_v24, %v3106_v12 }
 0x351   : > { %3912 = vmatmul.f32.gmra.mxu2 %v7941_v29  ;;  %4077 = vmatmul.f32.gmra.mxu3 %v7942_v37 }
 0x354   : > { %v3113_v60 = vpop.f32.mrf.mxu2  ;;  %v3354_v5 = vpop.f32.mrf.mxu3 }
 0x355   : > { %v3114_v7 = vadd.f32 %v7178_v9, %v3113_v60 }
 0x357   : > { %v7288_v6 = vadd.f32 %v3350_v51, %v3114_v7  ;;  %v7947_v51 = vld [vmem:[#allocation72_spill] sm:$0xff]  ;;  %v7948_v7 = vld [vmem:[#allocation17_spill] sm:$0xff] }
 0x359   : > { %3916 = vmatmul.f32.gmra.mxu2 %v7942_v37  ;;  %4081 = vmatmul.f32.gmra.mxu3 %v7943_v43 }
 0x35c   : > { %v3121_v39 = vpop.f32.mrf.mxu2  ;;  %v3358_v25 = vpop.f32.mrf.mxu3 }
 0x35d   : > { %v3122_v57 = vadd.f32 %v7178_v9, %v3121_v39  ;;  %v7949_v39 = vld [vmem:[#allocation71_spill] sm:$0xff] }
 0x35f   : > { %v7293_v55 = vadd.f32 %v3354_v5, %v3122_v57 }
 0x361   : > { %7944 = vst [vmem:[#allocation81_spill] sm:$0xff] %v7293_v55  ;;  %3920 = vmatmul.f32.gmra.mxu2 %v7943_v43  ;;  %4085 = vmatmul.f32.gmra.mxu3 %v7945_v15  ;;  %v3417_v43 = vadd.f32 %v7149_v21, %v7948_v7 }
 0x364   : > { %v3129_v24 = vpop.f32.mrf.mxu2  ;;  %v3362_v32 = vpop.f32.mrf.mxu3 }
 0x365   : > { %v3130_v29 = vadd.f32 %v7178_v9, %v3129_v24 }
 0x367   : > { %v7298_v18 = vadd.f32 %v3358_v25, %v3130_v29  ;;  %v3611_v25 = vadd.f32 %v7161_v40, %v3417_v43  ;;  %v7952_v43 = vld [vmem:[#allocation23_spill] sm:$0xff] }
 0x369   : > { %7946 = vst [vmem:[#allocation10_spill] sm:$0xff] %v7298_v18  ;;  %3924 = vmatmul.f32.gmra.mxu2 %v7945_v15  ;;  %4089 = vmatmul.f32.gmra.mxu3 %v7947_v51  ;;  %v7950_v18 = vld [vmem:[#allocation76_spill] sm:$0xff] }
 0x36a   : > { %v3422_v55 = vadd.f32 %v7163_v42, %v7950_v18 }
 0x36c   : > { %v3137_v12 = vpop.f32.mrf.mxu2  ;;  %v4026_v37 = vpop.f32.mrf.mxu3  ;;  %v3617_v21 = vadd.f32 %v7173_v48, %v3422_v55  ;;  %v3427_v48 = vadd.f32 %v7181_v41, %v7952_v43 }
 0x36d   : > { %v3138_v60 = vadd.f32 %v7178_v9, %v3137_v12  ;;  %v4425_v9 = vld [vmem:[%s4651_s10] sm:$0xff]  ;;  %v7328_v55 = vpop.f32.mrf.mxu1 }
 0x36f   : > { %v7303_v5 = vadd.f32 %v3362_v32, %v3138_v60  ;;  %v7951_v32 = vld [vmem:[#allocation11_spill] sm:$0xff]  ;;  %v7324_v60 = vpop.f32.mrf.mxu0 }
 0x371   : > { %3928 = vmatmul.f32.gmra.mxu2 %v7947_v51  ;;  %4093 = vmatmul.f32.gmra.mxu3 %v7949_v39 }
 0x374   : > { %v3865_v57 = vpop.f32.mrf.mxu2  ;;  %v4030_v15 = vpop.f32.mrf.mxu3 }
 0x375   : > { %v3866_v24 = vadd.f32 %v3865_v57, %v3611_v25  ;;  %v7953_v57 = vld [vmem:[#allocation73_spill] sm:$0xff]  ;;  %v7343_v43 = vpop.f32.mrf.mxu1 }
 0x377   : > { %v4027_v29 = vadd.f32 %v4026_v37, %v3866_v24  ;;  %v3623_v24 = vadd.f32 %v7191_v1, %v3427_v48  ;;  %v7955_v1 = vld [vmem:[#allocation4_spill] sm:$0xff] }
 0x379   : > { %v4153_v12 = vadd.f32 %v4425_v9, %v4027_v29  ;;  %3932 = vmatmul.f32.gmra.mxu2 %v7949_v39  ;;  %4097 = vmatmul.f32.gmra.mxu3 %v7951_v32  ;;  %v4426_v39 = vld [vmem:[%s4651_s10 + $0x8] sm:$0xff] }
 0x37b   : > { %vm4185_vm0 = vcmp.gt.f32.partialorder %v4153_v12, 0.0  ;;  %v4217_v40 = vmul.f32 0.01, %v4153_v12 }
 0x37c   : > { %v3869_v51 = vpop.f32.mrf.mxu2  ;;  %v4034_v42 = vpop.f32.mrf.mxu3 }
 0x37d   : > { %v4249_v18 = vsel %vm4185_vm0, %v4153_v12, %v4217_v40  ;;  %v3870_v37 = vadd.f32 %v3869_v51, %v3617_v21  ;;  %v7954_v40 = vld [vmem:[#allocation28_spill] sm:$0xff] }
 0x37e   : > { %4281 = vst [vmem:[%s7321_s29] sm:$0xff] %v4249_v18  ;;  %v3432_v51 = vadd.f32 %v7195_v14, %v7954_v40  ;;  %v7337_v18 = vpop.f32.mrf.mxu0 }
 0x37f   : > { %v4031_v7 = vadd.f32 %v4030_v15, %v3870_v37 }
 0x381   : > { %v4154_v25 = vadd.f32 %v4426_v39, %v4031_v7  ;;  %3936 = vmatmul.f32.gmra.mxu2 %v7951_v32  ;;  %4101 = vmatmul.f32.gmra.mxu3 %v7953_v57  ;;  %v4427_v32 = vld [vmem:[%s4651_s10 + $0x10] sm:$0xff]  ;;  %v3629_v7 = vadd.f32 %v7205_v36, %v3432_v51 }
 0x382   : > { %v7956_v36 = vld [vmem:[#allocation79_spill] sm:$0xff] }
 0x383   : > { %vm4186_vm1 = vcmp.gt.f32.partialorder %v4154_v25, 0.0  ;;  %v4218_v29 = vmul.f32 0.01, %v4154_v25 }
 0x384   : > { %v3873_v9 = vpop.f32.mrf.mxu2  ;;  %v4038_v12 = vpop.f32.mrf.mxu3 }
 0x385   : > { %v4250_v21 = vsel %vm4186_vm1, %v4154_v25, %v4218_v29  ;;  %v3874_v15 = vadd.f32 %v3873_v9, %v3623_v24  ;;  %v3437_v29 = vadd.f32 %v7212_v30, %v6969_v27  ;;  %v4428_v9 = vld [vmem:[%s4651_s10 + $0x18] sm:$0xff]  ;;  %v3442_v30 = vadd.f32 %v7225_v10, %v7011_v61 }
 0x386   : > { %4282 = vst [vmem:[%s7321_s29 + $0x8] sm:$0xff] %v4250_v21 }
 0x387   : > { %v4035_v41 = vadd.f32 %v4034_v42, %v3874_v15  ;;  %v3635_v21 = vadd.f32 %v7222_v8, %v3437_v29  ;;  %v7352_v15 = vpop.f32.mrf.mxu0  ;;  %v7957_v8 = vld [vmem:[#allocation78_spill] sm:$0xff] }
 0x389   : > { %v4155_v37 = vadd.f32 %v4427_v32, %v4035_v41  ;;  %3940 = vmatmul.f32.gmra.mxu2 %v7953_v57  ;;  %4105 = vmatmul.f32.gmra.mxu3 %v7955_v1  ;;  %v7354_v32 = vpop.f32.mrf.mxu1 }
 0x38b   : > { %vm4187_vm2 = vcmp.gt.f32.partialorder %v4155_v37, 0.0  ;;  %v4219_v48 = vmul.f32 0.01, %v4155_v37 }
 0x38c   : > { %v3877_v39 = vpop.f32.mrf.mxu2  ;;  %v4042_v42 = vpop.f32.mrf.mxu3 }
 0x38d   : > { %v4251_v25 = vsel %vm4187_vm2, %v4155_v37, %v4219_v48  ;;  %v3878_v24 = vadd.f32 %v3877_v39, %v3629_v7  ;;  %v3641_v48 = vadd.f32 %v7235_v0, %v3442_v30  ;;  %v7958_v0 = vld [vmem:[#allocation77_spill] sm:$0xff] }
 0x38e   : > { %4283 = vst [vmem:[%s7321_s29 + $0x10] sm:$0xff] %v4251_v25 }
 0x38f   : > { %v4039_v14 = vadd.f32 %v4038_v12, %v3878_v24 }
 0x391   : > { %v4156_v57 = vadd.f32 %v4428_v9, %v4039_v14  ;;  %3944 = vmatmul.f32.gmra.mxu2 %v7955_v1  ;;  %4109 = vmatmul.f32.gmra.mxu3 %v7956_v36  ;;  %v4429_v1 = vld [vmem:[%s4651_s10 + $0x20] sm:$0xff]  ;;  %v7363_v14 = vpop.f32.mrf.mxu0  ;;  %v7366_v61 = vpop.f32.mrf.mxu1  ;;  %v3447_v9 = vadd.f32 %v7239_v44, %v7056_v54  ;;  %v3452_v44 = vadd.f32 %v7253_v46, %v7073_v28 }
 0x392   : > { %v3457_v46 = vadd.f32 %v7324_v60, %v7083_v53  ;;  %v3462_v60 = vadd.f32 %v7337_v18, %v7090_v17  ;;  %v4434_v18 = vld [vmem:[%s4651_s10 + $0x48] sm:$0xff] }
 0x393   : > { %vm4188_vm3 = vcmp.gt.f32.partialorder %v4156_v57, 0.0  ;;  %v4220_v41 = vmul.f32 0.01, %v4156_v57 }
 0x394   : > { %v3881_v40 = vpop.f32.mrf.mxu2  ;;  %v4046_v51 = vpop.f32.mrf.mxu3 }
 0x395   : > { %v4252_v12 = vsel %vm4188_vm3, %v4156_v57, %v4220_v41  ;;  %v3882_v37 = vadd.f32 %v3881_v40, %v3635_v21  ;;  %v4430_v57 = vld [vmem:[%s4651_s10 + $0x28] sm:$0xff]  ;;  %v3647_v21 = vadd.f32 %v7249_v19, %v3447_v9  ;;  %v7959_v19 = vld [vmem:[#allocation12_spill] sm:$0xff] }
 0x396   : > { %4284 = vst [vmem:[%s7321_s29 + $0x18] sm:$0xff] %v4252_v12 }
 0x397   : > { %v4043_v27 = vadd.f32 %v4042_v42, %v3882_v37 }
 0x399   : > { %v4157_v7 = vadd.f32 %v4429_v1, %v4043_v27  ;;  %3948 = vmatmul.f32.gmra.mxu2 %v7956_v36  ;;  %4113 = vmatmul.f32.gmra.mxu3 %v7957_v8  ;;  %v7379_v30 = vpop.f32.mrf.mxu1  ;;  %v4431_v1 = vld [vmem:[%s4651_s10 + $0x30] sm:$0xff] }
 0x39b   : > { %vm4189_vm4 = vcmp.gt.f32.partialorder %v4157_v7, 0.0  ;;  %v4221_v39 = vmul.f32 0.01, %v4157_v7 }
 0x39c   : > { %v3885_v25 = vpop.f32.mrf.mxu2  ;;  %v4050_v24 = vpop.f32.mrf.mxu3 }
 0x39d   : > { %v4253_v29 = vsel %vm4189_vm4, %v4157_v7, %v4221_v39  ;;  %v3886_v42 = vadd.f32 %v3885_v25, %v3641_v48 }
 0x39e   : > { %4285 = vst [vmem:[%s7321_s29 + $0x20] sm:$0xff] %v4253_v29 }
 0x39f   : > { %v4047_v10 = vadd.f32 %v4046_v51, %v3886_v42  ;;  %v7375_v51 = vpop.f32.mrf.mxu0 }
 0x3a1   : > { %v4158_v36 = vadd.f32 %v4430_v57, %v4047_v10  ;;  %3952 = vmatmul.f32.gmra.mxu2 %v7957_v8  ;;  %4117 = vmatmul.f32.gmra.mxu3 %v7958_v0  ;;  %v3653_v8 = vadd.f32 %v7263_v22, %v3452_v44  ;;  %v4432_v10 = vld [vmem:[%s4651_s10 + $0x38] sm:$0xff]  ;;  %v3659_v22 = vadd.f32 %v7328_v55, %v3457_v46  ;;  %v7394_v57 = vpop.f32.mrf.mxu1 }
 0x3a2   : > { %v7960_v55 = vld [vmem:[#allocation80_spill] sm:$0xff] }
 0x3a3   : > { %vm4190_vm5 = vcmp.gt.f32.partialorder %v4158_v36, 0.0  ;;  %v4222_v41 = vmul.f32 0.01, %v4158_v36 }
 0x3a4   : > { %v3889_v40 = vpop.f32.mrf.mxu2  ;;  %v4054_v12 = vpop.f32.mrf.mxu3 }
 0x3a5   : > { %v4254_v37 = vsel %vm4190_vm5, %v4158_v36, %v4222_v41  ;;  %v3890_v27 = vadd.f32 %v3889_v40, %v3647_v21 }
 0x3a6   : > { %4286 = vst [vmem:[%s7321_s29 + $0x28] sm:$0xff] %v4254_v37 }
 0x3a7   : > { %v4051_v54 = vadd.f32 %v4050_v24, %v3890_v27  ;;  %v7388_v42 = vpop.f32.mrf.mxu0  ;;  %v3665_v27 = vadd.f32 %v7343_v43, %v3462_v60 }
 0x3a9   : > { %v4159_v7 = vadd.f32 %v4431_v1, %v4051_v54  ;;  %3956 = vmatmul.f32.gmra.mxu2 %v7958_v0  ;;  %4121 = vmatmul.f32.gmra.mxu3 %v7959_v19 }
 0x3ab   : > { %vm4191_vm6 = vcmp.gt.f32.partialorder %v4159_v7, 0.0  ;;  %v4223_v48 = vmul.f32 0.01, %v4159_v7 }
 0x3ac   : > { %v3893_v39 = vpop.f32.mrf.mxu2  ;;  %v4058_v25 = vpop.f32.mrf.mxu3 }
 0x3ad   : > { %v4255_v29 = vsel %vm4191_vm6, %v4159_v7, %v4223_v48  ;;  %v3894_v24 = vadd.f32 %v3893_v39, %v3653_v8 }
 0x3ae   : > { %4287 = vst [vmem:[%s7321_s29 + $0x30] sm:$0xff] %v4255_v29 }
 0x3af   : > { %v4055_v28 = vadd.f32 %v4054_v12, %v3894_v24  ;;  %v4433_v12 = vld [vmem:[%s4651_s10 + $0x40] sm:$0xff]  ;;  %v7403_v54 = vpop.f32.mrf.mxu0 }
 0x3b1   : > { %v4160_v9 = vadd.f32 %v4432_v10, %v4055_v28  ;;  %3960 = vmatmul.f32.gmra.mxu2 %v7959_v19  ;;  %4125 = vmatmul.f32.gmra.mxu3 %v6919_v4  ;;  %v7405_v19 = vpop.f32.mrf.mxu1 }
 0x3b3   : > { %vm4192_vm7 = vcmp.gt.f32.partialorder %v4160_v9, 0.0  ;;  %v4224_v36 = vmul.f32 0.01, %v4160_v9 }
 0x3b4   : > { %v3897_v0 = vpop.f32.mrf.mxu2  ;;  %v4062_v21 = vpop.f32.mrf.mxu3 }
 0x3b5   : > { %v4256_v41 = vsel %vm4192_vm7, %v4160_v9, %v4224_v36  ;;  %v3898_v40 = vadd.f32 %v3897_v0, %v3659_v22  ;;  %v3472_v9 = vadd.f32 %v7363_v14, %v7109_v13  ;;  %v4435_v22 = vld [vmem:[%s4651_s10 + $0x50] sm:$0xff]  ;;  %v3477_v14 = vadd.f32 %v7375_v51, %v7126_v56 }
 0x3b6   : > { %4288 = vst [vmem:[%s7321_s29 + $0x38] sm:$0xff] %v4256_v41  ;;  %v3482_v51 = vadd.f32 %v7388_v42, %v7143_v52  ;;  %v3487_v42 = vadd.f32 %v7403_v54, %v7155_v63 }
 0x3b7   : > { %v4059_v53 = vadd.f32 %v4058_v25, %v3898_v40  ;;  %v7414_v28 = vpop.f32.mrf.mxu0 }
 0x3b8   : > { %v3492_v54 = vadd.f32 %v7414_v28, %v7166_v31  ;;  %v4440_v28 = vld [vmem:[%s4651_s10 + $0x78] sm:$0xff] }
 0x3b9   : > { %v4161_v37 = vadd.f32 %v4433_v12, %v4059_v53  ;;  %3964 = vmatmul.f32.gmra.mxu2 %v6919_v4  ;;  %4129 = vmatmul.f32.gmra.mxu3 %v7960_v55  ;;  %v3467_v4 = vadd.f32 %v7352_v15, %v7093_v47  ;;  %v7417_v47 = vpop.f32.mrf.mxu1 }
 0x3bb   : > { %vm4193_vm8 = vcmp.gt.f32.partialorder %v4161_v37, 0.0  ;;  %v4225_v44 = vmul.f32 0.01, %v4161_v37  ;;  %v3671_v43 = vadd.f32 %v7354_v32, %v3467_v4  ;;  %v3677_v32 = vadd.f32 %v7366_v61, %v3472_v9 }
 0x3bc   : > { %v3901_v1 = vpop.f32.mrf.mxu2  ;;  %v4066_v7 = vpop.f32.mrf.mxu3  ;;  %v3683_v61 = vadd.f32 %v7379_v30, %v3477_v14  ;;  %v3689_v30 = vadd.f32 %v7394_v57, %v3482_v51  ;;  %v3695_v57 = vadd.f32 %v7405_v19, %v3487_v42  ;;  %v3701_v19 = vadd.f32 %v7417_v47, %v3492_v54 }
 0x3bd   : > { %v4257_v8 = vsel %vm4193_vm8, %v4161_v37, %v4225_v44  ;;  %v3902_v48 = vadd.f32 %v3901_v1, %v3665_v27 }
 0x3be   : > { %4289 = vst [vmem:[%s7321_s29 + $0x40] sm:$0xff] %v4257_v8 }
 0x3bf   : > { %v4063_v17 = vadd.f32 %v4062_v21, %v3902_v48  ;;  %v7426_v60 = vpop.f32.mrf.mxu0  ;;  %v4437_v48 = vld [vmem:[%s4651_s10 + $0x60] sm:$0xff] }
 0x3c0   : > { %v3497_v31 = vadd.f32 %v7426_v60, %v7183_v33 }
 0x3c1   : > { %v4162_v39 = vadd.f32 %v4434_v18, %v4063_v17  ;;  %3968 = vmatmul.f32.gmra.mxu2 %v7960_v55  ;;  %4133 = vmatmul.f32.gmra.mxu3 %v7008_v3  ;;  %v7430_v12 = vpop.f32.mrf.mxu1 }
 0x3c3   : > { %vm4194_vm9 = vcmp.gt.f32.partialorder %v4162_v39, 0.0  ;;  %v4226_v25 = vmul.f32 0.01, %v4162_v39 }
 0x3c4   : > { %v3905_v29 = vpop.f32.mrf.mxu2  ;;  %v4070_v24 = vpop.f32.mrf.mxu3 }
 0x3c5   : > { %v4258_v46 = vsel %vm4194_vm9, %v4162_v39, %v4226_v25  ;;  %v3906_v10 = vadd.f32 %v3905_v29, %v3671_v43  ;;  %v4438_v29 = vld [vmem:[%s4651_s10 + $0x68] sm:$0xff] }
 0x3c6   : > { %4290 = vst [vmem:[%s7321_s29 + $0x48] sm:$0xff] %v4258_v46 }
 0x3c7   : > { %v4067_v15 = vadd.f32 %v4066_v7, %v3906_v10  ;;  %v3501_v8 = vpop.f32.mrf.mxu0 }
 0x3c9   : > { %v4163_v36 = vadd.f32 %v4435_v22, %v4067_v15  ;;  %3972 = vmatmul.f32.gmra.mxu2 %v7008_v3  ;;  %4137 = vmatmul.f32.gmra.mxu3 %v7068_v59  ;;  %v4436_v3 = vld [vmem:[%s4651_s10 + $0x58] sm:$0xff]  ;;  %v3712_v17 = vpop.f32.mrf.mxu1 }
 0x3cb   : > { %vm4195_vm10 = vcmp.gt.f32.partialorder %v4163_v36, 0.0  ;;  %v4227_v0 = vmul.f32 0.01, %v4163_v36 }
 0x3cc   : > { %v3909_v21 = vpop.f32.mrf.mxu2  ;;  %v4074_v41 = vpop.f32.mrf.mxu3 }
 0x3cd   : > { %v4259_v40 = vsel %vm4195_vm10, %v4163_v36, %v4227_v0  ;;  %v3910_v53 = vadd.f32 %v3909_v21, %v3677_v32 }
 0x3ce   : > { %4291 = vst [vmem:[%s7321_s29 + $0x50] sm:$0xff] %v4259_v40 }
 0x3cf   : > { %v4071_v13 = vadd.f32 %v4070_v24, %v3910_v53  ;;  %v3506_v24 = vpop.f32.mrf.mxu0 }
 0x3d1   : > { %v4164_v37 = vadd.f32 %v4436_v3, %v4071_v13  ;;  %3976 = vmatmul.f32.gmra.mxu2 %v7068_v59  ;;  %4141 = vmatmul.f32.gmra.mxu3 %v7100_v58  ;;  %v3718_v9 = vpop.f32.mrf.mxu1 }
 0x3d3   : > { %vm4196_vm11 = vcmp.gt.f32.partialorder %v4164_v37, 0.0  ;;  %v4228_v55 = vmul.f32 0.01, %v4164_v37 }
 0x3d4   : > { %v3913_v27 = vpop.f32.mrf.mxu2  ;;  %v4078_v44 = vpop.f32.mrf.mxu3 }
 0x3d5   : > { %v4260_v1 = vsel %vm4196_vm11, %v4164_v37, %v4228_v55  ;;  %v3914_v7 = vadd.f32 %v3913_v27, %v3683_v61 }
 0x3d6   : > { %4292 = vst [vmem:[%s7321_s29 + $0x58] sm:$0xff] %v4260_v1 }
 0x3d7   : > { %v4075_v56 = vadd.f32 %v4074_v41, %v3914_v7  ;;  %v3511_v40 = vpop.f32.mrf.mxu0 }
 0x3d9   : > { %v4165_v59 = vadd.f32 %v4437_v48, %v4075_v56  ;;  %3980 = vmatmul.f32.gmra.mxu2 %v7100_v58  ;;  %4145 = vmatmul.f32.gmra.mxu3 %v7119_v11  ;;  %v3724_v14 = vpop.f32.mrf.mxu1  ;;  %v3502_v56 = vadd.f32 %v3501_v8, %v7193_v34  ;;  %v4441_v48 = vld [vmem:[%s4651_s10 + $0x80] sm:$0xff] }
 0x3db   : > { %vm4197_vm12 = vcmp.gt.f32.partialorder %v4165_v59, 0.0  ;;  %v4229_v4 = vmul.f32 0.01, %v4165_v59  ;;  %v3713_v60 = vadd.f32 %v3712_v17, %v3502_v56 }
 0x3dc   : > { %v3917_v18 = vpop.f32.mrf.mxu2  ;;  %v4082_v39 = vpop.f32.mrf.mxu3 }
 0x3dd   : > { %v4261_v43 = vsel %vm4197_vm12, %v4165_v59, %v4229_v4  ;;  %v3918_v25 = vadd.f32 %v3917_v18, %v3689_v30 }
 0x3de   : > { %4293 = vst [vmem:[%s7321_s29 + $0x60] sm:$0xff] %v4261_v43  ;;  %v3507_v43 = vadd.f32 %v3506_v24, %v7203_v38 }
 0x3df   : > { %v4079_v52 = vadd.f32 %v4078_v44, %v3918_v25  ;;  %v3516_v1 = vpop.f32.mrf.mxu0 }
 0x3e0   : > { %v3719_v34 = vadd.f32 %v3718_v9, %v3507_v43 }
 0x3e1   : > { %v4166_v58 = vadd.f32 %v4438_v29, %v4079_v52  ;;  %3984 = vmatmul.f32.gmra.mxu2 %v7119_v11  ;;  %4149 = vmatmul.f32.gmra.mxu3 %v7133_v50  ;;  %v4439_v11 = vld [vmem:[%s4651_s10 + $0x70] sm:$0xff]  ;;  %v3730_v51 = vpop.f32.mrf.mxu1  ;;  %v4442_v52 = vld [vmem:[%s4651_s10 + $0x88] sm:$0xff] }
 0x3e3   : > { %vm4198_vm13 = vcmp.gt.f32.partialorder %v4166_v58, 0.0  ;;  %v4230_v46 = vmul.f32 0.01, %v4166_v58 }
 0x3e4   : > { %v3921_v10 = vpop.f32.mrf.mxu2  ;;  %v4086_v15 = vpop.f32.mrf.mxu3 }
 0x3e5   : > { %v4262_v22 = vsel %vm4198_vm13, %v4166_v58, %v4230_v46  ;;  %v3922_v36 = vadd.f32 %v3921_v10, %v3695_v57 }
 0x3e6   : > { %4294 = vst [vmem:[%s7321_s29 + $0x68] sm:$0xff] %v4262_v22  ;;  %v4443_v22 = vld [vmem:[%s4651_s10 + $0x90] sm:$0xff] }
 0x3e7   : > { %v4083_v63 = vadd.f32 %v4082_v39, %v3922_v36  ;;  %v3521_v25 = vpop.f32.mrf.mxu0 }
 0x3e9   : > { %v4167_v32 = vadd.f32 %v4439_v11, %v4083_v63  ;;  %3988 = vmatmul.f32.gmra.mxu2 %v7133_v50  ;;  %v3707_v50 = vadd.f32 %v7430_v12, %v3497_v31  ;;  %v3736_v8 = vpop.f32.mrf.mxu1 }
 0x3eb   : > { %vm4199_vm14 = vcmp.gt.f32.partialorder %v4167_v32, 0.0  ;;  %v4231_v0 = vmul.f32 0.01, %v4167_v32 }
 0x3ec   : > { %v3925_v21 = vpop.f32.mrf.mxu2  ;;  %v4090_v41 = vpop.f32.mrf.mxu3 }
 0x3ed   : > { %v4263_v53 = vsel %vm4199_vm14, %v4167_v32, %v4231_v0  ;;  %v3926_v13 = vadd.f32 %v3925_v21, %v3701_v19  ;;  %v3517_v21 = vadd.f32 %v3516_v1, %v7227_v16 }
 0x3ee   : > { %4295 = vst [vmem:[%s7321_s29 + $0x70] sm:$0xff] %v4263_v53 }
 0x3ef   : > { %v4087_v3 = vadd.f32 %v4086_v15, %v3926_v13  ;;  %v3512_v15 = vadd.f32 %v3511_v40, %v7215_v49  ;;  %v3526_v24 = vpop.f32.mrf.mxu0  ;;  %v3731_v49 = vadd.f32 %v3730_v51, %v3517_v21 }
 0x3f1   : > { %v4168_v37 = vadd.f32 %v4440_v28, %v4087_v3  ;;  %v3725_v38 = vadd.f32 %v3724_v14, %v3512_v15  ;;  %v3742_v11 = vpop.f32.mrf.mxu1 }
 0x3f3   : > { %vm4200_vm15 = vcmp.gt.f32.partialorder %v4168_v37, 0.0  ;;  %v4232_v47 = vmul.f32 0.01, %v4168_v37 }
 0x3f4   : > { %v3929_v61 = vpop.f32.mrf.mxu2  ;;  %v4094_v55 = vpop.f32.mrf.mxu3 }
 0x3f5   : > { %v4264_v27 = vsel %vm4200_vm15, %v4168_v37, %v4232_v47  ;;  %v3930_v44 = vadd.f32 %v3929_v61, %v3707_v50  ;;  %v3522_v47 = vadd.f32 %v3521_v25, %v7237_v20  ;;  %v4445_v61 = vld [vmem:[%s4651_s10 + $0xa0] sm:$0xff] }
 0x3f6   : > { %4296 = vst [vmem:[%s7321_s29 + $0x78] sm:$0xff] %v4264_v27 }
 0x3f7   : > { %v4091_v7 = vadd.f32 %v4090_v41, %v3930_v44  ;;  %v4444_v41 = vld [vmem:[%s4651_s10 + $0x98] sm:$0xff]  ;;  %v3531_v3 = vpop.f32.mrf.mxu0  ;;  %v3737_v16 = vadd.f32 %v3736_v8, %v3522_v47  ;;  %v4450_v47 = vld [vmem:[%s4651_s10 + $0xc8] sm:$0xff] }
 0x3f9   : > { %v4169_v33 = vadd.f32 %v4441_v48, %v4091_v7  ;;  %v3748_v37 = vpop.f32.mrf.mxu1 }
 0x3fb   : > { %vm4201_vm0 = vcmp.gt.f32.partialorder %v4169_v33, 0.0  ;;  %v4233_v59 = vmul.f32 0.01, %v4169_v33 }
 0x3fc   : > { %v3933_v12 = vpop.f32.mrf.mxu2  ;;  %v4098_v30 = vpop.f32.mrf.mxu3 }
 0x3fd   : > { %v4265_v4 = vsel %vm4201_vm0, %v4169_v33, %v4233_v59  ;;  %v3934_v18 = vadd.f32 %v3933_v12, %v3713_v60  ;;  %v3527_v33 = vadd.f32 %v3526_v24, %v7247_v23  ;;  %v4446_v59 = vld [vmem:[%s4651_s10 + $0xa8] sm:$0xff] }
 0x3fe   : > { %4297 = vst [vmem:[%s7321_s29 + $0x80] sm:$0xff] %v4265_v4 }
 0x3ff   : > { %v4095_v39 = vadd.f32 %v4094_v55, %v3934_v18  ;;  %v3536_v51 = vpop.f32.mrf.mxu0  ;;  %v3743_v20 = vadd.f32 %v3742_v11, %v3527_v33 }
 0x401   : > { %v4170_v42 = vadd.f32 %v4442_v52, %v4095_v39  ;;  %v3754_v60 = vpop.f32.mrf.mxu1  ;;  %v3532_v52 = vadd.f32 %v3531_v3, %v7259_v26 }
 0x403   : > { %vm4202_vm1 = vcmp.gt.f32.partialorder %v4170_v42, 0.0  ;;  %v4234_v29 = vmul.f32 0.01, %v4170_v42  ;;  %v3749_v23 = vadd.f32 %v3748_v37, %v3532_v52 }
 0x404   : > { %v3937_v17 = vpop.f32.mrf.mxu2  ;;  %v4102_v58 = vpop.f32.mrf.mxu3 }
 0x405   : > { %v4266_v57 = vsel %vm4202_vm1, %v4170_v42, %v4234_v29  ;;  %v3938_v46 = vadd.f32 %v3937_v17, %v3719_v34  ;;  %v4447_v34 = vld [vmem:[%s4651_s10 + $0xb0] sm:$0xff] }
 0x406   : > { %4298 = vst [vmem:[%s7321_s29 + $0x88] sm:$0xff] %v4266_v57 }
 0x407   : > { %v4099_v10 = vadd.f32 %v4098_v30, %v3938_v46  ;;  %v3541_v42 = vpop.f32.mrf.mxu0 }
 0x408   : > { %v3542_v21 = vadd.f32 %v3541_v42, %v7273_v62 }
 0x409   : > { %v4171_v36 = vadd.f32 %v4443_v22, %v4099_v10  ;;  %v3760_v29 = vpop.f32.mrf.mxu1  ;;  %v3537_v22 = vadd.f32 %v3536_v51, %v7268_v2 }
 0x40a   : > { %v3761_v2 = vadd.f32 %v3760_v29, %v3542_v21 }
 0x40b   : > { %vm4203_vm2 = vcmp.gt.f32.partialorder %v4171_v36, 0.0  ;;  %v4235_v63 = vmul.f32 0.01, %v4171_v36  ;;  %v3755_v26 = vadd.f32 %v3754_v60, %v3537_v22 }
 0x40c   : > { %v3941_v9 = vpop.f32.mrf.mxu2  ;;  %v4106_v54 = vpop.f32.mrf.mxu3 }
 0x40d   : > { %v4267_v32 = vsel %vm4203_vm2, %v4171_v36, %v4235_v63  ;;  %v3942_v19 = vadd.f32 %v3941_v9, %v3725_v38  ;;  %v4448_v36 = vld [vmem:[%s4651_s10 + $0xb8] sm:$0xff] }
 0x40e   : > { %4299 = vst [vmem:[%s7321_s29 + $0x90] sm:$0xff] %v4267_v32 }
 0x40f   : > { %v4103_v0 = vadd.f32 %v4102_v58, %v3942_v19  ;;  %v3546_v24 = vpop.f32.mrf.mxu0 }
 0x411   : > { %v4172_v53 = vadd.f32 %v4444_v41, %v4103_v0  ;;  %v3766_v19 = vpop.f32.mrf.mxu1  ;;  %v4449_v41 = vld [vmem:[%s4651_s10 + $0xc0] sm:$0xff] }
 0x413   : > { %vm4204_vm3 = vcmp.gt.f32.partialorder %v4172_v53, 0.0  ;;  %v4236_v40 = vmul.f32 0.01, %v4172_v53 }
 0x414   : > { %v3945_v13 = vpop.f32.mrf.mxu2  ;;  %v4110_v14 = vpop.f32.mrf.mxu3 }
 0x415   : > { %v4268_v31 = vsel %vm4204_vm3, %v4172_v53, %v4236_v40  ;;  %v3946_v28 = vadd.f32 %v3945_v13, %v3731_v49 }
 0x416   : > { %4300 = vst [vmem:[%s7321_s29 + $0x98] sm:$0xff] %v4268_v31 }
 0x417   : > { %v4107_v50 = vadd.f32 %v4106_v54, %v3946_v28  ;;  %v3551_v31 = vpop.f32.mrf.mxu0 }
 0x418   : > { %v3552_v51 = vadd.f32 %v3551_v31, %v7283_v45  ;;  %v4455_v31 = vld [vmem:[%s4651_s10 + $0xf0] sm:$0xff] }
 0x419   : > { %v4173_v55 = vadd.f32 %v4445_v61, %v4107_v50  ;;  %v3772_v37 = vpop.f32.mrf.mxu1  ;;  %v3547_v50 = vadd.f32 %v3546_v24, %v7278_v35 }
 0x41a   : > { %v3773_v35 = vadd.f32 %v3772_v37, %v3552_v51 }
 0x41b   : > { %vm4205_vm4 = vcmp.gt.f32.partialorder %v4173_v55, 0.0  ;;  %v4237_v27 = vmul.f32 0.01, %v4173_v55  ;;  %v3767_v62 = vadd.f32 %v3766_v19, %v3547_v50 }
 0x41c   : > { %v3949_v44 = vpop.f32.mrf.mxu2  ;;  %v4114_v1 = vpop.f32.mrf.mxu3 }
 0x41d   : > { %v4269_v7 = vsel %vm4205_vm4, %v4173_v55, %v4237_v27  ;;  %v3950_v56 = vadd.f32 %v3949_v44, %v3737_v16 }
 0x41e   : > { %4301 = vst [vmem:[%s7321_s29 + $0xa0] sm:$0xff] %v4269_v7 }
 0x41f   : > { %v4111_v48 = vadd.f32 %v4110_v14, %v3950_v56  ;;  %v3556_v56 = vpop.f32.mrf.mxu0 }
 0x421   : > { %v4174_v12 = vadd.f32 %v4446_v59, %v4111_v48  ;;  %v4451_v48 = vld [vmem:[%s4651_s10 + $0xd0] sm:$0xff]  ;;  %v3778_v60 = vpop.f32.mrf.mxu1 }
 0x423   : > { %vm4206_vm5 = vcmp.gt.f32.partialorder %v4174_v12, 0.0  ;;  %v4238_v30 = vmul.f32 0.01, %v4174_v12 }
 0x424   : > { %v3953_v4 = vpop.f32.mrf.mxu2  ;;  %v4118_v18 = vpop.f32.mrf.mxu3 }
 0x425   : > { %v4270_v39 = vsel %vm4206_vm5, %v4174_v12, %v4238_v30  ;;  %v3954_v43 = vadd.f32 %v3953_v4, %v3743_v20 }
 0x426   : > { %4302 = vst [vmem:[%s7321_s29 + $0xa8] sm:$0xff] %v4270_v39  ;;  %v3557_v39 = vadd.f32 %v3556_v56, %v7288_v6 }
 0x427   : > { %v4115_v25 = vadd.f32 %v4114_v1, %v3954_v43  ;;  %v4452_v43 = vld [vmem:[%s4651_s10 + $0xd8] sm:$0xff]  ;;  %v3561_v52 = vpop.f32.mrf.mxu0 }
 0x428   : > { %v3779_v45 = vadd.f32 %v3778_v60, %v3557_v39 }
 0x429   : > { %v4175_v8 = vadd.f32 %v4447_v34, %v4115_v25  ;;  %v3784_v34 = vpop.f32.mrf.mxu1 }
 0x42b   : > { %vm4207_vm6 = vcmp.gt.f32.partialorder %v4175_v8, 0.0  ;;  %v4239_v17 = vmul.f32 0.01, %v4175_v8 }
 0x42c   : > { %v3957_v58 = vpop.f32.mrf.mxu2  ;;  %v4122_v57 = vpop.f32.mrf.mxu3 }
 0x42d   : > { %v4271_v46 = vsel %vm4207_vm6, %v4175_v8, %v4239_v17  ;;  %v3958_v10 = vadd.f32 %v3957_v58, %v3749_v23  ;;  %v7961_v58 = vld [vmem:[#allocation81_spill] sm:$0xff] }
 0x42e   : > { %4303 = vst [vmem:[%s7321_s29 + $0xb0] sm:$0xff] %v4271_v46  ;;  %v4453_v46 = vld [vmem:[%s4651_s10 + $0xe0] sm:$0xff] }
 0x42f   : > { %v4119_v15 = vadd.f32 %v4118_v18, %v3958_v10 }
 0x431   : > { %v4176_v38 = vadd.f32 %v4448_v36, %v4119_v15  ;;  %v3566_v36 = vpop.f32.mrf.mxu0 }
 0x433   : > { %vm4208_vm7 = vcmp.gt.f32.partialorder %v4176_v38, 0.0  ;;  %v4240_v63 = vmul.f32 0.01, %v4176_v38 }
 0x434   : > { %v3961_v9 = vpop.f32.mrf.mxu2  ;;  %v4126_v54 = vpop.f32.mrf.mxu3 }
 0x435   : > { %v4272_v11 = vsel %vm4208_vm7, %v4176_v38, %v4240_v63  ;;  %v3962_v32 = vadd.f32 %v3961_v9, %v3755_v26  ;;  %v3790_v63 = vpop.f32.mrf.mxu1 }
 0x436   : > { %4304 = vst [vmem:[%s7321_s29 + $0xb8] sm:$0xff] %v4272_v11 }
 0x437   : > { %v4123_v0 = vadd.f32 %v4122_v57, %v3962_v32  ;;  %v3562_v57 = vadd.f32 %v3561_v52, %v7961_v58  ;;  %v4454_v32 = vld [vmem:[%s4651_s10 + $0xe8] sm:$0xff] }
 0x439   : > { %v4177_v53 = vadd.f32 %v4449_v41, %v4123_v0  ;;  %v3785_v6 = vadd.f32 %v3784_v34, %v3562_v57 }
 0x43b   : > { %vm4209_vm8 = vcmp.gt.f32.partialorder %v4177_v53, 0.0  ;;  %v4241_v49 = vmul.f32 0.01, %v4177_v53 }
 0x43c   : > { %v3965_v40 = vpop.f32.mrf.mxu2  ;;  %v4130_v13 = vpop.f32.mrf.mxu3 }
 0x43d   : > { %v4273_v14 = vsel %vm4209_vm8, %v4177_v53, %v4241_v49  ;;  %v3966_v3 = vadd.f32 %v3965_v40, %v3761_v2  ;;  %v3571_v40 = vpop.f32.mrf.mxu0 }
 0x43e   : > { %4305 = vst [vmem:[%s7321_s29 + $0xc0] sm:$0xff] %v4273_v14  ;;  %v3796_v14 = vpop.f32.mrf.mxu1 }
 0x43f   : > { %v4127_v28 = vadd.f32 %v4126_v54, %v3966_v3  ;;  %v7962_v54 = vld [vmem:[#allocation10_spill] sm:$0xff]  ;;  %v3572_v3 = vadd.f32 %v3571_v40, %v7303_v5 }
 0x440   : > { %v3567_v11 = vadd.f32 %v3566_v36, %v7962_v54 }
 0x441   : > { %v4178_v61 = vadd.f32 %v4450_v47, %v4127_v28  ;;  %v3797_v37 = vadd.f32 %v3796_v14, %v3572_v3 }
 0x442   : > { %v3791_v0 = vadd.f32 %v3790_v63, %v3567_v11 }
 0x443   : > { %vm4210_vm9 = vcmp.gt.f32.partialorder %v4178_v61, 0.0  ;;  %v4242_v55 = vmul.f32 0.01, %v4178_v61 }
 0x444   : > { %v3969_v16 = vpop.f32.mrf.mxu2  ;;  %v4134_v1 = vpop.f32.mrf.mxu3 }
 0x445   : > { %v4274_v27 = vsel %vm4210_vm9, %v4178_v61, %v4242_v55  ;;  %v3970_v44 = vadd.f32 %v3969_v16, %v3767_v62 }
 0x446   : > { %4306 = vst [vmem:[%s7321_s29 + $0xc8] sm:$0xff] %v4274_v27  ;;  %v4456_v27 = vld [vmem:[%s4651_s10 + $0xf8] sm:$0xff] }
 0x447   : > { %v4131_v7 = vadd.f32 %v4130_v13, %v3970_v44 }
 0x449   : > { %v4179_v33 = vadd.f32 %v4451_v48, %v4131_v7 }
 0x44b   : > { %vm4211_vm10 = vcmp.gt.f32.partialorder %v4179_v33, 0.0  ;;  %v4243_v59 = vmul.f32 0.01, %v4179_v33 }
 0x44c   : > { %v3973_v12 = vpop.f32.mrf.mxu2  ;;  %v4138_v18 = vpop.f32.mrf.mxu3 }
 0x44d   : > { %v4275_v20 = vsel %vm4211_vm10, %v4179_v33, %v4243_v59  ;;  %v3974_v30 = vadd.f32 %v3973_v12, %v3773_v35 }
 0x44e   : > { %4307 = vst [vmem:[%s7321_s29 + $0xd0] sm:$0xff] %v4275_v20 }
 0x44f   : > { %v4135_v4 = vadd.f32 %v4134_v1, %v3974_v30 }
 0x451   : > { %v4180_v25 = vadd.f32 %v4452_v43, %v4135_v4 }
 0x453   : > { %vm4212_vm11 = vcmp.gt.f32.partialorder %v4180_v25, 0.0  ;;  %v4244_v42 = vmul.f32 0.01, %v4180_v25 }
 0x454   : > { %v3977_v8 = vpop.f32.mrf.mxu2  ;;  %v4142_v15 = vpop.f32.mrf.mxu3 }
 0x455   : > { %v4276_v23 = vsel %vm4212_vm11, %v4180_v25, %v4244_v42  ;;  %v3978_v29 = vadd.f32 %v3977_v8, %v3779_v45 }
 0x456   : > { %4308 = vst [vmem:[%s7321_s29 + $0xd8] sm:$0xff] %v4276_v23 }
 0x457   : > { %v4139_v17 = vadd.f32 %v4138_v18, %v3978_v29 }
 0x459   : > { %v4181_v10 = vadd.f32 %v4453_v46, %v4139_v17 }
 0x45b   : > { %vm4213_vm12 = vcmp.gt.f32.partialorder %v4181_v10, 0.0  ;;  %v4245_v22 = vmul.f32 0.01, %v4181_v10 }
 0x45c   : > { %v3981_v38 = vpop.f32.mrf.mxu2  ;;  %v4146_v41 = vpop.f32.mrf.mxu3 }
 0x45d   : > { %v4277_v26 = vsel %vm4213_vm12, %v4181_v10, %v4245_v22  ;;  %v3982_v24 = vadd.f32 %v3981_v38, %v3785_v6 }
 0x45e   : > { %4309 = vst [vmem:[%s7321_s29 + $0xe0] sm:$0xff] %v4277_v26 }
 0x45f   : > { %v4143_v9 = vadd.f32 %v4142_v15, %v3982_v24 }
 0x461   : > { %v4182_v19 = vadd.f32 %v4454_v32, %v4143_v9 }
 0x463   : > { %vm4214_vm13 = vcmp.gt.f32.partialorder %v4182_v19, 0.0  ;;  %v4246_v21 = vmul.f32 0.01, %v4182_v19 }
 0x464   : > { %v3985_v53 = vpop.f32.mrf.mxu2  ;;  %v4150_v55 = vpop.f32.mrf.mxu3 }
 0x465   : > { %v4278_v2 = vsel %vm4214_vm13, %v4182_v19, %v4246_v21  ;;  %v3986_v49 = vadd.f32 %v3985_v53, %v3791_v0 }
 0x466   : > { %4310 = vst [vmem:[%s7321_s29 + $0xe8] sm:$0xff] %v4278_v2 }
 0x467   : > { %v4147_v13 = vadd.f32 %v4146_v41, %v3986_v49 }
 0x469   : > { %v4183_v28 = vadd.f32 %v4455_v31, %v4147_v13 }
 0x46b   : > { %vm4215_vm14 = vcmp.gt.f32.partialorder %v4183_v28, 0.0  ;;  %v4247_v50 = vmul.f32 0.01, %v4183_v28 }
 0x46c   : > { %v3989_v47 = vpop.f32.mrf.mxu2 }
 0x46d   : > { %v4279_v61 = vsel %vm4215_vm14, %v4183_v28, %v4247_v50  ;;  %v3990_v62 = vadd.f32 %v3989_v47, %v3797_v37 }
 0x46e   : > { %4311 = vst [vmem:[%s7321_s29 + $0xf0] sm:$0xff] %v4279_v61 }
 0x46f   : > { %v4151_v16 = vadd.f32 %v4150_v55, %v3990_v62 }
 0x471   : > { %v4184_v44 = vadd.f32 %v4456_v27, %v4151_v16 }
 0x473   : > { %vm4216_vm15 = vcmp.gt.f32.partialorder %v4184_v44, 0.0  ;;  %v4248_v1 = vmul.f32 0.01, %v4184_v44 }
 0x475   : > { %v4280_v7 = vsel %vm4216_vm15, %v4184_v44, %v4248_v1 }
 0x476   : > { %4312 = vst [vmem:[%s7321_s29 + $0xf8] sm:$0xff] %v4280_v7 }
 0x477 PF: > { %s17_s24 = sadd.s32 1, %s4463_s24  }
 0x478   : > { %p14_p4 = scmp.ge.s32.totalorder %s17_s24, 4  }
 0x47a   :  { %16 = sbr.rel (!%p14_p4) target bundleno = 1 (0x1), region = 80 }

</bundles_post_ra>
